<compile_context>
chip_gen: v5e
topology: v5e:2x2
jax: 0.10.0
libtpu: 0.0.40
codegen_flags: <defaults>
</compile_context>

<pallas_src>
import functools
import math

import jax
import jax.numpy as jnp
import numpy as np
from jax.experimental import pallas as pl
from jax.experimental.pallas import tpu as pltpu


def _make_red(emb):
    """Segment-reduce matrix: red[p, i] = 1 if p // emb == i (host-side, 0/1)."""
    p = np.arange(emb * emb)
    red = (p[:, None] // emb == np.arange(emb)[None, :]).astype(np.float32)
    return jnp.asarray(red)                                    # (E*E, E)


def _layernorm(x, g, b, eps):
    mu = jnp.mean(x, axis=-1, keepdims=True)
    xc = x - mu
    var = jnp.mean(xc * xc, axis=-1, keepdims=True)
    return xc * jax.lax.rsqrt(var + eps) * g + b


def _accumulate_tile(idx_ref, ea_ref, h_ref, w_ref, red_ref, acc, *, compute_dtype):
    """Scatter contribution of one edge tile, added into the f32 (N, E) acc."""
    cd = compute_dtype
    tm = ea_ref.shape[0]
    n_nodes, emb = h_ref.shape

    # --- edge MLP: one fused lane-dense MXU matmul (bias folded into W) -----
    lin = jnp.dot(ea_ref[...], w_ref[...],
                  preferred_element_type=jnp.float32)          # (TM, E*E) f32

    # --- one-hot selectors for this tile (0/1 -> exact in bf16 too) ---------
    src = idx_ref[:, 0:1]                                      # (TM, 1) int32
    dst = idx_ref[:, 1:2]                                      # (TM, 1) int32
    node_ids = jax.lax.broadcasted_iota(jnp.int32, (tm, n_nodes), 1)
    sel_src = (node_ids == src).astype(cd)                     # (TM, N)
    sel_dst = (node_ids == dst).astype(cd)                     # (TM, N)

    # --- gather h[src] on the MXU: (TM, N) @ (N, E) -------------------------
    hs = jnp.dot(sel_src, h_ref[...].astype(cd),
                 preferred_element_type=jnp.float32)           # (TM, E) f32

    # --- per-edge mat-vec: msg[e, i] = sum_j lin[e, i*E + j] * hs[e, j] -----
    # hs_rep[e, i*E + j] = hs[e, j] via lane concat (frees the MXU; no padded
    # replicate-matmul, no (E, E*E) resident constant).
    hs_rep = jnp.concatenate([hs] * emb, axis=1)               # (TM, E*E)
    msg = jnp.dot((lin * hs_rep).astype(cd), red_ref[...],
                  preferred_element_type=jnp.float32)          # (TM, E) f32

    # --- scatter-add to destination nodes: sel_dst^T @ msg ------------------
    return acc + jax.lax.dot_general(
        sel_dst, msg.astype(cd),
        dimension_numbers=(((0,), (0,)), ((), ())),
        preferred_element_type=jnp.float32)                    # (N, E) f32


def _fused_kernel(idx_ref, ea_ref, h_ref, w_ref, red_ref, g_ref, beta_ref,
                  o_ref, acc_ref, *, eps, compute_dtype):
    t = pl.program_id(0)

    @pl.when(t == 0)
    def _init():
        acc_ref[...] = jnp.zeros_like(acc_ref)

    acc_ref[...] = _accumulate_tile(idx_ref, ea_ref, h_ref, w_ref, red_ref,
                                    acc_ref[...], compute_dtype=compute_dtype)

    @pl.when(t == pl.num_programs(0) - 1)
    def _finalize():
        o_ref[...] = _layernorm(h_ref[...] + acc_ref[...],
                                g_ref[...], beta_ref[...], eps)


def _partial_agg_kernel(idx_ref, ea_ref, h_ref, w_ref, red_ref, part_ref, *,
                        compute_dtype):
    t = pl.program_id(1)

    @pl.when(t == 0)
    def _init():
        part_ref[...] = jnp.zeros_like(part_ref)

    part_ref[...] = _accumulate_tile(idx_ref, ea_ref, h_ref, w_ref, red_ref,
                                     part_ref[...], compute_dtype=compute_dtype)


def _finalize_kernel(part_ref, h_ref, g_ref, beta_ref, o_ref, *, eps):
    agg = part_ref[0]
    for c in range(1, part_ref.shape[0]):
        agg = agg + part_ref[c]
    o_ref[...] = _layernorm(h_ref[...] + agg, g_ref[...], beta_ref[...], eps)


def edge_network(h, ei, ea, params, *, edge_tile=256, eps=1e-5, num_cores=1,
                 compute_dtype=jnp.float32, vmem_limit_bytes=32 * 1024 * 1024):
    """h: (N, E) f32; ei: (2, M) int32 [row0 = dst, row1 = src]; ea: (M, K) f32."""
    n_nodes, emb = h.shape
    m_edges, in_dim = ea.shape

    # Bias fold: ea gets a ones column, W gets b as an extra row.
    w_aug = jnp.concatenate([params["w"], params["b"]], axis=0).astype(compute_dtype)
    ea_aug = jnp.concatenate([ea, jnp.ones((m_edges, 1), ea.dtype)], axis=1)

    # Packed (src, dst) index stream: one DMA per tile instead of two.
    idx = jnp.stack([ei[1], ei[0]], axis=1).astype(jnp.int32)   # (M, 2)

    # Pad edges to a multiple of edge_tile * num_cores.  Padded rows use an
    # out-of-range dst (== n_nodes): their one-hot scatter row is all-zero so
    # they contribute nothing to any node's accumulator.
    pad_to = edge_tile * num_cores
    m_pad = ((m_edges + pad_to - 1) // pad_to) * pad_to
    if m_pad != m_edges:
        pad = m_pad - m_edges
        idx = jnp.concatenate(
            [idx, jnp.full((pad, 2), n_nodes, jnp.int32)], axis=0)
        ea_aug = jnp.concatenate(
            [ea_aug, jnp.zeros((pad, in_dim + 1), ea_aug.dtype)], axis=0)
    ea_aug = ea_aug.astype(compute_dtype)

    red = _make_red(emb).astype(compute_dtype)
    gamma, beta = params["gamma"], params["beta"]
    n_tiles = m_pad // edge_tile

    def inv(shape, index_map):
        # Grid-invariant operand: constant index map + single buffering.
        return pl.BlockSpec(shape, index_map, pipeline_mode=pl.Buffered(1))

    if num_cores == 1:
        zero1 = lambda t: (0, 0)
        return pl.pallas_call(
            functools.partial(_fused_kernel, eps=eps, compute_dtype=compute_dtype),
            out_shape=jax.ShapeDtypeStruct((n_nodes, emb), jnp.float32),
            grid_spec=pltpu.PrefetchScalarGridSpec(
                num_scalar_prefetch=0,
                grid=(n_tiles,),
                in_specs=[
                    pl.BlockSpec((edge_tile, 2), lambda t: (t, 0)),        # src/dst
                    pl.BlockSpec((edge_tile, in_dim + 1), lambda t: (t, 0)),  # ea
                    inv((n_nodes, emb), zero1),                            # h
                    inv((in_dim + 1, emb * emb), zero1),                   # W (+bias)
                    inv((emb * emb, emb), zero1),                          # red
                    inv((1, emb), zero1),                                  # gamma
                    inv((1, emb), zero1),                                  # beta
                ],
                out_specs=pl.BlockSpec((n_nodes, emb), lambda t: (0, 0)),
                scratch_shapes=[pltpu.VMEM((n_nodes, emb), jnp.float32)],
            ),
            compiler_params=pltpu.CompilerParams(
                dimension_semantics=("arbitrary",),
                vmem_limit_bytes=vmem_limit_bytes),
        )(idx, ea_aug, h, w_aug, red, gamma, beta)

    # ---- megacore path (v7x): per-core partial accumulators ---------------
    tiles_per_core = n_tiles // num_cores
    edge_map = lambda c, t: (c * tiles_per_core + t, 0)
    zero2 = lambda c, t: (0, 0)

    partials = pl.pallas_call(
        functools.partial(_partial_agg_kernel, compute_dtype=compute_dtype),
        out_shape=jax.ShapeDtypeStruct((num_cores, n_nodes, emb), jnp.float32),
        grid_spec=pltpu.PrefetchScalarGridSpec(
            num_scalar_prefetch=0,
            grid=(num_cores, tiles_per_core),
            in_specs=[
                pl.BlockSpec((edge_tile, 2), edge_map),
                pl.BlockSpec((edge_tile, in_dim + 1), edge_map),
                inv((n_nodes, emb), zero2),
                inv((in_dim + 1, emb * emb), zero2),
                inv((emb * emb, emb), zero2),
            ],
            out_specs=pl.BlockSpec((None, n_nodes, emb), lambda c, t: (c, 0, 0)),
        ),
        compiler_params=pltpu.CompilerParams(
            dimension_semantics=("parallel", "arbitrary"),
            vmem_limit_bytes=vmem_limit_bytes),
    )(idx, ea_aug, h, w_aug, red)

    return pl.pallas_call(
        functools.partial(_finalize_kernel, eps=eps),
        out_shape=jax.ShapeDtypeStruct((n_nodes, emb), jnp.float32),
        grid_spec=pltpu.PrefetchScalarGridSpec(
            num_scalar_prefetch=0,
            grid=(1,),
            in_specs=[
                pl.BlockSpec((num_cores, n_nodes, emb), lambda i: (0, 0, 0)),
                pl.BlockSpec((n_nodes, emb), lambda i: (0, 0)),
                pl.BlockSpec((1, emb), lambda i: (0, 0)),
                pl.BlockSpec((1, emb), lambda i: (0, 0)),
            ],
            out_specs=pl.BlockSpec((n_nodes, emb), lambda i: (0, 0)),
        ),
        compiler_params=pltpu.CompilerParams(
            dimension_semantics=("arbitrary",),
            vmem_limit_bytes=vmem_limit_bytes),
    )(partials, h, gamma, beta)


def _reference(h, ei, ea, params, *, eps=1e-5):
    """Pure-JAX reference matching the PyTorch forward semantics (full f32)."""
    M, E = ei.shape[1], h.shape[1]
    lin = jnp.dot(ea, params["w"], precision="highest") + params["b"]
    m3 = lin.reshape(M, E, E)
    hj = h[ei[1]]
    msg = jnp.einsum("mij,mj->mi", m3, hj, precision="highest")
    agg = jnp.zeros_like(h).at[ei[0]].add(msg)
    x = h + agg
    mu = x.mean(-1, keepdims=True)
    var = ((x - mu) ** 2).mean(-1, keepdims=True)
    return (x - mu) / jnp.sqrt(var + eps) * params["gamma"] + params["beta"]


def _init_params(key, in_dim, emb):
    """nn.Linear-style init: U(-1/sqrt(in_dim), 1/sqrt(in_dim)); LN affine."""
    bound = 1.0 / math.sqrt(in_dim)
    k1, k2, k3, k4 = jax.random.split(key, 4)
    return {
        "w": jax.random.uniform(k1, (in_dim, emb * emb), jnp.float32,
                                -bound, bound),            # pre-transposed
        "b": jax.random.uniform(k2, (1, emb * emb), jnp.float32, -bound, bound),
        "gamma": 1.0 + 0.1 * jax.random.normal(k3, (1, emb), jnp.float32),
        "beta": 0.1 * jax.random.normal(k4, (1, emb), jnp.float32),
    }


if __name__ == "__main__":
    N_NODES, EMB, IN_DIM, M_EDGES = 16, 32, 8, 500   # M not a tile multiple -> exercises padding

    root = jax.random.PRNGKey(0)
    k_h, k_ei, k_ea, k_p = jax.random.split(root, 4)

    h = jax.random.normal(k_h, (N_NODES, EMB), jnp.float32)
    ei = jax.random.randint(k_ei, (2, M_EDGES), 0, N_NODES, jnp.int32)
    ea = jax.random.normal(k_ea, (M_EDGES, IN_DIM), jnp.float32)
    params = _init_params(k_p, IN_DIM, EMB)

    ref = np.asarray(_reference(h, ei, ea, params))

    # 1) Default: fused single-kernel path, f32 MXU operands.
    out = jax.block_until_ready(edge_network(h, ei, ea, params))
    np.testing.assert_allclose(np.asarray(out), ref, rtol=5e-4, atol=5e-4)

    # 2) Two-TensorCore layout (v7x megacore): per-core partials + finalize.
    out2 = jax.block_until_ready(edge_network(h, ei, ea, params, num_cores=2))
    np.testing.assert_allclose(np.asarray(out2), ref, rtol=5e-4, atol=5e-4)

    # 3) bf16 MXU operands (selectors/red exact; ea/W/h casts lossy -> loose tol).
    out3 = jax.block_until_ready(
        edge_network(h, ei, ea, params, compute_dtype=jnp.bfloat16))
    np.testing.assert_allclose(np.asarray(out3), ref, rtol=1e-1, atol=1e-1)

    print("KERNEL_OK")
</pallas_src>

<mosaic_0001>
module attributes {stable_mosaic.version = 11 : i64} {
  func.func @_fused_kernel(%arg0: i32, %arg1: memref<256x2xi32, #tpu.memory_space<vmem>>, %arg2: memref<256x9xf32, #tpu.memory_space<vmem>>, %arg3: memref<16x32xf32, #tpu.memory_space<vmem>>, %arg4: memref<9x1024xf32, #tpu.memory_space<vmem>>, %arg5: memref<1024x32xf32, #tpu.memory_space<vmem>>, %arg6: memref<1x32xf32, #tpu.memory_space<vmem>>, %arg7: memref<1x32xf32, #tpu.memory_space<vmem>>, %arg8: memref<16x32xf32, #tpu.memory_space<vmem>>, %arg9: memref<16x32xf32, #tpu.memory_space<vmem>>) attributes {dimension_semantics = [#tpu.dimension_semantics<arbitrary>], iteration_bounds = array<i64: 2>, scalar_prefetch = 0 : i64, scratch_operands = 1 : i64, tpu.core_type = #tpu.core_type<tc>, window_params = [{transform_indices = @transform_0, window_bounds = array<i64: 256, 2>}, {transform_indices = @transform_1, window_bounds = array<i64: 256, 9>}, {pipeline_mode = #tpu.pipeline_mode<synchronous>, transform_indices = @transform_2, window_bounds = array<i64: 16, 32>}, {pipeline_mode = #tpu.pipeline_mode<synchronous>, transform_indices = @transform_3, window_bounds = array<i64: 9, 1024>}, {pipeline_mode = #tpu.pipeline_mode<synchronous>, transform_indices = @transform_4, window_bounds = array<i64: 1024, 32>}, {pipeline_mode = #tpu.pipeline_mode<synchronous>, transform_indices = @transform_5, window_bounds = array<i64: 1, 32>}, {pipeline_mode = #tpu.pipeline_mode<synchronous>, transform_indices = @transform_6, window_bounds = array<i64: 1, 32>}, {pipeline_mode = #tpu.pipeline_mode<synchronous>, transform_indices = @transform_7, window_bounds = array<i64: 16, 32>}]} {
    %c0_i32 = arith.constant 0 : i32
    %0 = arith.cmpi eq, %arg0, %c0_i32 : i32
    %1 = arith.extui %0 : i1 to i32
    %c0_i32_0 = arith.constant 0 : i32
    %2 = arith.cmpi ne, %1, %c0_i32_0 : i32
    scf.if %2 {
      %cst_19 = arith.constant 0.000000e+00 : f32
      %32 = vector.broadcast %cst_19 : f32 to vector<16x32xf32>
      %c0_20 = arith.constant 0 : index
      %c0_21 = arith.constant 0 : index
      %33 = vector.load %arg9[%c0_20, %c0_21] : memref<16x32xf32, #tpu.memory_space<vmem>>, vector<16x32xf32>
      tpu.vector_store %arg9[%c0_20, %c0_21], %32 {strides = array<i32>} : memref<16x32xf32, #tpu.memory_space<vmem>>, vector<16x32xf32>,
    } else {
    }
    %c0 = arith.constant 0 : index
    %c0_1 = arith.constant 0 : index
    %3 = vector.load %arg9[%c0, %c0_1] : memref<16x32xf32, #tpu.memory_space<vmem>>, vector<16x32xf32>
    %c0_2 = arith.constant 0 : index
    %c0_3 = arith.constant 0 : index
    %4 = vector.load %arg2[%c0_2, %c0_3] : memref<256x9xf32, #tpu.memory_space<vmem>>, vector<256x9xf32>
    %c0_4 = arith.constant 0 : index
    %c0_5 = arith.constant 0 : index
    %5 = vector.load %arg4[%c0_4, %c0_5] : memref<9x1024xf32, #tpu.memory_space<vmem>>, vector<9x1024xf32>
    %cst = arith.constant dense<0.000000e+00> : vector<256x1024xf32>
    %6 = tpu.matmul %4, %5, %cst {dimension_numbers = #tpu.dot_dimension_numbers<[1], [0], [0], [1], [0, 0, 1, 1], [], []>} : vector<256x9xf32>, vector<9x1024xf32>, vector<256x1024xf32> -> vector<256x1024xf32>
    %c0_6 = arith.constant 0 : index
    %c0_7 = arith.constant 0 : index
    %7 = vector.load %arg1[%c0_6, %c0_7] : memref<256x2xi32, #tpu.memory_space<vmem>>, vector<256x1xi32>
    %c0_8 = arith.constant 0 : index
    %c1 = arith.constant 1 : index
    %8 = vector.load %arg1[%c0_8, %c1] : memref<256x2xi32, #tpu.memory_space<vmem>>, vector<256x1xi32>
    %9 = tpu.iota {dimensions = array<i32: 1>} : vector<256x16xi32>
    %10 = vector.broadcast %7 : vector<256x1xi32> to vector<256x16xi32>
    %11 = arith.cmpi eq, %9, %10 : vector<256x16xi32>
    %12 = arith.extui %11 : vector<256x16xi1> to vector<256x16xi32>
    %13 = arith.sitofp %12 : vector<256x16xi32> to vector<256x16xf32>
    %14 = vector.broadcast %8 : vector<256x1xi32> to vector<256x16xi32>
    %15 = arith.cmpi eq, %9, %14 : vector<256x16xi32>
    %16 = arith.extui %15 : vector<256x16xi1> to vector<256x16xi32>
    %17 = arith.sitofp %16 : vector<256x16xi32> to vector<256x16xf32>
    %c0_9 = arith.constant 0 : index
    %c0_10 = arith.constant 0 : index
    %18 = vector.load %arg3[%c0_9, %c0_10] : memref<16x32xf32, #tpu.memory_space<vmem>>, vector<16x32xf32>
    %cst_11 = arith.constant dense<0.000000e+00> : vector<256x32xf32>
    %19 = tpu.matmul %13, %18, %cst_11 {dimension_numbers = #tpu.dot_dimension_numbers<[1], [0], [0], [1], [0, 0, 1, 1], [], []>} : vector<256x16xf32>, vector<16x32xf32>, vector<256x32xf32> -> vector<256x32xf32>
    %20 = tpu.concatenate %19, %19, %19, %19, %19, %19, %19, %19, %19, %19, %19, %19, %19, %19, %19, %19 in 1 : vector<256x32xf32>, vector<256x32xf32>, vector<256x32xf32>, vector<256x32xf32>, vector<256x32xf32>, vector<256x32xf32>, vector<256x32xf32>, vector<256x32xf32>, vector<256x32xf32>, vector<256x32xf32>, vector<256x32xf32>, vector<256x32xf32>, vector<256x32xf32>, vector<256x32xf32>, vector<256x32xf32>, vector<256x32xf32> -> vector<256x512xf32>
    %21 = tpu.concatenate %19, %19, %19, %19, %19, %19, %19, %19, %19, %19, %19, %19, %19, %19, %19, %19 in 1 : vector<256x32xf32>, vector<256x32xf32>, vector<256x32xf32>, vector<256x32xf32>, vector<256x32xf32>, vector<256x32xf32>, vector<256x32xf32>, vector<256x32xf32>, vector<256x32xf32>, vector<256x32xf32>, vector<256x32xf32>, vector<256x32xf32>, vector<256x32xf32>, vector<256x32xf32>, vector<256x32xf32>, vector<256x32xf32> -> vector<256x512xf32>
    %22 = tpu.concatenate %20, %21 in 1 : vector<256x512xf32>, vector<256x512xf32> -> vector<256x1024xf32>
    %23 = arith.mulf %6, %22 : vector<256x1024xf32>
    %c0_12 = arith.constant 0 : index
    %c0_13 = arith.constant 0 : index
    %24 = vector.load %arg5[%c0_12, %c0_13] : memref<1024x32xf32, #tpu.memory_space<vmem>>, vector<1024x32xf32>
    %cst_14 = arith.constant dense<0.000000e+00> : vector<256x32xf32>
    %25 = tpu.matmul %23, %24, %cst_14 {dimension_numbers = #tpu.dot_dimension_numbers<[1], [0], [0], [1], [0, 0, 1, 1], [], []>} : vector<256x1024xf32>, vector<1024x32xf32>, vector<256x32xf32> -> vector<256x32xf32>
    %cst_15 = arith.constant dense<0.000000e+00> : vector<16x32xf32>
    %26 = tpu.matmul %17, %25, %cst_15 {dimension_numbers = #tpu.dot_dimension_numbers<[0], [0], [1], [1], [0, 1, 1, 1], [], []>} : vector<256x16xf32>, vector<256x32xf32>, vector<16x32xf32> -> vector<16x32xf32>
    %27 = arith.addf %3, %26 : vector<16x32xf32>
    %c0_16 = arith.constant 0 : index
    %c0_17 = arith.constant 0 : index
    %28 = vector.load %arg9[%c0_16, %c0_17] : memref<16x32xf32, #tpu.memory_space<vmem>>, vector<16x32xf32>
    tpu.vector_store %arg9[%c0_16, %c0_17], %27 {strides = array<i32>} : memref<16x32xf32, #tpu.memory_space<vmem>>, vector<16x32xf32>,
    %c1_i32 = arith.constant 1 : i32
    %29 = arith.cmpi eq, %arg0, %c1_i32 : i32
    %30 = arith.extui %29 : i1 to i32
    %c0_i32_18 = arith.constant 0 : i32
    %31 = arith.cmpi ne, %30, %c0_i32_18 : i32
    scf.if %31 {
      %c0_19 = arith.constant 0 : index
      %c0_20 = arith.constant 0 : index
      %32 = vector.load %arg3[%c0_19, %c0_20] : memref<16x32xf32, #tpu.memory_space<vmem>>, vector<16x32xf32>
      %c0_21 = arith.constant 0 : index
      %c0_22 = arith.constant 0 : index
      %33 = vector.load %arg9[%c0_21, %c0_22] : memref<16x32xf32, #tpu.memory_space<vmem>>, vector<16x32xf32>
      %34 = arith.addf %32, %33 : vector<16x32xf32>
      %c0_23 = arith.constant 0 : index
      %c0_24 = arith.constant 0 : index
      %35 = vector.load %arg6[%c0_23, %c0_24] : memref<1x32xf32, #tpu.memory_space<vmem>>, vector<1x32xf32>
      %c0_25 = arith.constant 0 : index
      %c0_26 = arith.constant 0 : index
      %36 = vector.load %arg7[%c0_25, %c0_26] : memref<1x32xf32, #tpu.memory_space<vmem>>, vector<1x32xf32>
      %cst_27 = arith.constant dense<0.000000e+00> : vector<16xf32>
      %37 = vector.multi_reduction <add>, %34, %cst_27 [1] : vector<16x32xf32> to vector<16xf32>
      %38 = vector.shape_cast %37 : vector<16xf32> to vector<16x1xf32>
      %cst_28 = arith.constant 3.200000e+01 : f32
      %39 = vector.broadcast %cst_28 : f32 to vector<16x1xf32>
      %40 = arith.divf %38, %39 : vector<16x1xf32>
      %41 = vector.broadcast %40 : vector<16x1xf32> to vector<16x32xf32>
      %42 = arith.subf %34, %41 : vector<16x32xf32>
      %43 = arith.mulf %42, %42 : vector<16x32xf32>
      %cst_29 = arith.constant dense<0.000000e+00> : vector<16xf32>
      %44 = vector.multi_reduction <add>, %43, %cst_29 [1] : vector<16x32xf32> to vector<16xf32>
      %45 = vector.shape_cast %44 : vector<16xf32> to vector<16x1xf32>
      %cst_30 = arith.constant 3.200000e+01 : f32
      %46 = vector.broadcast %cst_30 : f32 to vector<16x1xf32>
      %47 = arith.divf %45, %46 : vector<16x1xf32>
      %cst_31 = arith.constant 9.99999974E-6 : f32
      %48 = vector.broadcast %cst_31 : f32 to vector<16x1xf32>
      %49 = arith.addf %47, %48 : vector<16x1xf32>
      %50 = math.rsqrt %49 : vector<16x1xf32>
      %51 = vector.broadcast %50 : vector<16x1xf32> to vector<16x32xf32>
      %52 = arith.mulf %42, %51 : vector<16x32xf32>
      %53 = vector.broadcast %35 : vector<1x32xf32> to vector<16x32xf32>
      %54 = arith.mulf %52, %53 : vector<16x32xf32>
      %55 = vector.broadcast %36 : vector<1x32xf32> to vector<16x32xf32>
      %56 = arith.addf %54, %55 : vector<16x32xf32>
      %c0_32 = arith.constant 0 : index
      %c0_33 = arith.constant 0 : index
      %57 = vector.load %arg8[%c0_32, %c0_33] : memref<16x32xf32, #tpu.memory_space<vmem>>, vector<16x32xf32>
      tpu.vector_store %arg8[%c0_32, %c0_33], %56 {strides = array<i32>} : memref<16x32xf32, #tpu.memory_space<vmem>>, vector<16x32xf32>,
    } else {
    }
    return
  }
  func.func @transform_0(%arg0: i32) -> (i32, i32) {
    %c0_i32 = arith.constant 0 : i32
    %c0_i32_0 = arith.constant 0 : i32
    return %arg0, %c0_i32 : i32, i32
  }
  func.func @transform_1(%arg0: i32) -> (i32, i32) {
    %c0_i32 = arith.constant 0 : i32
    %c0_i32_0 = arith.constant 0 : i32
    return %arg0, %c0_i32 : i32, i32
  }
  func.func @transform_2(%arg0: i32) -> (i32, i32) {
    %c0_i32 = arith.constant 0 : i32
    %c0_i32_0 = arith.constant 0 : i32
    %c0_i32_1 = arith.constant 0 : i32
    return %c0_i32, %c0_i32_0 : i32, i32
  }
  func.func @transform_3(%arg0: i32) -> (i32, i32) {
    %c0_i32 = arith.constant 0 : i32
    %c0_i32_0 = arith.constant 0 : i32
    %c0_i32_1 = arith.constant 0 : i32
    return %c0_i32, %c0_i32_0 : i32, i32
  }
  func.func @transform_4(%arg0: i32) -> (i32, i32) {
    %c0_i32 = arith.constant 0 : i32
    %c0_i32_0 = arith.constant 0 : i32
    %c0_i32_1 = arith.constant 0 : i32
    return %c0_i32, %c0_i32_0 : i32, i32
  }
  func.func @transform_5(%arg0: i32) -> (i32, i32) {
    %c0_i32 = arith.constant 0 : i32
    %c0_i32_0 = arith.constant 0 : i32
    %c0_i32_1 = arith.constant 0 : i32
    return %c0_i32, %c0_i32_0 : i32, i32
  }
  func.func @transform_6(%arg0: i32) -> (i32, i32) {
    %c0_i32 = arith.constant 0 : i32
    %c0_i32_0 = arith.constant 0 : i32
    %c0_i32_1 = arith.constant 0 : i32
    return %c0_i32, %c0_i32_0 : i32, i32
  }
  func.func @transform_7(%arg0: i32) -> (i32, i32) {
    %c0_i32 = arith.constant 0 : i32
    %c0_i32_0 = arith.constant 0 : i32
    %c0_i32_1 = arith.constant 0 : i32
    return %c0_i32, %c0_i32_0 : i32, i32
  }
}

</mosaic_0001>

<bundles_post_ra>
// kernel: tpu_custom_call.1
= control target key start
LH: loop header
LB: loop body
LE: loop exit
PB: predicated region body
PF: predicated region fallthrough
CT: control target
= control target key end

     0   :  { %12 = vsyncpa [#allocation4], 0  ;;  %s4598_s24 = smov 0   ;;  %s7707_s0 = inlined_call_operand.vmem [shape: s32[512,2], index: 0, kind: input, shape index: {}]   ;;  %s7708_s1 = inlined_call_operand.vmem [shape: f32[512,9], index: 1, kind: input, shape index: {}]   ;;  %s7709_s2 = inlined_call_operand.vmem [shape: f32[16,32], index: 2, kind: input, shape index: {}]   ;;  %s7710_s3 = inlined_call_operand.vmem [shape: f32[9,1024], index: 3, kind: input, shape index: {}]   ;;  %s7711_s4 = inlined_call_operand.vmem [shape: f32[1024,32], index: 4, kind: input, shape index: {}]   ;;  %s7712_s5 = inlined_call_operand.vmem [shape: f32[1,32], index: 5, kind: input, shape index: {}]   ;;  %s7713_s6 = inlined_call_operand.vmem [shape: f32[1,32], index: 6, kind: input, shape index: {}]   ;;  %s7714_s7 = inlined_call_operand.hbm [shape: f32[16,32], index: 7, kind: output, shape index: {}]  }
   0x1 LB: > { %s4604_s25 = sadd.s32 4294967295, %s4542_s24   ;;  %p3963_p0 = scmp.ge.s32.totalorder %s4542_s24, 1  ;;  %s4542_s24 = sphi %s4598_s24, %s18_s24  }
   0x2   : > { %p245_p1 = scmp.lt.s32.totalorder %s4542_s24, 3 }
   0x4   : > { %p246_p2 = pnand %p3963_p0, %p245_p1 }
   0x6   : > { %249 = sbr.rel (%p246_p2) target bundleno = 1723 (0x6bb), region = 48 }
   0xb   : > { %s3964_s26 = sshll.u32 %s4604_s25, 5  ;;  %p3968_p4 = scmp.ne.s32.totalorder %s4604_s25, 0 }
   0xc   : > { %p278_p3 = scmp.lt.s32.totalorder %s3964_s26, 63 }
   0xd   : > { %292 = sbr.rel (%p3968_p4) target bundleno = 21 (0x15), region = 52 }
   0xe   : > { %s8226_s26 = smov (!%p278_p3, %s3964_s26), 63 }
   0xf   : > { %s3965_s27 = sshll.u32 %s8226_s26, 3 }
  0x10   : > { %s4612_s30 = scalar_lea.vmem %s7707_s0, %s3965_s27  ;;  %s4617_s10 = scalar_lea.vmem %s7708_s1, %s3965_s27 }
  0x12   : > { %vm293_vm0 = vcmask 261120   ;;  %v4544_v0 = vmov 0.0  }
  0x13   : > { %294 = vst.msk [vmem:[#allocation2] sm:$0xff] %vm293_vm0, %v4544_v0 }
  0x14   : > { %295 = vst.msk [vmem:[#allocation2 + $0x8] sm:$0xff] %vm293_vm0, %v4544_v0 }
  0x15 PF: > { %v338_v1 = vld [vmem:[%s7710_s3 + $0x40] sm:$0x1]  ;;  %vm443_vm1 = vcmask 1040384   ;;  %vm346_vm2 = vcmask 72704   ;;  %v4632_v4 = vld [vmem:[%s4617_s10 + $0xb8] sm:$0xff]  ;;  %v4637_v5 = vld [vmem:[%s4617_s10 + $0x48] sm:$0xff] }
  0x16   : > { %v330_v2 = vld [vmem:[%s7710_s3] sm:$0xff]  ;;  %3969 = vmatpush.msk.msra.mxu0 %vm443_vm1, %v338_v1  ;;  %4336 = vmatpush.msk.msra.mxu3 %vm443_vm1, %v338_v1  ;;  %v4651_v7 = vld [vmem:[%s4617_s10 + $0x8] sm:$0xff]  ;;  %v4657_v9 = vld [vmem:[%s4617_s10 + $0x50] sm:$0xff]  ;;  %v4545_v44 = vmov 0   ;;  %vm1792_vm4 = vcmask 130048   ;;  %s4547_s8 = smov 96  }
  0x17   : > { %v4629_v3 = vld [vmem:[%s4617_s10] sm:$0xff]  ;;  %4334 = vmatpush.msk.msra.mxu1 %vm443_vm1, %v338_v1  ;;  %4335 = vmatpush.msk.msra.mxu2 %vm443_vm1, %v338_v1  ;;  %v4660_v10 = vld [vmem:[%s4617_s10 + $0x88] sm:$0xff]  ;;  %v4671_v11 = vld [vmem:[%s4617_s10 + $0x10] sm:$0xff]  ;;  %s4548_s9 = smov 64   ;;  %s4549_s11 = smov 32  }
  0x18   : > { %483 = vmatpush.msra.mxu0 %v330_v2  ;;  %4339 = vmatpush.msra.mxu3 %v330_v2  ;;  %v4640_v6 = vld [vmem:[%s4617_s10 + $0x80] sm:$0xff]  ;;  %v4674_v12 = vld [vmem:[%s4617_s10 + $0xc8] sm:$0xff]  ;;  %v4677_v13 = vld [vmem:[%s4617_s10 + $0x58] sm:$0xff]  ;;  %p4329_p5 = scmp.ne.s32.totalorder %s4604_s25, 1 }
  0x19   : > { %3970 = vmatmul.msk.f32.vlgmr.msra.gmra.mxu0 %vm346_vm2, %v4629_v3  ;;  %3993 = vmatmul.msk.f32.vlgmr.msra.gmra.mxu3 %vm346_vm2, %v4632_v4  ;;  %v4654_v8 = vld [vmem:[%s4617_s10 + $0xc0] sm:$0xff]  ;;  %v4680_v14 = vld [vmem:[%s4617_s10 + $0x90] sm:$0xff]  ;;  %v4691_v15 = vld [vmem:[%s4617_s10 + $0x18] sm:$0xff] }
  0x1a   : > { %4337 = vmatpush.msra.mxu1 %v330_v2  ;;  %4338 = vmatpush.msra.mxu2 %v330_v2  ;;  %v4694_v16 = vld [vmem:[%s4617_s10 + $0xd0] sm:$0xff]  ;;  %v4697_v17 = vld [vmem:[%s4617_s10 + $0x60] sm:$0xff]  ;;  %v4700_v18 = vld [vmem:[%s4617_s10 + $0x98] sm:$0xff] }
  0x1b   : > { %3979 = vmatmul.msk.f32.vlgmr.msra.gmra.mxu1 %vm346_vm2, %v4637_v5  ;;  %3986 = vmatmul.msk.f32.vlgmr.msra.gmra.mxu2 %vm346_vm2, %v4640_v6  ;;  %v339_v19 = vld [vmem:[%s7710_s3 + $0x48] sm:$0x1]  ;;  %v340_v20 = vld [vmem:[%s7710_s3 + $0x50] sm:$0x1]  ;;  %v4725_v23 = vld [vmem:[%s4617_s10 + $0x20] sm:$0xff] }
  0x1c   : > { %v331_v21 = vld [vmem:[%s7710_s3 + $0x8] sm:$0xff]  ;;  %4002 = vmatpush.msk.msra.mxu1 %vm443_vm1, %v339_v19  ;;  %4035 = vmatpush.msk.msra.mxu2 %vm443_vm1, %v340_v20  ;;  %v332_v22 = vld [vmem:[%s7710_s3 + $0x10] sm:$0xff]  ;;  %v4728_v24 = vld [vmem:[%s4617_s10 + $0xd8] sm:$0xff] }
  0x1d   : > { %v4731_v25 = vld [vmem:[%s4617_s10 + $0x68] sm:$0xff]  ;;  %v4734_v26 = vld [vmem:[%s4617_s10 + $0xa0] sm:$0xff]  ;;  %v341_v27 = vld [vmem:[%s7710_s3 + $0x58] sm:$0x1]  ;;  %4442 = vset.pattern.permute.xlu0 %v4545_v44  ;;  %4443 = vset.pattern.permute.xlu1 %v4545_v44 }
  0x1e   : > { %596 = vmatpush.msra.mxu1 %v331_v21  ;;  %709 = vmatpush.msra.mxu2 %v332_v22  ;;  %v342_v28 = vld [vmem:[%s7710_s3 + $0x60] sm:$0x1]  ;;  %v333_v29 = vld [vmem:[%s7710_s3 + $0x18] sm:$0xff]  ;;  %v4759_v31 = vld [vmem:[%s4617_s10 + $0x28] sm:$0xff] }
  0x1f   : > { %4068 = vmatpush.msk.msrb.mxu3 %vm443_vm1, %v341_v27  ;;  %4101 = vmatpush.msk.msrb.mxu0 %vm443_vm1, %v342_v28  ;;  %v334_v30 = vld [vmem:[%s7710_s3 + $0x20] sm:$0xff]  ;;  %v4765_v33 = vld [vmem:[%s4617_s10 + $0x70] sm:$0xff]  ;;  %v4768_v34 = vld [vmem:[%s4617_s10 + $0xa8] sm:$0xff] }
  0x20   : > { %v4762_v32 = vld [vmem:[%s4617_s10 + $0xe0] sm:$0xff]  ;;  %v4779_v35 = vld [vmem:[%s4617_s10 + $0x30] sm:$0xff]  ;;  %v4782_v36 = vld [vmem:[%s4617_s10 + $0xe8] sm:$0xff]  ;;  %4444 = vset.pattern.permute.xlu2 %v4545_v44 }
  0x21   : > { %3971 = vmatmul.msk.f32.gmra.mxu0 %vm346_vm2, %v4651_v7  ;;  %3994 = vmatmul.msk.f32.gmra.mxu3 %vm346_vm2, %v4654_v8  ;;  %v4785_v37 = vld [vmem:[%s4617_s10 + $0x78] sm:$0xff]  ;;  %v4788_v38 = vld [vmem:[%s4617_s10 + $0xb0] sm:$0xff]  ;;  %v4813_v41 = vld [vmem:[%s4617_s10 + $0x40] sm:$0xff] }
  0x22   : > { %822 = vmatpush.msrb.mxu3 %v333_v29  ;;  %935 = vmatpush.msrb.mxu0 %v334_v30  ;;  %v4799_v39 = vld [vmem:[%s4617_s10 + $0x38] sm:$0xff]  ;;  %v4802_v40 = vld [vmem:[%s4617_s10 + $0xf0] sm:$0xff]  ;;  %v1372_v43 = vld [vmem:[%s4612_s30] sm:$0xff] }
  0x23   : > { %3980 = vmatmul.msk.f32.gmra.mxu1 %vm346_vm2, %v4657_v9  ;;  %3987 = vmatmul.msk.f32.gmra.mxu2 %vm346_vm2, %v4660_v10  ;;  %v4816_v42 = vld [vmem:[%s4617_s10 + $0xf8] sm:$0xff]  ;;  %v1373_v45 = vld [vmem:[%s4612_s30 + $0x8] sm:$0xff]  ;;  %v1378_v46 = vld [vmem:[%s4612_s30 + $0x30] sm:$0xff] }
  0x24   : > { %1407 = vperm.xlu0 %4442, %v1372_v43   ;;  %v1381_v47 = vld [vmem:[%s4612_s30 + $0x48] sm:$0xff]  ;;  %v1374_v50 = vld [vmem:[%s4612_s30 + $0x10] sm:$0xff]  ;;  %v1384_v52 = vld [vmem:[%s4612_s30 + $0x60] sm:$0xff] }
  0x25   : > { %1413 = vperm.xlu1 %4443, %v1374_v50   ;;  %v1375_v56 = vld [vmem:[%s4612_s30 + $0x18] sm:$0xff]  ;;  %v1390_v0 = vld [vmem:[%s4612_s30 + $0x90] sm:$0xff]  ;;  %v1393_v22 = vld [vmem:[%s4612_s30 + $0xa8] sm:$0xff] }
  0x26   : > { %v1387_v58 = vld [vmem:[%s4612_s30 + $0x78] sm:$0xff]  ;;  %v1382_v20 = vld [vmem:[%s4612_s30 + $0x50] sm:$0xff]  ;;  %v1385_v30 = vld [vmem:[%s4612_s30 + $0x68] sm:$0xff] }
  0x27   : > { %v1379_v62 = vld [vmem:[%s4612_s30 + $0x38] sm:$0xff]  ;;  %v1396_v44 = vld [vmem:[%s4612_s30 + $0xc0] sm:$0xff] }
  0x28   : > { %v1376_v50 = vld [vmem:[%s4612_s30 + $0x20] sm:$0xff] }
  0x29   : > { %3972 = vmatmul.msk.f32.gmra.mxu0 %vm346_vm2, %v4671_v11  ;;  %3995 = vmatmul.msk.f32.gmra.mxu3 %vm346_vm2, %v4674_v12 }
  0x2a   : > { %1419 = vperm.xlu2 %4444, %v1376_v50   ;;  %v1402_v50 = vld [vmem:[%s4612_s30 + $0xf0] sm:$0xff] }
  0x2b   : > { %3981 = vmatmul.msk.f32.gmra.mxu1 %vm346_vm2, %v4677_v13  ;;  %3988 = vmatmul.msk.f32.gmra.mxu2 %vm346_vm2, %v4680_v14 }
  0x2c   : > { %1410 = vperm.xlu0 %4442, %v1373_v45  }
  0x2d   : > { %1416 = vperm.xlu1 %4443, %v1375_v56  }
  0x31   : > { %3973 = vmatmul.msk.f32.gmra.mxu0 %vm346_vm2, %v4691_v15  ;;  %3996 = vmatmul.msk.f32.gmra.mxu3 %vm346_vm2, %v4694_v16 }
  0x33   : > { %3982 = vmatmul.msk.f32.gmra.mxu1 %vm346_vm2, %v4697_v17  ;;  %3989 = vmatmul.msk.f32.gmra.mxu2 %vm346_vm2, %v4700_v18 }
  0x34   : > { %1425 = vperm.xlu0 %4442, %v1378_v46  }
  0x35   : > { %1428 = vperm.xlu1 %4443, %v1379_v62  }
  0x39   : > { %3974 = vmatmul.msk.f32.gmra.mxu0 %vm346_vm2, %v4725_v23  ;;  %3997 = vmatmul.msk.f32.gmra.mxu3 %vm346_vm2, %v4728_v24 }
  0x3b   : > { %3983 = vmatmul.msk.f32.gmra.mxu1 %vm346_vm2, %v4731_v25  ;;  %3990 = vmatmul.msk.f32.gmra.mxu2 %vm346_vm2, %v4734_v26 }
  0x3c   : > { %1434 = vperm.xlu0 %4442, %v1381_v47  }
  0x3d   : > { %1437 = vperm.xlu1 %4443, %v1382_v20  }
  0x41   : > { %3975 = vmatmul.msk.f32.gmra.mxu0 %vm346_vm2, %v4759_v31  ;;  %3998 = vmatmul.msk.f32.gmra.mxu3 %vm346_vm2, %v4762_v32 }
  0x43   : > { %3984 = vmatmul.msk.f32.gmra.mxu1 %vm346_vm2, %v4765_v33  ;;  %3991 = vmatmul.msk.f32.gmra.mxu2 %vm346_vm2, %v4768_v34 }
  0x44   : > { %1443 = vperm.xlu0 %4442, %v1384_v52   ;;  %v1388_v52 = vld [vmem:[%s4612_s30 + $0x80] sm:$0xff] }
  0x45   : > { %1446 = vperm.xlu1 %4443, %v1385_v30   ;;  %v1391_v30 = vld [vmem:[%s4612_s30 + $0x98] sm:$0xff] }
  0x49   : > { %3976 = vmatmul.msk.f32.gmra.mxu0 %vm346_vm2, %v4779_v35  ;;  %3999 = vmatmul.msk.f32.gmra.mxu3 %vm346_vm2, %v4782_v36 }
  0x4b   : > { %3985 = vmatmul.msk.f32.gmra.mxu1 %vm346_vm2, %v4785_v37  ;;  %3992 = vmatmul.msk.f32.gmra.mxu2 %vm346_vm2, %v4788_v38 }
  0x4c   : > { %1452 = vperm.xlu0 %4442, %v1387_v58   ;;  %v1399_v58 = vld [vmem:[%s4612_s30 + $0xd8] sm:$0xff] }
  0x4d   : > { %1455 = vperm.xlu1 %4443, %v1388_v52  }
  0x51   : > { %3977 = vmatmul.msk.f32.gmra.mxu0 %vm346_vm2, %v4799_v39  ;;  %4000 = vmatmul.msk.f32.gmra.mxu3 %vm346_vm2, %v4802_v40 }
  0x53   : > { %4003 = vmatmul.msk.f32.vlgmr.msra.gmra.mxu1 %vm346_vm2, %v4629_v3  ;;  %4036 = vmatmul.msk.f32.vlgmr.msra.gmra.mxu2 %vm346_vm2, %v4629_v3 }
  0x54   : > { %1461 = vperm.xlu0 %4442, %v1390_v0  }
  0x55   : > { %1464 = vperm.xlu1 %4443, %v1391_v30   ;;  %v1394_v30 = vld [vmem:[%s4612_s30 + $0xb0] sm:$0xff] }
  0x59   : > { %3978 = vmatmul.msk.f32.gmra.mxu0 %vm346_vm2, %v4813_v41  ;;  %4001 = vmatmul.msk.f32.gmra.mxu3 %vm346_vm2, %v4816_v42 }
  0x5b   : > { %4004 = vmatmul.msk.f32.gmra.mxu1 %vm346_vm2, %v4651_v7  ;;  %4037 = vmatmul.msk.f32.gmra.mxu2 %vm346_vm2, %v4651_v7 }
  0x5c   : > { %1470 = vperm.xlu0 %4442, %v1393_v22   ;;  %v1377_v22 = vld [vmem:[%s4612_s30 + $0x28] sm:$0xff] }
  0x5d   : > { %1422 = vperm.xlu2 %4444, %v1377_v22   ;;  %v1380_v22 = vld [vmem:[%s4612_s30 + $0x40] sm:$0xff]  ;;  %1473 = vperm.xlu1 %4443, %v1394_v30   ;;  %v1397_v30 = vld [vmem:[%s4612_s30 + $0xc8] sm:$0xff] }
  0x61   : > { %4069 = vmatmul.msk.f32.vlgmr.msrb.gmra.mxu3 %vm346_vm2, %v4629_v3  ;;  %4102 = vmatmul.msk.f32.vlgmr.msrb.gmra.mxu0 %vm346_vm2, %v4629_v3 }
  0x63   : > { %4005 = vmatmul.msk.f32.gmra.mxu1 %vm346_vm2, %v4671_v11  ;;  %4038 = vmatmul.msk.f32.gmra.mxu2 %vm346_vm2, %v4671_v11 }
  0x64   : > { %1479 = vperm.xlu0 %4442, %v1396_v44  }
  0x65   : > { %1431 = vperm.xlu2 %4444, %v1380_v22   ;;  %v1383_v22 = vld [vmem:[%s4612_s30 + $0x58] sm:$0xff]  ;;  %1482 = vperm.xlu1 %4443, %v1397_v30   ;;  %v1400_v30 = vld [vmem:[%s4612_s30 + $0xe0] sm:$0xff] }
  0x69   : > { %4070 = vmatmul.msk.f32.gmra.mxu3 %vm346_vm2, %v4651_v7  ;;  %4103 = vmatmul.msk.f32.gmra.mxu0 %vm346_vm2, %v4651_v7 }
  0x6b   : > { %4006 = vmatmul.msk.f32.gmra.mxu1 %vm346_vm2, %v4691_v15  ;;  %4039 = vmatmul.msk.f32.gmra.mxu2 %vm346_vm2, %v4691_v15 }
  0x6c   : > { %1488 = vperm.xlu0 %4442, %v1399_v58  }
  0x6d   : > { %1440 = vperm.xlu2 %4444, %v1383_v22   ;;  %v1386_v22 = vld [vmem:[%s4612_s30 + $0x70] sm:$0xff]  ;;  %1491 = vperm.xlu1 %4443, %v1400_v30  }
  0x71   : > { %4071 = vmatmul.msk.f32.gmra.mxu3 %vm346_vm2, %v4671_v11  ;;  %4104 = vmatmul.msk.f32.gmra.mxu0 %vm346_vm2, %v4671_v11 }
  0x73   : > { %4007 = vmatmul.msk.f32.gmra.mxu1 %vm346_vm2, %v4725_v23  ;;  %4040 = vmatmul.msk.f32.gmra.mxu2 %vm346_vm2, %v4725_v23 }
  0x74   : > { %1497 = vperm.xlu0 %4442, %v1402_v50  }
  0x75   : > { %1449 = vperm.xlu2 %4444, %v1386_v22  }
  0x79   : > { %4072 = vmatmul.msk.f32.gmra.mxu3 %vm346_vm2, %v4691_v15  ;;  %4105 = vmatmul.msk.f32.gmra.mxu0 %vm346_vm2, %v4691_v15 }
  0x7b   : > { %4008 = vmatmul.msk.f32.gmra.mxu1 %vm346_vm2, %v4759_v31  ;;  %4041 = vmatmul.msk.f32.gmra.mxu2 %vm346_vm2, %v4759_v31 }
  0x81   : > { %4073 = vmatmul.msk.f32.gmra.mxu3 %vm346_vm2, %v4725_v23  ;;  %4106 = vmatmul.msk.f32.gmra.mxu0 %vm346_vm2, %v4725_v23 }
  0x83   : > { %4009 = vmatmul.msk.f32.gmra.mxu1 %vm346_vm2, %v4779_v35  ;;  %4042 = vmatmul.msk.f32.gmra.mxu2 %vm346_vm2, %v4779_v35 }
  0x89   : > { %4074 = vmatmul.msk.f32.gmra.mxu3 %vm346_vm2, %v4759_v31  ;;  %4107 = vmatmul.msk.f32.gmra.mxu0 %vm346_vm2, %v4759_v31 }
  0x8b   : > { %4010 = vmatmul.msk.f32.gmra.mxu1 %vm346_vm2, %v4799_v39  ;;  %4043 = vmatmul.msk.f32.gmra.mxu2 %vm346_vm2, %v4799_v39 }
  0x91   : > { %4075 = vmatmul.msk.f32.gmra.mxu3 %vm346_vm2, %v4779_v35  ;;  %4108 = vmatmul.msk.f32.gmra.mxu0 %vm346_vm2, %v4779_v35 }
  0x93   : > { %4011 = vmatmul.msk.f32.gmra.mxu1 %vm346_vm2, %v4813_v41  ;;  %4044 = vmatmul.msk.f32.gmra.mxu2 %vm346_vm2, %v4813_v41 }
  0x96   : > { %v4886_v48 = vpop.f32.mrf.mxu0 }
  0x98   : > { %v4888_v49 = vpop.f32.mrf.mxu1 }
  0x99   : > { %7726 = vst [vmem:[#allocation6_spill] sm:$0xff] %v4888_v49  ;;  %4076 = vmatmul.msk.f32.gmra.mxu3 %vm346_vm2, %v4799_v39  ;;  %4109 = vmatmul.msk.f32.gmra.mxu0 %vm346_vm2, %v4799_v39 }
  0x9b   : > { %4012 = vmatmul.msk.f32.gmra.mxu1 %vm346_vm2, %v4637_v5  ;;  %4045 = vmatmul.msk.f32.gmra.mxu2 %vm346_vm2, %v4637_v5 }
  0x9c   : > { %v4899_v51 = vpop.f32.mrf.mxu3 }
  0x9d   : > { %7727 = vst [vmem:[#allocation7_spill] sm:$0xff] %v4899_v51 }
  0x9e   : > { %v4902_v53 = vpop.f32.mrf.mxu0  ;;  %v4904_v54 = vpop.f32.mrf.mxu2 }
  0x9f   : > { %7728 = vst [vmem:[#allocation8_spill] sm:$0xff] %v4904_v54 }
  0xa0   : > { %v4906_v55 = vpop.f32.mrf.mxu1 }
  0xa1   : > { %7729 = vst [vmem:[#allocation9_spill] sm:$0xff] %v4906_v55  ;;  %4077 = vmatmul.msk.f32.gmra.mxu3 %vm346_vm2, %v4813_v41  ;;  %4110 = vmatmul.msk.f32.gmra.mxu0 %vm346_vm2, %v4813_v41 }
  0xa3   : > { %4013 = vmatmul.msk.f32.gmra.mxu1 %vm346_vm2, %v4657_v9  ;;  %4046 = vmatmul.msk.f32.gmra.mxu2 %vm346_vm2, %v4657_v9 }
  0xa4   : > { %v4917_v57 = vpop.f32.mrf.mxu3 }
  0xa5   : > { %7730 = vst [vmem:[#allocation10_spill] sm:$0xff] %v4917_v57 }
  0xa6   : > { %v4920_v59 = vpop.f32.mrf.mxu0  ;;  %v4922_v60 = vpop.f32.mrf.mxu2 }
  0xa7   : > { %7731 = vst [vmem:[#allocation11_spill] sm:$0xff] %v4922_v60 }
  0xa8   : > { %v4924_v61 = vpop.f32.mrf.mxu1 }
  0xa9   : > { %7732 = vst [vmem:[#allocation12_spill] sm:$0xff] %v4924_v61  ;;  %4078 = vmatmul.msk.f32.gmra.mxu3 %vm346_vm2, %v4637_v5  ;;  %4111 = vmatmul.msk.f32.gmra.mxu0 %vm346_vm2, %v4637_v5 }
  0xab   : > { %4014 = vmatmul.msk.f32.gmra.mxu1 %vm346_vm2, %v4677_v13  ;;  %4047 = vmatmul.msk.f32.gmra.mxu2 %vm346_vm2, %v4677_v13 }
  0xac   : > { %v4935_v63 = vpop.f32.mrf.mxu3 }
  0xad   : > { %7733 = vst [vmem:[#allocation13_spill] sm:$0xff] %v4935_v63 }
  0xae   : > { %v4938_v1 = vpop.f32.mrf.mxu0  ;;  %v4940_v2 = vpop.f32.mrf.mxu2 }
  0xaf   : > { %7734 = vst [vmem:[#allocation14_spill] sm:$0xff] %v4940_v2 }
  0xb0   : > { %v4942_v19 = vpop.f32.mrf.mxu1 }
  0xb1   : > { %7735 = vst [vmem:[#allocation15_spill] sm:$0xff] %v4942_v19  ;;  %4079 = vmatmul.msk.f32.gmra.mxu3 %vm346_vm2, %v4657_v9  ;;  %4112 = vmatmul.msk.f32.gmra.mxu0 %vm346_vm2, %v4657_v9 }
  0xb3   : > { %4015 = vmatmul.msk.f32.gmra.mxu1 %vm346_vm2, %v4697_v17  ;;  %4048 = vmatmul.msk.f32.gmra.mxu2 %vm346_vm2, %v4697_v17 }
  0xb4   : > { %v4953_v21 = vpop.f32.mrf.mxu3 }
  0xb5   : > { %7736 = vst [vmem:[#allocation16_spill] sm:$0xff] %v4953_v21 }
  0xb6   : > { %v4956_v27 = vpop.f32.mrf.mxu0  ;;  %v4958_v28 = vpop.f32.mrf.mxu2 }
  0xb7   : > { %7737 = vst [vmem:[#allocation17_spill] sm:$0xff] %v4958_v28 }
  0xb8   : > { %v4960_v29 = vpop.f32.mrf.mxu1 }
  0xb9   : > { %7738 = vst [vmem:[#allocation18_spill] sm:$0xff] %v4960_v29  ;;  %4080 = vmatmul.msk.f32.gmra.mxu3 %vm346_vm2, %v4677_v13  ;;  %4113 = vmatmul.msk.f32.gmra.mxu0 %vm346_vm2, %v4677_v13 }
  0xbb   : > { %4016 = vmatmul.msk.f32.gmra.mxu1 %vm346_vm2, %v4731_v25  ;;  %4049 = vmatmul.msk.f32.gmra.mxu2 %vm346_vm2, %v4731_v25 }
  0xbc   : > { %v4971_v43 = vpop.f32.mrf.mxu3 }
  0xbd   : > { %7739 = vst [vmem:[#allocation19_spill] sm:$0xff] %v4971_v43 }
  0xbe   : > { %v4974_v45 = vpop.f32.mrf.mxu0  ;;  %v4976_v46 = vpop.f32.mrf.mxu2 }
  0xbf   : > { %7740 = vst [vmem:[#allocation20_spill] sm:$0xff] %v4976_v46 }
  0xc0   : > { %v4978_v47 = vpop.f32.mrf.mxu1 }
  0xc1   : > { %7741 = vst [vmem:[#allocation21_spill] sm:$0xff] %v4978_v47  ;;  %4081 = vmatmul.msk.f32.gmra.mxu3 %vm346_vm2, %v4697_v17  ;;  %4114 = vmatmul.msk.f32.gmra.mxu0 %vm346_vm2, %v4697_v17 }
  0xc3   : > { %4017 = vmatmul.msk.f32.gmra.mxu1 %vm346_vm2, %v4765_v33  ;;  %4050 = vmatmul.msk.f32.gmra.mxu2 %vm346_vm2, %v4765_v33 }
  0xc4   : > { %v4990_v56 = vpop.f32.mrf.mxu3 }
  0xc5   : > { %7742 = vst [vmem:[#allocation22_spill] sm:$0xff] %v4990_v56 }
  0xc6   : > { %v4993_v62 = vpop.f32.mrf.mxu0  ;;  %v4995_v0 = vpop.f32.mrf.mxu2 }
  0xc7   : > { %7743 = vst [vmem:[#allocation23_spill] sm:$0xff] %v4995_v0 }
  0xc8   : > { %v4997_v20 = vpop.f32.mrf.mxu1 }
  0xc9   : > { %7744 = vst [vmem:[#allocation24_spill] sm:$0xff] %v4997_v20  ;;  %4082 = vmatmul.msk.f32.gmra.mxu3 %vm346_vm2, %v4731_v25  ;;  %4115 = vmatmul.msk.f32.gmra.mxu0 %vm346_vm2, %v4731_v25 }
  0xcb   : > { %4018 = vmatmul.msk.f32.gmra.mxu1 %vm346_vm2, %v4785_v37  ;;  %4051 = vmatmul.msk.f32.gmra.mxu2 %vm346_vm2, %v4785_v37 }
  0xcc   : > { %v5009_v44 = vpop.f32.mrf.mxu3 }
  0xcd   : > { %7745 = vst [vmem:[#allocation25_spill] sm:$0xff] %v5009_v44 }
  0xce   : > { %v5012_v52 = vpop.f32.mrf.mxu0  ;;  %v5014_v58 = vpop.f32.mrf.mxu2 }
  0xcf   : > { %7746 = vst [vmem:[#allocation26_spill] sm:$0xff] %v5014_v58 }
  0xd0   : > { %v5016_v56 = vpop.f32.mrf.mxu1 }
  0xd1   : > { %4083 = vmatmul.msk.f32.gmra.mxu3 %vm346_vm2, %v4765_v33  ;;  %4116 = vmatmul.msk.f32.gmra.mxu0 %vm346_vm2, %v4765_v33 }
  0xd3   : > { %4019 = vmatmul.msk.f32.gmra.mxu1 %vm346_vm2, %v4640_v6  ;;  %4052 = vmatmul.msk.f32.gmra.mxu2 %vm346_vm2, %v4640_v6 }
  0xd4   : > { %v5028_v50 = vpop.f32.mrf.mxu3 }
  0xd5   : > { %7747 = vst [vmem:[#allocation27_spill] sm:$0xff] %v5028_v50 }
  0xd6   : > { %v5030_v44 = vpop.f32.mrf.mxu0  ;;  %v5032_v43 = vpop.f32.mrf.mxu2 }
  0xd8   : > { %v5034_v21 = vpop.f32.mrf.mxu1 }
  0xd9   : > { %4084 = vmatmul.msk.f32.gmra.mxu3 %vm346_vm2, %v4785_v37  ;;  %4117 = vmatmul.msk.f32.gmra.mxu0 %vm346_vm2, %v4785_v37 }
  0xdb   : > { %4020 = vmatmul.msk.f32.gmra.mxu1 %vm346_vm2, %v4660_v10  ;;  %4053 = vmatmul.msk.f32.gmra.mxu2 %vm346_vm2, %v4660_v10 }
  0xdc   : > { %v5046_v50 = vpop.f32.mrf.mxu3 }
  0xdd   : > { %7748 = vst [vmem:[#allocation28_spill] sm:$0xff] %v5046_v50 }
  0xde   : > { %v5048_v63 = vpop.f32.mrf.mxu0  ;;  %v5050_v57 = vpop.f32.mrf.mxu2 }
  0xdf   : > { %7749 = vst [vmem:[#allocation29_spill] sm:$0xff] %v5048_v63 }
  0xe0   : > { %v5052_v51 = vpop.f32.mrf.mxu1 }
  0xe1   : > { %4085 = vmatmul.msk.f32.gmra.mxu3 %vm346_vm2, %v4640_v6  ;;  %4118 = vmatmul.msk.f32.gmra.mxu0 %vm346_vm2, %v4640_v6  ;;  %v1389_v6 = vld [vmem:[%s4612_s30 + $0x88] sm:$0xff] }
  0xe2   : > { %1458 = vperm.xlu2 %4444, %v1389_v6  }
  0xe3   : > { %4021 = vmatmul.msk.f32.gmra.mxu1 %vm346_vm2, %v4680_v14  ;;  %4054 = vmatmul.msk.f32.gmra.mxu2 %vm346_vm2, %v4680_v14 }
  0xe4   : > { %v5064_v63 = vpop.f32.mrf.mxu3 }
  0xe6   : > { %v5066_v50 = vpop.f32.mrf.mxu0  ;;  %v5068_v58 = vpop.f32.mrf.mxu2 }
  0xe7   : > { %7750 = vst [vmem:[#allocation30_spill] sm:$0xff] %v5066_v50 }
  0xe8   : > { %v5070_v0 = vpop.f32.mrf.mxu1 }
  0xe9   : > { %4086 = vmatmul.msk.f32.gmra.mxu3 %vm346_vm2, %v4660_v10  ;;  %4119 = vmatmul.msk.f32.gmra.mxu0 %vm346_vm2, %v4660_v10  ;;  %v1392_v10 = vld [vmem:[%s4612_s30 + $0xa0] sm:$0xff] }
  0xea   : > { %1467 = vperm.xlu2 %4444, %v1392_v10  }
  0xeb   : > { %4022 = vmatmul.msk.f32.gmra.mxu1 %vm346_vm2, %v4700_v18  ;;  %4055 = vmatmul.msk.f32.gmra.mxu2 %vm346_vm2, %v4700_v18 }
  0xec   : > { %v5081_v22 = vpop.f32.mrf.mxu3 }
  0xee   : > { %v5083_v30 = vpop.f32.mrf.mxu0  ;;  %v5085_v50 = vpop.f32.mrf.mxu2 }
  0xef   : > { %7751 = vst [vmem:[#allocation31_spill] sm:$0xff] %v5083_v30 }
  0xf0   : > { %v5087_v46 = vpop.f32.mrf.mxu1 }
  0xf1   : > { %4087 = vmatmul.msk.f32.gmra.mxu3 %vm346_vm2, %v4680_v14  ;;  %4120 = vmatmul.msk.f32.gmra.mxu0 %vm346_vm2, %v4680_v14  ;;  %v1395_v14 = vld [vmem:[%s4612_s30 + $0xb8] sm:$0xff] }
  0xf2   : > { %1476 = vperm.xlu2 %4444, %v1395_v14  }
  0xf3   : > { %4023 = vmatmul.msk.f32.gmra.mxu1 %vm346_vm2, %v4734_v26  ;;  %4056 = vmatmul.msk.f32.gmra.mxu2 %vm346_vm2, %v4734_v26 }
  0xf4   : > { %v5098_v6 = vpop.f32.mrf.mxu3 }
  0xf6   : > { %v5100_v30 = vpop.f32.mrf.mxu0  ;;  %v5102_v28 = vpop.f32.mrf.mxu2 }
  0xf7   : > { %7752 = vst [vmem:[#allocation32_spill] sm:$0xff] %v5100_v30 }
  0xf8   : > { %v5104_v2 = vpop.f32.mrf.mxu1 }
  0xf9   : > { %4088 = vmatmul.msk.f32.gmra.mxu3 %vm346_vm2, %v4700_v18  ;;  %4121 = vmatmul.msk.f32.gmra.mxu0 %vm346_vm2, %v4700_v18  ;;  %v1398_v18 = vld [vmem:[%s4612_s30 + $0xd0] sm:$0xff] }
  0xfa   : > { %1485 = vperm.xlu2 %4444, %v1398_v18  }
  0xfb   : > { %4024 = vmatmul.msk.f32.gmra.mxu1 %vm346_vm2, %v4768_v34  ;;  %4057 = vmatmul.msk.f32.gmra.mxu2 %vm346_vm2, %v4768_v34 }
  0xfc   : > { %v5115_v10 = vpop.f32.mrf.mxu3 }
  0xfe   : > { %v5117_v30 = vpop.f32.mrf.mxu0  ;;  %v5119_v60 = vpop.f32.mrf.mxu2 }
  0xff   : > { %7753 = vst [vmem:[#allocation33_spill] sm:$0xff] %v5117_v30 }
 0x100   : > { %v5121_v54 = vpop.f32.mrf.mxu1 }
 0x101   : > { %4089 = vmatmul.msk.f32.gmra.mxu3 %vm346_vm2, %v4734_v26  ;;  %4122 = vmatmul.msk.f32.gmra.mxu0 %vm346_vm2, %v4734_v26  ;;  %v1401_v26 = vld [vmem:[%s4612_s30 + $0xe8] sm:$0xff] }
 0x102   : > { %1494 = vperm.xlu2 %4444, %v1401_v26  }
 0x103   : > { %4025 = vmatmul.msk.f32.gmra.mxu1 %vm346_vm2, %v4788_v38  ;;  %4058 = vmatmul.msk.f32.gmra.mxu2 %vm346_vm2, %v4788_v38 }
 0x104   : > { %v5132_v14 = vpop.f32.mrf.mxu3 }
 0x106   : > { %v5134_v30 = vpop.f32.mrf.mxu0  ;;  %v5136_v20 = vpop.f32.mrf.mxu2 }
 0x107   : > { %7754 = vst [vmem:[#allocation34_spill] sm:$0xff] %v5134_v30 }
 0x108   : > { %v5138_v47 = vpop.f32.mrf.mxu1 }
 0x109   : > { %4090 = vmatmul.msk.f32.gmra.mxu3 %vm346_vm2, %v4768_v34  ;;  %4123 = vmatmul.msk.f32.gmra.mxu0 %vm346_vm2, %v4768_v34 }
 0x10b   : > { %4026 = vmatmul.msk.f32.gmra.mxu1 %vm346_vm2, %v4632_v4  ;;  %4059 = vmatmul.msk.f32.gmra.mxu2 %vm346_vm2, %v4632_v4 }
 0x10c   : > { %v5149_v18 = vpop.f32.mrf.mxu3 }
 0x10e   : > { %v5151_v30 = vpop.f32.mrf.mxu0  ;;  %v5153_v29 = vpop.f32.mrf.mxu2 }
 0x10f   : > { %7755 = vst [vmem:[#allocation35_spill] sm:$0xff] %v5151_v30 }
 0x110   : > { %v5155_v19 = vpop.f32.mrf.mxu1 }
 0x111   : > { %4091 = vmatmul.msk.f32.gmra.mxu3 %vm346_vm2, %v4788_v38  ;;  %4124 = vmatmul.msk.f32.gmra.mxu0 %vm346_vm2, %v4788_v38 }
 0x113   : > { %4027 = vmatmul.msk.f32.gmra.mxu1 %vm346_vm2, %v4654_v8  ;;  %4060 = vmatmul.msk.f32.gmra.mxu2 %vm346_vm2, %v4654_v8 }
 0x114   : > { %v5165_v34 = vpop.f32.mrf.mxu3 }
 0x116   : > { %v5167_v26 = vpop.f32.mrf.mxu0  ;;  %v5169_v30 = vpop.f32.mrf.mxu2 }
 0x117   : > { %7756 = vst [vmem:[#allocation36_spill] sm:$0xff] %v5167_v26 }
 0x118   : > { %v5171_v61 = vpop.f32.mrf.mxu1 }
 0x119   : > { %7757 = vst [vmem:[#allocation37_spill] sm:$0xff] %v5171_v61  ;;  %4092 = vmatmul.msk.f32.gmra.mxu3 %vm346_vm2, %v4632_v4  ;;  %4125 = vmatmul.msk.f32.gmra.mxu0 %vm346_vm2, %v4632_v4  ;;  %v344_v61 = vld [vmem:[%s7710_s3 + $0x70] sm:$0x1]  ;;  %v345_v4 = vld [vmem:[%s7710_s3 + $0x78] sm:$0x1] }
 0x11a   : > { %4167 = vmatpush.msk.msra.mxu2 %vm443_vm1, %v344_v61  ;;  %4200 = vmatpush.msk.msra.mxu3 %vm443_vm1, %v345_v4 }
 0x11b   : > { %4028 = vmatmul.msk.f32.gmra.mxu1 %vm346_vm2, %v4674_v12  ;;  %4061 = vmatmul.msk.f32.gmra.mxu2 %vm346_vm2, %v4674_v12 }
 0x11c   : > { %v5181_v38 = vpop.f32.mrf.mxu3 }
 0x11e   : > { %v5183_v55 = vpop.f32.mrf.mxu0  ;;  %v5185_v26 = vpop.f32.mrf.mxu2 }
 0x11f   : > { %7758 = vst [vmem:[#allocation38_spill] sm:$0xff] %v5183_v55  ;;  %v343_v55 = vld [vmem:[%s7710_s3 + $0x68] sm:$0x1] }
 0x120   : > { %7759 = vst [vmem:[#allocation39_spill] sm:$0xff] %v5185_v26  ;;  %v5191_v49 = vpop.f32.mrf.mxu1  ;;  %4134 = vmatpush.msk.msra.mxu1 %vm443_vm1, %v343_v55 }
 0x121   : > { %7760 = vst [vmem:[#allocation40_spill] sm:$0xff] %v5191_v49  ;;  %4093 = vmatmul.msk.f32.gmra.mxu3 %vm346_vm2, %v4654_v8  ;;  %4126 = vmatmul.msk.f32.gmra.mxu0 %vm346_vm2, %v4654_v8  ;;  %v1791_v8 = vld [vmem:[%s7709_s2 + $0x8] sm:$0xff] }
 0x122   : > { %1903 = vmatpush.msra.mxu0 %v1791_v8 }
 0x123   : > { %4029 = vmatmul.msk.f32.gmra.mxu1 %vm346_vm2, %v4694_v16  ;;  %4062 = vmatmul.msk.f32.gmra.mxu2 %vm346_vm2, %v4694_v16 }
 0x124   : > { %v5205_v61 = vpop.f32.mrf.mxu3 }
 0x125   : > { %7761 = vst [vmem:[#allocation41_spill] sm:$0xff] %v5205_v61 }
 0x126   : > { %v5214_v4 = vpop.f32.mrf.mxu0  ;;  %v5216_v49 = vpop.f32.mrf.mxu2 }
 0x127   : > { %7762 = vst [vmem:[#allocation42_spill] sm:$0xff] %v5214_v4 }
 0x128   : > { %7763 = vst [vmem:[#allocation43_spill] sm:$0xff] %v5216_v49  ;;  %v5218_v26 = vpop.f32.mrf.mxu1 }
 0x129   : > { %7764 = vst [vmem:[#allocation44_spill] sm:$0xff] %v5218_v26  ;;  %4094 = vmatmul.msk.f32.gmra.mxu3 %vm346_vm2, %v4674_v12  ;;  %4127 = vmatmul.msk.f32.gmra.mxu0 %vm346_vm2, %v4674_v12 }
 0x12b   : > { %4030 = vmatmul.msk.f32.gmra.mxu1 %vm346_vm2, %v4728_v24  ;;  %4063 = vmatmul.msk.f32.gmra.mxu2 %vm346_vm2, %v4728_v24 }
 0x12c   : > { %v5228_v55 = vpop.f32.mrf.mxu3 }
 0x12d   : > { %7765 = vst [vmem:[#allocation45_spill] sm:$0xff] %v5228_v55 }
 0x12e   : > { %v5230_v8 = vpop.f32.mrf.mxu0  ;;  %v5232_v4 = vpop.f32.mrf.mxu2 }
 0x12f   : > { %7766 = vst [vmem:[#allocation46_spill] sm:$0xff] %v5230_v8  ;;  %v335_v8 = vld [vmem:[%s7710_s3 + $0x28] sm:$0xff] }
 0x130   : > { %7767 = vst [vmem:[#allocation47_spill] sm:$0xff] %v5232_v4  ;;  %v5234_v49 = vpop.f32.mrf.mxu1  ;;  %1048 = vmatpush.msra.mxu1 %v335_v8 }
 0x131   : > { %7768 = vst [vmem:[#allocation48_spill] sm:$0xff] %v5234_v49  ;;  %4095 = vmatmul.msk.f32.gmra.mxu3 %vm346_vm2, %v4694_v16  ;;  %4128 = vmatmul.msk.f32.gmra.mxu0 %vm346_vm2, %v4694_v16  ;;  %v336_v49 = vld [vmem:[%s7710_s3 + $0x30] sm:$0xff] }
 0x132   : > { %1161 = vmatpush.msra.mxu2 %v336_v49  ;;  %v337_v49 = vld [vmem:[%s7710_s3 + $0x38] sm:$0xff] }
 0x133   : > { %4031 = vmatmul.msk.f32.gmra.mxu1 %vm346_vm2, %v4762_v32  ;;  %4064 = vmatmul.msk.f32.gmra.mxu2 %vm346_vm2, %v4762_v32 }
 0x134   : > { %v5244_v12 = vpop.f32.mrf.mxu3  ;;  %1274 = vmatpush.msra.mxu3 %v337_v49 }
 0x135   : > { %7769 = vst [vmem:[#allocation49_spill] sm:$0xff] %v5244_v12 }
 0x136   : > { %v5252_v4 = vpop.f32.mrf.mxu0  ;;  %v5254_v26 = vpop.f32.mrf.mxu2 }
 0x137   : > { %7770 = vst [vmem:[#allocation50_spill] sm:$0xff] %v5252_v4 }
 0x138   : > { %7771 = vst [vmem:[#allocation51_spill] sm:$0xff] %v5254_v26  ;;  %v5256_v16 = vpop.f32.mrf.mxu1 }
 0x139   : > { %7772 = vst [vmem:[#allocation52_spill] sm:$0xff] %v5256_v16  ;;  %4096 = vmatmul.msk.f32.gmra.mxu3 %vm346_vm2, %v4728_v24  ;;  %4129 = vmatmul.msk.f32.gmra.mxu0 %vm346_vm2, %v4728_v24  ;;  %v1790_v24 = vld [vmem:[%s7709_s2] sm:$0xff] }
 0x13a   : > { %1904 = vmatpush.msra.mxu0 %v1790_v24 }
 0x13b   : > { %4032 = vmatmul.msk.f32.gmra.mxu1 %vm346_vm2, %v4782_v36  ;;  %4065 = vmatmul.msk.f32.gmra.mxu2 %vm346_vm2, %v4782_v36 }
 0x13c   : > { %v5266_v12 = vpop.f32.mrf.mxu3 }
 0x13d   : > { %7773 = vst [vmem:[#allocation53_spill] sm:$0xff] %v5266_v12 }
 0x13e   : > { %v5268_v4 = vpop.f32.mrf.mxu0  ;;  %v5270_v8 = vpop.f32.mrf.mxu2 }
 0x13f   : > { %7774 = vst [vmem:[#allocation54_spill] sm:$0xff] %v5268_v4 }
 0x140   : > { %7775 = vst [vmem:[#allocation55_spill] sm:$0xff] %v5270_v8  ;;  %v5278_v16 = vpop.f32.mrf.mxu1 }
 0x141   : > { %7776 = vst [vmem:[#allocation56_spill] sm:$0xff] %v5278_v16  ;;  %4097 = vmatmul.msk.f32.gmra.mxu3 %vm346_vm2, %v4762_v32  ;;  %4130 = vmatmul.msk.f32.gmra.mxu0 %vm346_vm2, %v4762_v32 }
 0x143   : > { %4033 = vmatmul.msk.f32.gmra.mxu1 %vm346_vm2, %v4802_v40  ;;  %4066 = vmatmul.msk.f32.gmra.mxu2 %vm346_vm2, %v4802_v40 }
 0x144   : > { %v5288_v4 = vpop.f32.mrf.mxu3 }
 0x145   : > { %7777 = vst [vmem:[#allocation57_spill] sm:$0xff] %v5288_v4 }
 0x146   : > { %v5290_v8 = vpop.f32.mrf.mxu0  ;;  %v5292_v49 = vpop.f32.mrf.mxu2 }
 0x147   : > { %7778 = vst [vmem:[#allocation58_spill] sm:$0xff] %v5290_v8 }
 0x148   : > { %7779 = vst [vmem:[#allocation59_spill] sm:$0xff] %v5292_v49  ;;  %v5294_v24 = vpop.f32.mrf.mxu1 }
 0x149   : > { %7780 = vst [vmem:[#allocation60_spill] sm:$0xff] %v5294_v24  ;;  %4098 = vmatmul.msk.f32.gmra.mxu3 %vm346_vm2, %v4782_v36  ;;  %4131 = vmatmul.msk.f32.gmra.mxu0 %vm346_vm2, %v4782_v36  ;;  %v1404_v36 = vlaneseq }
 0x14b   : > { %4034 = vmatmul.msk.f32.gmra.mxu1 %vm346_vm2, %v4816_v42  ;;  %4067 = vmatmul.msk.f32.gmra.mxu2 %vm346_vm2, %v4816_v42 }
 0x14c   : > { %v5304_v32 = vpop.f32.mrf.mxu3 }
 0x14d   : > { %7781 = vst [vmem:[#allocation61_spill] sm:$0xff] %v5304_v32 }
 0x14e   : > { %v5306_v16 = vpop.f32.mrf.mxu0  ;;  %v5308_v8 = vpop.f32.mrf.mxu2 }
 0x14f   : > { %7782 = vst [vmem:[#allocation62_spill] sm:$0xff] %v5306_v16 }
 0x150   : > { %7783 = vst [vmem:[#allocation63_spill] sm:$0xff] %v5308_v8  ;;  %v5310_v49 = vpop.f32.mrf.mxu1 }
 0x151   : > { %7784 = vst [vmem:[#allocation64_spill] sm:$0xff] %v5310_v49  ;;  %4099 = vmatmul.msk.f32.gmra.mxu3 %vm346_vm2, %v4802_v40  ;;  %4132 = vmatmul.msk.f32.gmra.mxu0 %vm346_vm2, %v4802_v40  ;;  %v5326_v49 = vand.u32 127, %v1404_v36  ;;  %v1408_v40 = vpop.permute.xlu0 %1407  ;;  %v7715_v36 = vmov 0.0  }
 0x153   : > { %4135 = vmatmul.msk.f32.vlgmr.msra.gmra.mxu1 %vm346_vm2, %v4629_v3  ;;  %4168 = vmatmul.msk.f32.vlgmr.msra.gmra.mxu2 %vm346_vm2, %v4629_v3  ;;  %7788 = vst [vmem:[#allocation68_spill] sm:$0xff] %v5326_v49  ;;  %vm1502_vm3 = vcmp.eq.s32.totalorder %v5326_v49, %v1408_v40 }
 0x154   : > { %v5320_v24 = vpop.f32.mrf.mxu3 }
 0x155   : > { %7785 = vst [vmem:[#allocation65_spill] sm:$0xff] %v5320_v24 }
 0x156   : > { %v5322_v16 = vpop.f32.mrf.mxu0  ;;  %v5324_v8 = vpop.f32.mrf.mxu2 }
 0x157   : > { %7786 = vst [vmem:[#allocation66_spill] sm:$0xff] %v5322_v16 }
 0x158   : > { %7787 = vst [vmem:[#allocation67_spill] sm:$0xff] %v5324_v8  ;;  %v5328_v32 = vpop.f32.mrf.mxu1 }
 0x159   : > { %7789 = vst [vmem:[#allocation69_spill] sm:$0xff] %v5328_v32  ;;  %4100 = vmatmul.msk.f32.gmra.mxu3 %vm346_vm2, %v4816_v42  ;;  %4133 = vmatmul.msk.f32.gmra.mxu0 %vm346_vm2, %v4816_v42  ;;  %v4233_v32 = vsel %vm1502_vm3, 1.0, %v7715_v36  ;;  %v1411_v40 = vpop.permute.xlu0 %1410 }
 0x15a   : > { %vm1503_vm5 = vcmp.eq.s32.totalorder %v5326_v49, %v1411_v40 }
 0x15b   : > { %4136 = vmatmul.msk.f32.gmra.mxu1 %vm346_vm2, %v4651_v7  ;;  %4169 = vmatmul.msk.f32.gmra.mxu2 %vm346_vm2, %v4651_v7 }
 0x15c   : > { %v5339_v16 = vpop.f32.mrf.mxu3 }
 0x15d   : > { %7790 = vst [vmem:[#allocation70_spill] sm:$0xff] %v5339_v16 }
 0x15e   : > { %v5342_v8 = vpop.f32.mrf.mxu0  ;;  %v5344_v24 = vpop.f32.mrf.mxu2 }
 0x15f   : > { %7791 = vst [vmem:[#allocation71_spill] sm:$0xff] %v5342_v8 }
 0x160   : > { %7792 = vst [vmem:[#allocation72_spill] sm:$0xff] %v5344_v24  ;;  %v5346_v42 = vpop.f32.mrf.mxu1 }
 0x161   : > { %7793 = vst [vmem:[#allocation73_spill] sm:$0xff] %v5346_v42  ;;  %4201 = vmatmul.msk.f32.vlgmr.msra.gmra.mxu3 %vm346_vm2, %v4629_v3  ;;  %4297 = vmatmul.msk.f32.vlgmr.msra.gmra.mxu0 %vm1792_vm4, %v4233_v32  ;;  %v7797_v42 = vmov 0.0   ;;  %v1414_v3 = vpop.permute.xlu1 %1413 }
 0x162   : > { %v4234_v16 = vsel %vm1503_vm5, 1.0, %v7797_v42  ;;  %vm1504_vm6 = vcmp.eq.s32.totalorder %v5326_v49, %v1414_v3 }
 0x163   : > { %4137 = vmatmul.msk.f32.gmra.mxu1 %vm346_vm2, %v4671_v11  ;;  %4170 = vmatmul.msk.f32.gmra.mxu2 %vm346_vm2, %v4671_v11  ;;  %v4235_v40 = vsel %vm1504_vm6, 1.0, %v7797_v42 }
 0x164   : > { %v5355_v36 = vpop.f32.mrf.mxu3 }
 0x165   : > { %7794 = vst [vmem:[#allocation74_spill] sm:$0xff] %v5355_v36 }
 0x166   : > { %v5358_v8 = vpop.f32.mrf.mxu0  ;;  %v5360_v24 = vpop.f32.mrf.mxu2 }
 0x167   : > { %7795 = vst [vmem:[#allocation75_spill] sm:$0xff] %v5358_v8 }
 0x168   : > { %7796 = vst [vmem:[#allocation76_spill] sm:$0xff] %v5360_v24  ;;  %v5363_v4 = vpop.f32.mrf.mxu1 }
 0x169   : > { %7798 = vst [vmem:[#allocation77_spill] sm:$0xff] %v5363_v4  ;;  %4202 = vmatmul.msk.f32.gmra.mxu3 %vm346_vm2, %v4651_v7  ;;  %4298 = vmatmul.msk.f32.gmra.mxu0 %vm1792_vm4, %v4234_v16  ;;  %v1417_v7 = vpop.permute.xlu1 %1416 }
 0x16a   : > { %vm1505_vm7 = vcmp.eq.s32.totalorder %v5326_v49, %v1417_v7 }
 0x16b   : > { %4138 = vmatmul.msk.f32.gmra.mxu1 %vm346_vm2, %v4691_v15  ;;  %4171 = vmatmul.msk.f32.gmra.mxu2 %vm346_vm2, %v4691_v15  ;;  %v4236_v3 = vsel %vm1505_vm7, 1.0, %v7797_v42 }
 0x16c   : > { %v5373_v32 = vpop.f32.mrf.mxu3 }
 0x16d   : > { %7799 = vst [vmem:[#allocation78_spill] sm:$0xff] %v5373_v32 }
 0x16e   : > { %v5376_v8 = vpop.f32.mrf.mxu0  ;;  %v5378_v4 = vpop.f32.mrf.mxu2 }
 0x16f   : > { %7800 = vst [vmem:[#allocation79_spill] sm:$0xff] %v5376_v8 }
 0x170   : > { %7801 = vst [vmem:[#allocation80_spill] sm:$0xff] %v5378_v4  ;;  %v5380_v24 = vpop.f32.mrf.mxu1 }
 0x171   : > { %7802 = vst [vmem:[#allocation81_spill] sm:$0xff] %v5380_v24  ;;  %4203 = vmatmul.msk.f32.gmra.mxu3 %vm346_vm2, %v4671_v11  ;;  %4299 = vmatmul.msk.f32.gmra.mxu0 %vm1792_vm4, %v4235_v40  ;;  %v1420_v11 = vpop.permute.xlu2 %1419 }
 0x172   : > { %vm1506_vm8 = vcmp.eq.s32.totalorder %v5326_v49, %v1420_v11 }
 0x173   : > { %4139 = vmatmul.msk.f32.gmra.mxu1 %vm346_vm2, %v4725_v23  ;;  %4172 = vmatmul.msk.f32.gmra.mxu2 %vm346_vm2, %v4725_v23  ;;  %v4237_v7 = vsel %vm1506_vm8, 1.0, %v7797_v42 }
 0x174   : > { %v5390_v16 = vpop.f32.mrf.mxu3 }
 0x175   : > { %7803 = vst [vmem:[#allocation82_spill] sm:$0xff] %v5390_v16 }
 0x176   : > { %v5393_v8 = vpop.f32.mrf.mxu0  ;;  %v5395_v24 = vpop.f32.mrf.mxu2 }
 0x177   : > { %7804 = vst [vmem:[#allocation83_spill] sm:$0xff] %v5393_v8 }
 0x178   : > { %7805 = vst [vmem:[#allocation84_spill] sm:$0xff] %v5395_v24  ;;  %v5397_v4 = vpop.f32.mrf.mxu1 }
 0x179   : > { %7806 = vst [vmem:[#allocation85_spill] sm:$0xff] %v5397_v4  ;;  %4204 = vmatmul.msk.f32.gmra.mxu3 %vm346_vm2, %v4691_v15  ;;  %4300 = vmatmul.msk.f32.gmra.mxu0 %vm1792_vm4, %v4236_v3  ;;  %v1423_v15 = vpop.permute.xlu2 %1422 }
 0x17a   : > { %vm1507_vm9 = vcmp.eq.s32.totalorder %v5326_v49, %v1423_v15 }
 0x17b   : > { %4140 = vmatmul.msk.f32.gmra.mxu1 %vm346_vm2, %v4759_v31  ;;  %4173 = vmatmul.msk.f32.gmra.mxu2 %vm346_vm2, %v4759_v31  ;;  %v4238_v11 = vsel %vm1507_vm9, 1.0, %v7797_v42 }
 0x17c   : > { %v5407_v40 = vpop.f32.mrf.mxu3 }
 0x17d   : > { %7807 = vst [vmem:[#allocation86_spill] sm:$0xff] %v5407_v40 }
 0x17e   : > { %v5410_v8 = vpop.f32.mrf.mxu0  ;;  %v5412_v4 = vpop.f32.mrf.mxu2 }
 0x17f   : > { %7808 = vst [vmem:[#allocation87_spill] sm:$0xff] %v5410_v8 }
 0x180   : > { %7809 = vst [vmem:[#allocation88_spill] sm:$0xff] %v5412_v4  ;;  %v5414_v24 = vpop.f32.mrf.mxu1 }
 0x181   : > { %7810 = vst [vmem:[#allocation89_spill] sm:$0xff] %v5414_v24  ;;  %4205 = vmatmul.msk.f32.gmra.mxu3 %vm346_vm2, %v4725_v23  ;;  %4301 = vmatmul.msk.f32.gmra.mxu0 %vm1792_vm4, %v4237_v7  ;;  %v1426_v7 = vpop.permute.xlu0 %1425 }
 0x182   : > { %vm1508_vm10 = vcmp.eq.s32.totalorder %v5326_v49, %v1426_v7 }
 0x183   : > { %4141 = vmatmul.msk.f32.gmra.mxu1 %vm346_vm2, %v4779_v35  ;;  %4174 = vmatmul.msk.f32.gmra.mxu2 %vm346_vm2, %v4779_v35 }
 0x184   : > { %v5424_v3 = vpop.f32.mrf.mxu3 }
 0x185   : > { %7811 = vst [vmem:[#allocation90_spill] sm:$0xff] %v5424_v3  ;;  %v2702_v3 = vld [vmem:[%s7711_s4 + $0xc8] sm:$0xff] }
 0x186   : > { %v5427_v8 = vpop.f32.mrf.mxu0  ;;  %v5429_v24 = vpop.f32.mrf.mxu2 }
 0x187   : > { %7812 = vst [vmem:[#allocation91_spill] sm:$0xff] %v5427_v8 }
 0x188   : > { %7813 = vst [vmem:[#allocation92_spill] sm:$0xff] %v5429_v24  ;;  %v5431_v23 = vpop.f32.mrf.mxu1 }
 0x189   : > { %7814 = vst [vmem:[#allocation93_spill] sm:$0xff] %v5431_v23  ;;  %4206 = vmatmul.msk.f32.gmra.mxu3 %vm346_vm2, %v4759_v31  ;;  %4302 = vmatmul.msk.f32.gmra.mxu0 %vm1792_vm4, %v4238_v11  ;;  %v4239_v23 = vsel %vm1508_vm10, 1.0, %v7797_v42  ;;  %v1429_v11 = vpop.permute.xlu1 %1428 }
 0x18a   : > { %vm1509_vm11 = vcmp.eq.s32.totalorder %v5326_v49, %v1429_v11 }
 0x18b   : > { %4142 = vmatmul.msk.f32.gmra.mxu1 %vm346_vm2, %v4799_v39  ;;  %4175 = vmatmul.msk.f32.gmra.mxu2 %vm346_vm2, %v4799_v39 }
 0x18c   : > { %v5440_v15 = vpop.f32.mrf.mxu3 }
 0x18d   : > { %7815 = vst [vmem:[#allocation94_spill] sm:$0xff] %v5440_v15 }
 0x18e   : > { %v5443_v8 = vpop.f32.mrf.mxu0  ;;  %v5445_v24 = vpop.f32.mrf.mxu2 }
 0x18f   : > { %7816 = vst [vmem:[#allocation95_spill] sm:$0xff] %v5443_v8 }
 0x190   : > { %7817 = vst [vmem:[#allocation96_spill] sm:$0xff] %v5445_v24  ;;  %v5448_v31 = vpop.f32.mrf.mxu1 }
 0x191   : > { %7818 = vst [vmem:[#allocation97_spill] sm:$0xff] %v5448_v31  ;;  %4207 = vmatmul.msk.f32.gmra.mxu3 %vm346_vm2, %v4779_v35  ;;  %4303 = vmatmul.msk.f32.gmra.mxu0 %vm1792_vm4, %v4239_v23  ;;  %v4240_v31 = vsel %vm1509_vm11, 1.0, %v7797_v42  ;;  %v1432_v23 = vpop.permute.xlu2 %1431 }
 0x192   : > { %vm1510_vm12 = vcmp.eq.s32.totalorder %v5326_v49, %v1432_v23 }
 0x193   : > { %4143 = vmatmul.msk.f32.gmra.mxu1 %vm346_vm2, %v4813_v41  ;;  %4176 = vmatmul.msk.f32.gmra.mxu2 %vm346_vm2, %v4813_v41 }
 0x194   : > { %v5457_v7 = vpop.f32.mrf.mxu3 }
 0x195   : > { %7819 = vst [vmem:[#allocation98_spill] sm:$0xff] %v5457_v7 }
 0x196   : > { %v5460_v8 = vpop.f32.mrf.mxu0  ;;  %v5462_v24 = vpop.f32.mrf.mxu2 }
 0x197   : > { %7820 = vst [vmem:[#allocation99_spill] sm:$0xff] %v5460_v8 }
 0x198   : > { %7821 = vst [vmem:[#allocation100_spill] sm:$0xff] %v5462_v24  ;;  %v5465_v35 = vpop.f32.mrf.mxu1 }
 0x199   : > { %7822 = vst [vmem:[#allocation101_spill] sm:$0xff] %v5465_v35  ;;  %4208 = vmatmul.msk.f32.gmra.mxu3 %vm346_vm2, %v4799_v39  ;;  %4304 = vmatmul.msk.f32.gmra.mxu0 %vm1792_vm4, %v4240_v31  ;;  %v4241_v35 = vsel %vm1510_vm12, 1.0, %v7797_v42  ;;  %v1435_v31 = vpop.permute.xlu0 %1434 }
 0x19a   : > { %vm1511_vm13 = vcmp.eq.s32.totalorder %v5326_v49, %v1435_v31 }
 0x19b   : > { %4144 = vmatmul.msk.f32.gmra.mxu1 %vm346_vm2, %v4637_v5  ;;  %4177 = vmatmul.msk.f32.gmra.mxu2 %vm346_vm2, %v4637_v5 }
 0x19c   : > { %v5474_v11 = vpop.f32.mrf.mxu3 }
 0x19d   : > { %7823 = vst [vmem:[#allocation102_spill] sm:$0xff] %v5474_v11 }
 0x19e   : > { %v5477_v8 = vpop.f32.mrf.mxu0  ;;  %v5479_v24 = vpop.f32.mrf.mxu2 }
 0x19f   : > { %7824 = vst [vmem:[#allocation103_spill] sm:$0xff] %v5477_v8 }
 0x1a0   : > { %7825 = vst [vmem:[#allocation104_spill] sm:$0xff] %v5479_v24  ;;  %v5482_v39 = vpop.f32.mrf.mxu1 }
 0x1a1   : > { %7826 = vst [vmem:[#allocation105_spill] sm:$0xff] %v5482_v39  ;;  %4209 = vmatmul.msk.f32.gmra.mxu3 %vm346_vm2, %v4813_v41  ;;  %4305 = vmatmul.msk.f32.gmra.mxu0 %vm1792_vm4, %v4241_v35  ;;  %v4242_v39 = vsel %vm1511_vm13, 1.0, %v7797_v42  ;;  %v1438_v35 = vpop.permute.xlu1 %1437 }
 0x1a2   : > { %vm1512_vm14 = vcmp.eq.s32.totalorder %v5326_v49, %v1438_v35 }
 0x1a3   : > { %4145 = vmatmul.msk.f32.gmra.mxu1 %vm346_vm2, %v4657_v9  ;;  %4178 = vmatmul.msk.f32.gmra.mxu2 %vm346_vm2, %v4657_v9 }
 0x1a4   : > { %v5491_v23 = vpop.f32.mrf.mxu3 }
 0x1a5   : > { %7827 = vst [vmem:[#allocation106_spill] sm:$0xff] %v5491_v23 }
 0x1a6   : > { %v5494_v8 = vpop.f32.mrf.mxu0  ;;  %v5496_v24 = vpop.f32.mrf.mxu2 }
 0x1a7   : > { %7828 = vst [vmem:[#allocation107_spill] sm:$0xff] %v5494_v8 }
 0x1a8   : > { %7829 = vst [vmem:[#allocation108_spill] sm:$0xff] %v5496_v24  ;;  %v5499_v41 = vpop.f32.mrf.mxu1 }
 0x1a9   : > { %7830 = vst [vmem:[#allocation109_spill] sm:$0xff] %v5499_v41  ;;  %4210 = vmatmul.msk.f32.gmra.mxu3 %vm346_vm2, %v4637_v5  ;;  %4306 = vmatmul.msk.f32.gmra.mxu0 %vm1792_vm4, %v4242_v39  ;;  %v4243_v41 = vsel %vm1512_vm14, 1.0, %v7797_v42  ;;  %v1441_v39 = vpop.permute.xlu2 %1440 }
 0x1aa   : > { %vm1513_vm15 = vcmp.eq.s32.totalorder %v5326_v49, %v1441_v39 }
 0x1ab   : > { %4146 = vmatmul.msk.f32.gmra.mxu1 %vm346_vm2, %v4677_v13  ;;  %4179 = vmatmul.msk.f32.gmra.mxu2 %vm346_vm2, %v4677_v13 }
 0x1ac   : > { %v5508_v31 = vpop.f32.mrf.mxu3 }
 0x1ad   : > { %7831 = vst [vmem:[#allocation110_spill] sm:$0xff] %v5508_v31 }
 0x1ae   : > { %v5511_v8 = vpop.f32.mrf.mxu0  ;;  %v5513_v24 = vpop.f32.mrf.mxu2 }
 0x1af   : > { %7832 = vst [vmem:[#allocation111_spill] sm:$0xff] %v5511_v8 }
 0x1b0   : > { %7833 = vst [vmem:[#allocation112_spill] sm:$0xff] %v5513_v24  ;;  %v5516_v5 = vpop.f32.mrf.mxu1 }
 0x1b1   : > { %7834 = vst [vmem:[#allocation113_spill] sm:$0xff] %v5516_v5  ;;  %4211 = vmatmul.msk.f32.gmra.mxu3 %vm346_vm2, %v4657_v9  ;;  %4307 = vmatmul.msk.f32.gmra.mxu0 %vm1792_vm4, %v4243_v41  ;;  %v4244_v5 = vsel %vm1513_vm15, 1.0, %v7797_v42  ;;  %v1444_v41 = vpop.permute.xlu0 %1443 }
 0x1b2   : > { %vm1514_vm0 = vcmp.eq.s32.totalorder %v5326_v49, %v1444_v41 }
 0x1b3   : > { %4147 = vmatmul.msk.f32.gmra.mxu1 %vm346_vm2, %v4697_v17  ;;  %4180 = vmatmul.msk.f32.gmra.mxu2 %vm346_vm2, %v4697_v17 }
 0x1b4   : > { %v5525_v35 = vpop.f32.mrf.mxu3 }
 0x1b5   : > { %7835 = vst [vmem:[#allocation114_spill] sm:$0xff] %v5525_v35 }
 0x1b6   : > { %v5528_v8 = vpop.f32.mrf.mxu0  ;;  %v5530_v24 = vpop.f32.mrf.mxu2 }
 0x1b7   : > { %7836 = vst [vmem:[#allocation115_spill] sm:$0xff] %v5528_v8 }
 0x1b8   : > { %7837 = vst [vmem:[#allocation116_spill] sm:$0xff] %v5530_v24  ;;  %v5533_v9 = vpop.f32.mrf.mxu1 }
 0x1b9   : > { %7838 = vst [vmem:[#allocation117_spill] sm:$0xff] %v5533_v9  ;;  %4212 = vmatmul.msk.f32.gmra.mxu3 %vm346_vm2, %v4677_v13  ;;  %4308 = vmatmul.msk.f32.gmra.mxu0 %vm1792_vm4, %v4244_v5  ;;  %v4245_v9 = vsel %vm1514_vm0, 1.0, %v7797_v42  ;;  %v1447_v5 = vpop.permute.xlu1 %1446 }
 0x1ba   : > { %vm1515_vm1 = vcmp.eq.s32.totalorder %v5326_v49, %v1447_v5 }
 0x1bb   : > { %4148 = vmatmul.msk.f32.gmra.mxu1 %vm346_vm2, %v4731_v25  ;;  %4181 = vmatmul.msk.f32.gmra.mxu2 %vm346_vm2, %v4731_v25 }
 0x1bc   : > { %v5542_v39 = vpop.f32.mrf.mxu3 }
 0x1bd   : > { %7839 = vst [vmem:[#allocation118_spill] sm:$0xff] %v5542_v39 }
 0x1be   : > { %v5545_v8 = vpop.f32.mrf.mxu0  ;;  %v5547_v24 = vpop.f32.mrf.mxu2 }
 0x1bf   : > { %7840 = vst [vmem:[#allocation119_spill] sm:$0xff] %v5545_v8 }
 0x1c0   : > { %7841 = vst [vmem:[#allocation120_spill] sm:$0xff] %v5547_v24  ;;  %v5550_v13 = vpop.f32.mrf.mxu1 }
 0x1c1   : > { %7842 = vst [vmem:[#allocation121_spill] sm:$0xff] %v5550_v13  ;;  %4213 = vmatmul.msk.f32.gmra.mxu3 %vm346_vm2, %v4697_v17  ;;  %4309 = vmatmul.msk.f32.gmra.mxu0 %vm1792_vm4, %v4245_v9  ;;  %v4246_v17 = vsel %vm1515_vm1, 1.0, %v7797_v42  ;;  %v1450_v9 = vpop.permute.xlu2 %1449 }
 0x1c2   : > { %vm1516_vm3 = vcmp.eq.s32.totalorder %v5326_v49, %v1450_v9  ;;  %v1453_v9 = vpop.permute.xlu0 %1452 }
 0x1c3   : > { %4149 = vmatmul.msk.f32.gmra.mxu1 %vm346_vm2, %v4765_v33  ;;  %4182 = vmatmul.msk.f32.gmra.mxu2 %vm346_vm2, %v4765_v33  ;;  %vm1517_vm5 = vcmp.eq.s32.totalorder %v5326_v49, %v1453_v9 }
 0x1c4   : > { %v5559_v41 = vpop.f32.mrf.mxu3 }
 0x1c5   : > { %7843 = vst [vmem:[#allocation122_spill] sm:$0xff] %v5559_v41 }
 0x1c6   : > { %v5562_v8 = vpop.f32.mrf.mxu0  ;;  %v5564_v24 = vpop.f32.mrf.mxu2 }
 0x1c7   : > { %7844 = vst [vmem:[#allocation123_spill] sm:$0xff] %v5562_v8 }
 0x1c8   : > { %7845 = vst [vmem:[#allocation124_spill] sm:$0xff] %v5564_v24  ;;  %v5567_v13 = vpop.f32.mrf.mxu1 }
 0x1c9   : > { %7846 = vst [vmem:[#allocation125_spill] sm:$0xff] %v5567_v13  ;;  %4214 = vmatmul.msk.f32.gmra.mxu3 %vm346_vm2, %v4731_v25  ;;  %4310 = vmatmul.msk.f32.gmra.mxu0 %vm1792_vm4, %v4246_v17  ;;  %v4247_v13 = vsel %vm1516_vm3, 1.0, %v7797_v42  ;;  %v4448_v17 = vld [vmem:[%s4617_s10 + $0x80] sm:$0xff] }
 0x1cb   : > { %4150 = vmatmul.msk.f32.gmra.mxu1 %vm346_vm2, %v4785_v37  ;;  %4183 = vmatmul.msk.f32.gmra.mxu2 %vm346_vm2, %v4785_v37 }
 0x1cc   : > { %v5576_v5 = vpop.f32.mrf.mxu3 }
 0x1cd   : > { %7847 = vst [vmem:[#allocation126_spill] sm:$0xff] %v5576_v5 }
 0x1ce   : > { %v5579_v8 = vpop.f32.mrf.mxu0  ;;  %v5581_v24 = vpop.f32.mrf.mxu2 }
 0x1cf   : > { %7848 = vst [vmem:[#allocation127_spill] sm:$0xff] %v5579_v8 }
 0x1d0   : > { %7849 = vst [vmem:[#allocation128_spill] sm:$0xff] %v5581_v24  ;;  %v5584_v25 = vpop.f32.mrf.mxu1 }
 0x1d1   : > { %7850 = vst [vmem:[#allocation129_spill] sm:$0xff] %v5584_v25  ;;  %4215 = vmatmul.msk.f32.gmra.mxu3 %vm346_vm2, %v4765_v33  ;;  %4311 = vmatmul.msk.f32.gmra.mxu0 %vm1792_vm4, %v4247_v13  ;;  %v4248_v25 = vsel %vm1517_vm5, 1.0, %v7797_v42  ;;  %v4449_v33 = vld [vmem:[%s4617_s10 + $0x88] sm:$0xff]  ;;  %v1456_v13 = vpop.permute.xlu1 %1455 }
 0x1d2   : > { %vm1518_vm6 = vcmp.eq.s32.totalorder %v5326_v49, %v1456_v13  ;;  %v4450_v13 = vld [vmem:[%s4617_s10 + $0x90] sm:$0xff] }
 0x1d3   : > { %4151 = vmatmul.msk.f32.gmra.mxu1 %vm346_vm2, %v4448_v17  ;;  %4184 = vmatmul.msk.f32.gmra.mxu2 %vm346_vm2, %v4448_v17 }
 0x1d4   : > { %v5592_v5 = vpop.f32.mrf.mxu3 }
 0x1d5   : > { %7851 = vst [vmem:[#allocation130_spill] sm:$0xff] %v5592_v5 }
 0x1d6   : > { %v5595_v8 = vpop.f32.mrf.mxu0  ;;  %v5597_v24 = vpop.f32.mrf.mxu2 }
 0x1d7   : > { %7852 = vst [vmem:[#allocation131_spill] sm:$0xff] %v5595_v8 }
 0x1d8   : > { %7853 = vst [vmem:[#allocation132_spill] sm:$0xff] %v5597_v24  ;;  %v5600_v41 = vpop.f32.mrf.mxu1 }
 0x1d9   : > { %7854 = vst [vmem:[#allocation133_spill] sm:$0xff] %v5600_v41  ;;  %4216 = vmatmul.msk.f32.gmra.mxu3 %vm346_vm2, %v4785_v37  ;;  %4312 = vmatmul.msk.f32.gmra.mxu0 %vm1792_vm4, %v4248_v25  ;;  %v4249_v37 = vsel %vm1518_vm6, 1.0, %v7797_v42 }
 0x1db   : > { %4152 = vmatmul.msk.f32.gmra.mxu1 %vm346_vm2, %v4449_v33  ;;  %4185 = vmatmul.msk.f32.gmra.mxu2 %vm346_vm2, %v4449_v33 }
 0x1dc   : > { %v5608_v9 = vpop.f32.mrf.mxu3 }
 0x1dd   : > { %7855 = vst [vmem:[#allocation134_spill] sm:$0xff] %v5608_v9  ;;  %v1403_v9 = vld [vmem:[%s4612_s30 + $0xf8] sm:$0xff] }
 0x1de   : > { %v5611_v8 = vpop.f32.mrf.mxu0  ;;  %v5613_v24 = vpop.f32.mrf.mxu2 }
 0x1df   : > { %7856 = vst [vmem:[#allocation135_spill] sm:$0xff] %v5613_v24  ;;  %2226 = vrot.lane.b32.xlu0 %v5611_v8, %s4547_s8  ;;  %2130 = vrot.lane.b32.xlu2 %v5611_v8, %s4548_s9  ;;  %v1459_v24 = vpop.permute.xlu2 %1458 }
 0x1e0   : > { %2034 = vrot.lane.b32.xlu1 %v5611_v8, %s4549_s11  ;;  %v5622_v25 = vpop.f32.mrf.mxu1  ;;  %vm1519_vm7 = vcmp.eq.s32.totalorder %v5326_v49, %v1459_v24  ;;  %v4451_v24 = vld [vmem:[%s4617_s10 + $0x98] sm:$0xff] }
 0x1e1   : > { %7857 = vst [vmem:[#allocation136_spill] sm:$0xff] %v5622_v25  ;;  %4217 = vmatmul.msk.f32.gmra.mxu3 %vm346_vm2, %v4448_v17  ;;  %4313 = vmatmul.msk.f32.gmra.mxu0 %vm1792_vm4, %v4249_v37  ;;  %v4250_v17 = vsel %vm1519_vm7, 1.0, %v7797_v42  ;;  %vm2355_vm7 = vcmask 523264  }
 0x1e3   : > { %4153 = vmatmul.msk.f32.gmra.mxu1 %vm346_vm2, %v4450_v13  ;;  %4186 = vmatmul.msk.f32.gmra.mxu2 %vm346_vm2, %v4450_v13 }
 0x1e4   : > { %v5629_v41 = vpop.f32.mrf.mxu3 }
 0x1e5   : > { %7858 = vst [vmem:[#allocation137_spill] sm:$0xff] %v5629_v41 }
 0x1e6   : > { %v5633_v5 = vpop.f32.mrf.mxu0  ;;  %v5635_v39 = vpop.f32.mrf.mxu2 }
 0x1e7   : > { %7859 = vst [vmem:[#allocation138_spill] sm:$0xff] %v5635_v39  ;;  %2132 = vrot.lane.b32.xlu0 %v5633_v5, %s4548_s9  ;;  %2036 = vrot.lane.b32.xlu2 %v5633_v5, %s4549_s11  ;;  %v1462_v39 = vpop.permute.xlu0 %1461 }
 0x1e8   : > { %1500 = vperm.xlu1 %4443, %v1403_v9   ;;  %v5642_v37 = vpop.f32.mrf.mxu1  ;;  %vm1520_vm8 = vcmp.eq.s32.totalorder %v5326_v49, %v1462_v39  ;;  %v4452_v39 = vld [vmem:[%s4617_s10 + $0xa0] sm:$0xff] }
 0x1e9   : > { %7860 = vst [vmem:[#allocation139_spill] sm:$0xff] %v5642_v37  ;;  %4218 = vmatmul.msk.f32.gmra.mxu3 %vm346_vm2, %v4449_v33  ;;  %4314 = vmatmul.msk.f32.gmra.mxu0 %vm1792_vm4, %v4250_v17  ;;  %v4251_v33 = vsel %vm1520_vm8, 1.0, %v7797_v42  ;;  %vm2322_vm8 = vcmask 261120  }
 0x1eb   : > { %4154 = vmatmul.msk.f32.gmra.mxu1 %vm346_vm2, %v4451_v24  ;;  %4187 = vmatmul.msk.f32.gmra.mxu2 %vm346_vm2, %v4451_v24 }
 0x1ec   : > { %v5649_v25 = vpop.f32.mrf.mxu3 }
 0x1ed   : > { %7861 = vst [vmem:[#allocation140_spill] sm:$0xff] %v5649_v25 }
 0x1ee   : > { %v5652_v41 = vpop.f32.mrf.mxu0  ;;  %v5654_v9 = vpop.f32.mrf.mxu2 }
 0x1ef   : > { %7862 = vst [vmem:[#allocation141_spill] sm:$0xff] %v5654_v9  ;;  %2134 = vrot.lane.b32.xlu0 %v5652_v41, %s4548_s9  ;;  %2038 = vrot.lane.b32.xlu2 %v5652_v41, %s4549_s11  ;;  %v1465_v9 = vpop.permute.xlu1 %1464 }
 0x1f0   : > { %2228 = vrot.lane.b32.xlu1 %v5633_v5, %s4547_s8  ;;  %v5663_v17 = vpop.f32.mrf.mxu1  ;;  %vm1521_vm9 = vcmp.eq.s32.totalorder %v5326_v49, %v1465_v9  ;;  %v4453_v9 = vld [vmem:[%s4617_s10 + $0xa8] sm:$0xff] }
 0x1f1   : > { %7863 = vst [vmem:[#allocation142_spill] sm:$0xff] %v5663_v17  ;;  %4219 = vmatmul.msk.f32.gmra.mxu3 %vm346_vm2, %v4450_v13  ;;  %4315 = vmatmul.msk.f32.gmra.mxu0 %vm1792_vm4, %v4251_v33  ;;  %v4252_v13 = vsel %vm1521_vm9, 1.0, %v7797_v42  ;;  %vm2388_vm9 = vcmask 785408  }
 0x1f3   : > { %4155 = vmatmul.msk.f32.gmra.mxu1 %vm346_vm2, %v4452_v39  ;;  %4188 = vmatmul.msk.f32.gmra.mxu2 %vm346_vm2, %v4452_v39 }
 0x1f4   : > { %v5670_v37 = vpop.f32.mrf.mxu3 }
 0x1f5   : > { %7864 = vst [vmem:[#allocation143_spill] sm:$0xff] %v5670_v37 }
 0x1f6   : > { %v5673_v25 = vpop.f32.mrf.mxu0  ;;  %v5675_v35 = vpop.f32.mrf.mxu2 }
 0x1f7   : > { %7865 = vst [vmem:[#allocation144_spill] sm:$0xff] %v5675_v35  ;;  %2136 = vrot.lane.b32.xlu0 %v5673_v25, %s4548_s9  ;;  %2040 = vrot.lane.b32.xlu2 %v5673_v25, %s4549_s11  ;;  %v1468_v35 = vpop.permute.xlu2 %1467 }
 0x1f8   : > { %2230 = vrot.lane.b32.xlu1 %v5652_v41, %s4547_s8  ;;  %v5684_v33 = vpop.f32.mrf.mxu1  ;;  %vm1522_vm10 = vcmp.eq.s32.totalorder %v5326_v49, %v1468_v35  ;;  %v4454_v35 = vld [vmem:[%s4617_s10 + $0xb0] sm:$0xff] }
 0x1f9   : > { %7866 = vst [vmem:[#allocation145_spill] sm:$0xff] %v5684_v33  ;;  %4220 = vmatmul.msk.f32.gmra.mxu3 %vm346_vm2, %v4451_v24  ;;  %4316 = vmatmul.msk.f32.gmra.mxu0 %vm1792_vm4, %v4252_v13  ;;  %v4253_v24 = vsel %vm1522_vm10, 1.0, %v7797_v42 }
 0x1fb   : > { %4156 = vmatmul.msk.f32.gmra.mxu1 %vm346_vm2, %v4453_v9  ;;  %4189 = vmatmul.msk.f32.gmra.mxu2 %vm346_vm2, %v4453_v9 }
 0x1fc   : > { %v5691_v17 = vpop.f32.mrf.mxu3 }
 0x1fd   : > { %7867 = vst [vmem:[#allocation146_spill] sm:$0xff] %v5691_v17 }
 0x1fe   : > { %v5694_v37 = vpop.f32.mrf.mxu0  ;;  %v5696_v31 = vpop.f32.mrf.mxu2 }
 0x1ff   : > { %7868 = vst [vmem:[#allocation147_spill] sm:$0xff] %v5696_v31  ;;  %2138 = vrot.lane.b32.xlu0 %v5694_v37, %s4548_s9  ;;  %2042 = vrot.lane.b32.xlu2 %v5694_v37, %s4549_s11  ;;  %v1471_v31 = vpop.permute.xlu0 %1470 }
 0x200   : > { %2232 = vrot.lane.b32.xlu1 %v5673_v25, %s4547_s8  ;;  %v5705_v13 = vpop.f32.mrf.mxu1  ;;  %vm1523_vm11 = vcmp.eq.s32.totalorder %v5326_v49, %v1471_v31  ;;  %v4455_v31 = vld [vmem:[%s4617_s10 + $0xb8] sm:$0xff] }
 0x201   : > { %7869 = vst [vmem:[#allocation148_spill] sm:$0xff] %v5705_v13  ;;  %4221 = vmatmul.msk.f32.gmra.mxu3 %vm346_vm2, %v4452_v39  ;;  %4317 = vmatmul.msk.f32.gmra.mxu0 %vm1792_vm4, %v4253_v24  ;;  %v4254_v39 = vsel %vm1523_vm11, 1.0, %v7797_v42 }
 0x203   : > { %4157 = vmatmul.msk.f32.gmra.mxu1 %vm346_vm2, %v4454_v35  ;;  %4190 = vmatmul.msk.f32.gmra.mxu2 %vm346_vm2, %v4454_v35 }
 0x204   : > { %v5712_v33 = vpop.f32.mrf.mxu3 }
 0x205   : > { %7870 = vst [vmem:[#allocation149_spill] sm:$0xff] %v5712_v33 }
 0x206   : > { %v5715_v17 = vpop.f32.mrf.mxu0  ;;  %v5717_v23 = vpop.f32.mrf.mxu2 }
 0x207   : > { %7871 = vst [vmem:[#allocation150_spill] sm:$0xff] %v5717_v23  ;;  %2140 = vrot.lane.b32.xlu0 %v5715_v17, %s4548_s9  ;;  %2044 = vrot.lane.b32.xlu2 %v5715_v17, %s4549_s11  ;;  %v1474_v23 = vpop.permute.xlu1 %1473  ;;  %v1480_v15 = vpop.permute.xlu0 %1479 }
 0x208   : > { %2234 = vrot.lane.b32.xlu1 %v5694_v37, %s4547_s8  ;;  %v5726_v24 = vpop.f32.mrf.mxu1  ;;  %vm1524_vm12 = vcmp.eq.s32.totalorder %v5326_v49, %v1474_v23  ;;  %v4456_v23 = vld [vmem:[%s4617_s10 + $0xc0] sm:$0xff]  ;;  %vm1526_vm14 = vcmp.eq.s32.totalorder %v5326_v49, %v1480_v15 }
 0x209   : > { %7872 = vst [vmem:[#allocation151_spill] sm:$0xff] %v5726_v24  ;;  %4222 = vmatmul.msk.f32.gmra.mxu3 %vm346_vm2, %v4453_v9  ;;  %4318 = vmatmul.msk.f32.gmra.mxu0 %vm1792_vm4, %v4254_v39  ;;  %v4255_v9 = vsel %vm1524_vm12, 1.0, %v7797_v42  ;;  %v2705_v15 = vld [vmem:[%s7711_s4 + $0xe0] sm:$0xff] }
 0x20b   : > { %4158 = vmatmul.msk.f32.gmra.mxu1 %vm346_vm2, %v4455_v31  ;;  %4191 = vmatmul.msk.f32.gmra.mxu2 %vm346_vm2, %v4455_v31 }
 0x20c   : > { %v5733_v13 = vpop.f32.mrf.mxu3 }
 0x20d   : > { %7873 = vst [vmem:[#allocation152_spill] sm:$0xff] %v5733_v13 }
 0x20e   : > { %v5736_v33 = vpop.f32.mrf.mxu0  ;;  %v5738_v11 = vpop.f32.mrf.mxu2 }
 0x20f   : > { %7874 = vst [vmem:[#allocation153_spill] sm:$0xff] %v5738_v11  ;;  %2142 = vrot.lane.b32.xlu0 %v5736_v33, %s4548_s9  ;;  %2046 = vrot.lane.b32.xlu2 %v5736_v33, %s4549_s11  ;;  %v1477_v11 = vpop.permute.xlu2 %1476 }
 0x210   : > { %2236 = vrot.lane.b32.xlu1 %v5715_v17, %s4547_s8  ;;  %v5747_v39 = vpop.f32.mrf.mxu1  ;;  %vm1525_vm13 = vcmp.eq.s32.totalorder %v5326_v49, %v1477_v11  ;;  %v2692_v11 = vld [vmem:[%s7711_s4 + $0x78] sm:$0xff] }
 0x211   : > { %7875 = vst [vmem:[#allocation154_spill] sm:$0xff] %v5747_v39  ;;  %4223 = vmatmul.msk.f32.gmra.mxu3 %vm346_vm2, %v4454_v35  ;;  %4319 = vmatmul.msk.f32.gmra.mxu0 %vm1792_vm4, %v4255_v9  ;;  %v4256_v35 = vsel %vm1525_vm13, 1.0, %v7797_v42  ;;  %v2691_v39 = vld [vmem:[%s7711_s4 + $0x70] sm:$0xff] }
 0x212   : > { %2805 = vmatpush.msra.mxu1 %v2692_v11 }
 0x213   : > { %4159 = vmatmul.msk.f32.gmra.mxu1 %vm346_vm2, %v4456_v23  ;;  %4192 = vmatmul.msk.f32.gmra.mxu2 %vm346_vm2, %v4456_v23 }
 0x214   : > { %v5754_v24 = vpop.f32.mrf.mxu3  ;;  %2806 = vmatpush.msra.mxu1 %v2691_v39  ;;  %v2689_v39 = vld [vmem:[%s7711_s4 + $0x60] sm:$0xff] }
 0x215   : > { %7876 = vst [vmem:[#allocation155_spill] sm:$0xff] %v5754_v24  ;;  %v4457_v24 = vld [vmem:[%s4617_s10 + $0xc8] sm:$0xff] }
 0x216   : > { %v5757_v13 = vpop.f32.mrf.mxu0  ;;  %v5759_v7 = vpop.f32.mrf.mxu2 }
 0x217   : > { %7877 = vst [vmem:[#allocation156_spill] sm:$0xff] %v5759_v7  ;;  %2144 = vrot.lane.b32.xlu0 %v5757_v13, %s4548_s9  ;;  %2048 = vrot.lane.b32.xlu2 %v5757_v13, %s4549_s11  ;;  %v2708_v7 = vld [vmem:[%s7711_s4 + $0xf8] sm:$0xff] }
 0x218   : > { %2238 = vrot.lane.b32.xlu1 %v5736_v33, %s4547_s8  ;;  %v5768_v9 = vpop.f32.mrf.mxu1  ;;  %2918 = vmatpush.msra.mxu2 %v2708_v7 }
 0x219   : > { %7878 = vst [vmem:[#allocation157_spill] sm:$0xff] %v5768_v9  ;;  %4224 = vmatmul.msk.f32.gmra.mxu3 %vm346_vm2, %v4455_v31  ;;  %4320 = vmatmul.msk.f32.gmra.mxu0 %vm1792_vm4, %v4256_v35  ;;  %v2707_v9 = vld [vmem:[%s7711_s4 + $0xf0] sm:$0xff]  ;;  %v2690_v31 = vld [vmem:[%s7711_s4 + $0x68] sm:$0xff] }
 0x21a   : > { %2919 = vmatpush.msra.mxu2 %v2707_v9  ;;  %v2706_v35 = vld [vmem:[%s7711_s4 + $0xe8] sm:$0xff]  ;;  %2807 = vmatpush.msra.mxu1 %v2690_v31  ;;  %v4257_v9 = vsel %vm1526_vm14, 1.0, %v7797_v42 }
 0x21b   : > { %4160 = vmatmul.msk.f32.gmra.mxu1 %vm346_vm2, %v4457_v24  ;;  %4193 = vmatmul.msk.f32.gmra.mxu2 %vm346_vm2, %v4457_v24 }
 0x21c   : > { %v5787_v4 = vpop.f32.mrf.mxu3  ;;  %2920 = vmatpush.msra.mxu2 %v2706_v35  ;;  %2808 = vmatpush.msra.mxu1 %v2689_v39  ;;  %v2688_v35 = vld [vmem:[%s7711_s4 + $0x58] sm:$0xff] }
 0x21d   : > { %7879 = vst [vmem:[#allocation158_spill] sm:$0xff] %v5787_v4  ;;  %v2687_v4 = vld [vmem:[%s7711_s4 + $0x50] sm:$0xff]  ;;  %v2724_v39 = vld [vmem:[%s7711_s4 + $0x178] sm:$0xff] }
 0x21e   : > { %v5796_v7 = vpop.f32.mrf.mxu0  ;;  %v5798_v11 = vpop.f32.mrf.mxu2  ;;  %2921 = vmatpush.msra.mxu2 %v2705_v15  ;;  %2809 = vmatpush.msra.mxu1 %v2688_v35  ;;  %v2686_v35 = vld [vmem:[%s7711_s4 + $0x48] sm:$0xff] }
 0x21f   : > { %7880 = vst [vmem:[#allocation159_spill] sm:$0xff] %v5798_v11  ;;  %2146 = vrot.lane.b32.xlu0 %v5796_v7, %s4548_s9  ;;  %2050 = vrot.lane.b32.xlu2 %v5796_v7, %s4549_s11  ;;  %v2704_v11 = vld [vmem:[%s7711_s4 + $0xd8] sm:$0xff] }
 0x220   : > { %2240 = vrot.lane.b32.xlu1 %v5757_v13, %s4547_s8  ;;  %v5813_v31 = vpop.f32.mrf.mxu1  ;;  %2922 = vmatpush.msra.mxu2 %v2704_v11  ;;  %v2740_v11 = vld [vmem:[%s7711_s4 + $0x1f8] sm:$0xff] }
 0x221   : > { %7881 = vst [vmem:[#allocation160_spill] sm:$0xff] %v5813_v31  ;;  %4225 = vmatmul.msk.f32.gmra.mxu3 %vm346_vm2, %v4456_v23  ;;  %4321 = vmatmul.msk.f32.gmra.mxu0 %vm1792_vm4, %v4257_v9  ;;  %v4458_v31 = vld [vmem:[%s4617_s10 + $0xd0] sm:$0xff]  ;;  %v1483_v9 = vpop.permute.xlu1 %1482 }
 0x222   : > { %v2703_v23 = vld [vmem:[%s7711_s4 + $0xd0] sm:$0xff]  ;;  %2810 = vmatpush.msra.mxu1 %v2687_v4  ;;  %vm1527_vm15 = vcmp.eq.s32.totalorder %v5326_v49, %v1483_v9  ;;  %3031 = vmatpush.msrb.mxu3 %v2724_v39  ;;  %v2685_v9 = vld [vmem:[%s7711_s4 + $0x40] sm:$0xff] }
 0x223   : > { %4161 = vmatmul.msk.f32.gmra.mxu1 %vm346_vm2, %v4458_v31  ;;  %4194 = vmatmul.msk.f32.gmra.mxu2 %vm346_vm2, %v4458_v31  ;;  %v2723_v4 = vld [vmem:[%s7711_s4 + $0x170] sm:$0xff]  ;;  %v4258_v39 = vsel %vm1527_vm15, 1.0, %v7797_v42 }
 0x224   : > { %v5835_v15 = vpop.f32.mrf.mxu3  ;;  %2923 = vmatpush.msra.mxu2 %v2703_v23  ;;  %2811 = vmatpush.msra.mxu1 %v2686_v35  ;;  %v2701_v35 = vld [vmem:[%s7711_s4 + $0xc0] sm:$0xff] }
 0x225   : > { %7882 = vst [vmem:[#allocation161_spill] sm:$0xff] %v5835_v15  ;;  %v1486_v15 = vpop.permute.xlu2 %1485  ;;  %3032 = vmatpush.msrb.mxu3 %v2723_v4  ;;  %3144 = vmatpush.msrb.mxu0 %v2740_v11  ;;  %v2700_v4 = vld [vmem:[%s7711_s4 + $0xb8] sm:$0xff] }
 0x226   : > { %v5844_v40 = vpop.f32.mrf.mxu0  ;;  %v5846_v16 = vpop.f32.mrf.mxu2  ;;  %2924 = vmatpush.msra.mxu2 %v2702_v3  ;;  %v2739_v3 = vld [vmem:[%s7711_s4 + $0x1f0] sm:$0xff]  ;;  %2812 = vmatpush.msra.mxu1 %v2685_v9  ;;  %vm1528_vm0 = vcmp.eq.s32.totalorder %v5326_v49, %v1486_v15 }
 0x227   : > { %7883 = vst [vmem:[#allocation162_spill] sm:$0xff] %v5844_v40  ;;  %2148 = vrot.lane.b32.xlu0 %v5844_v40, %s4548_s9  ;;  %2052 = vrot.lane.b32.xlu2 %v5844_v40, %s4549_s11  ;;  %v2683_v15 = vld [vmem:[%s7711_s4 + $0x30] sm:$0xff]  ;;  %v4259_v9 = vsel %vm1528_vm0, 1.0, %v7797_v42 }
 0x228   : > { %7884 = vst [vmem:[#allocation163_spill] sm:$0xff] %v5846_v16  ;;  %2242 = vrot.lane.b32.xlu1 %v5796_v7, %s4547_s8  ;;  %v5861_v23 = vpop.f32.mrf.mxu1  ;;  %v2722_v16 = vld [vmem:[%s7711_s4 + $0x168] sm:$0xff]  ;;  %2925 = vmatpush.msra.mxu2 %v2701_v35 }
 0x229   : > { %7885 = vst [vmem:[#allocation164_spill] sm:$0xff] %v5861_v23  ;;  %4226 = vmatmul.msk.f32.gmra.mxu3 %vm346_vm2, %v4457_v24  ;;  %4322 = vmatmul.msk.f32.gmra.mxu0 %vm1792_vm4, %v4258_v39  ;;  %v4459_v24 = vld [vmem:[%s4617_s10 + $0xd8] sm:$0xff]  ;;  %v2721_v23 = vld [vmem:[%s7711_s4 + $0x160] sm:$0xff] }
 0x22a   : > { %v2684_v39 = vld [vmem:[%s7711_s4 + $0x38] sm:$0xff]  ;;  %3033 = vmatpush.msrb.mxu3 %v2722_v16  ;;  %3145 = vmatpush.msrb.mxu0 %v2739_v3  ;;  %v2738_v16 = vld [vmem:[%s7711_s4 + $0x1e8] sm:$0xff] }
 0x22b   : > { %4162 = vmatmul.msk.f32.gmra.mxu1 %vm346_vm2, %v4459_v24  ;;  %4195 = vmatmul.msk.f32.gmra.mxu2 %vm346_vm2, %v4459_v24 }
 0x22c   : > { %v5886_v11 = vpop.f32.mrf.mxu3  ;;  %2813 = vmatpush.msra.mxu1 %v2684_v39  ;;  %2926 = vmatpush.msra.mxu2 %v2700_v4  ;;  %v2699_v39 = vld [vmem:[%s7711_s4 + $0xb0] sm:$0xff]  ;;  %v2720_v4 = vld [vmem:[%s7711_s4 + $0x158] sm:$0xff] }
 0x22d   : > { %7886 = vst [vmem:[#allocation165_spill] sm:$0xff] %v5886_v11  ;;  %3034 = vmatpush.msrb.mxu3 %v2721_v23  ;;  %v5911_v3 = vpop.permute.xlu2 %1494  ;;  %3146 = vmatpush.msrb.mxu0 %v2738_v16  ;;  %v2737_v23 = vld [vmem:[%s7711_s4 + $0x1e0] sm:$0xff]  ;;  %v2719_v16 = vld [vmem:[%s7711_s4 + $0x150] sm:$0xff]  ;;  %v2736_v11 = vld [vmem:[%s7711_s4 + $0x1d8] sm:$0xff] }
 0x22e   : > { %v5892_v32 = vpop.f32.mrf.mxu0  ;;  %v5894_v36 = vpop.f32.mrf.mxu2  ;;  %2814 = vmatpush.msra.mxu1 %v2683_v15  ;;  %2927 = vmatpush.msra.mxu2 %v2699_v39  ;;  %v2681_v39 = vld [vmem:[%s7711_s4 + $0x20] sm:$0xff]  ;;  %vm1531_vm5 = vcmp.eq.s32.totalorder %v5326_v49, %v5911_v3  ;;  %v2714_v3 = vld [vmem:[%s7711_s4 + $0x128] sm:$0xff] }
 0x22f   : > { %7887 = vst [vmem:[#allocation166_spill] sm:$0xff] %v5892_v32  ;;  %2150 = vrot.lane.b32.xlu0 %v5892_v32, %s4548_s9  ;;  %2054 = vrot.lane.b32.xlu2 %v5892_v32, %s4549_s11  ;;  %v1489_v15 = vpop.permute.xlu0 %1488 }
 0x230   : > { %7888 = vst [vmem:[#allocation167_spill] sm:$0xff] %v5894_v36  ;;  %2244 = vrot.lane.b32.xlu1 %v5844_v40, %s4547_s8  ;;  %v5909_v35 = vpop.f32.mrf.mxu1  ;;  %3035 = vmatpush.msrb.mxu3 %v2720_v4  ;;  %vm1529_vm1 = vcmp.eq.s32.totalorder %v5326_v49, %v1489_v15  ;;  %v2697_v4 = vld [vmem:[%s7711_s4 + $0xa0] sm:$0xff]  ;;  %v2735_v15 = vld [vmem:[%s7711_s4 + $0x1d0] sm:$0xff] }
 0x231   : > { %7889 = vst [vmem:[#allocation168_spill] sm:$0xff] %v5909_v35  ;;  %4227 = vmatmul.msk.f32.gmra.mxu3 %vm346_vm2, %v4458_v31  ;;  %4323 = vmatmul.msk.f32.gmra.mxu0 %vm1792_vm4, %v4259_v9  ;;  %v2682_v31 = vld [vmem:[%s7711_s4 + $0x28] sm:$0xff]  ;;  %v4460_v35 = vld [vmem:[%s4617_s10 + $0xe0] sm:$0xff] }
 0x232   : > { %v2698_v9 = vld [vmem:[%s7711_s4 + $0xa8] sm:$0xff]  ;;  %3147 = vmatpush.msrb.mxu0 %v2737_v23  ;;  %2815 = vmatpush.msra.mxu1 %v2682_v31  ;;  %v4260_v23 = vsel %vm1529_vm1, 1.0, %v7797_v42 }
 0x233   : > { %4163 = vmatmul.msk.f32.gmra.mxu1 %vm346_vm2, %v4460_v35  ;;  %4196 = vmatmul.msk.f32.gmra.mxu2 %vm346_vm2, %v4460_v35 }
 0x234   : > { %v5936_v36 = vpop.f32.mrf.mxu3  ;;  %2928 = vmatpush.msra.mxu2 %v2698_v9  ;;  %3036 = vmatpush.msrb.mxu3 %v2719_v16  ;;  %v2718_v16 = vld [vmem:[%s7711_s4 + $0x148] sm:$0xff] }
 0x235   : > { %7890 = vst [vmem:[#allocation169_spill] sm:$0xff] %v5936_v36  ;;  %3148 = vmatpush.msrb.mxu0 %v2736_v11  ;;  %2816 = vmatpush.msra.mxu1 %v2681_v39  ;;  %v2680_v11 = vld [vmem:[%s7711_s4 + $0x18] sm:$0xff]  ;;  %v2734_v39 = vld [vmem:[%s7711_s4 + $0x1c8] sm:$0xff]  ;;  %v2679_v36 = vld [vmem:[%s7711_s4 + $0x10] sm:$0xff] }
 0x236   : > { %v5942_v26 = vpop.f32.mrf.mxu0  ;;  %v5944_v12 = vpop.f32.mrf.mxu2  ;;  %2929 = vmatpush.msra.mxu2 %v2697_v4  ;;  %3037 = vmatpush.msrb.mxu3 %v2718_v16  ;;  %v2716_v16 = vld [vmem:[%s7711_s4 + $0x138] sm:$0xff] }
 0x237   : > { %7891 = vst [vmem:[#allocation170_spill] sm:$0xff] %v5942_v26  ;;  %2152 = vrot.lane.b32.xlu0 %v5942_v26, %s4548_s9  ;;  %2056 = vrot.lane.b32.xlu2 %v5942_v26, %s4549_s11 }
 0x238   : > { %7892 = vst [vmem:[#allocation171_spill] sm:$0xff] %v5944_v12  ;;  %2246 = vrot.lane.b32.xlu1 %v5892_v32, %s4547_s8  ;;  %v5959_v31 = vpop.f32.mrf.mxu1  ;;  %v1492_v12 = vpop.permute.xlu1 %1491  ;;  %3149 = vmatpush.msrb.mxu0 %v2735_v15 }
 0x239   : > { %7893 = vst [vmem:[#allocation172_spill] sm:$0xff] %v5959_v31  ;;  %4228 = vmatmul.msk.f32.gmra.mxu3 %vm346_vm2, %v4459_v24  ;;  %v5962_v9 = vpop.permute.xlu2 %2130  ;;  %4324 = vmatmul.msk.f32.gmra.mxu0 %vm1792_vm4, %v4260_v23  ;;  %v2696_v24 = vld [vmem:[%s7711_s4 + $0x98] sm:$0xff]  ;;  %v4461_v23 = vld [vmem:[%s4617_s10 + $0xe8] sm:$0xff]  ;;  %v2717_v31 = vld [vmem:[%s7711_s4 + $0x140] sm:$0xff]  ;;  %vm1530_vm3 = vcmp.eq.s32.totalorder %v5326_v49, %v1492_v12 }
 0x23a   : > { %2817 = vmatpush.msra.mxu1 %v2680_v11  ;;  %2930 = vmatpush.msra.mxu2 %v2696_v24  ;;  %v2695_v12 = vld [vmem:[%s7711_s4 + $0x90] sm:$0xff]  ;;  %v4261_v15 = vsel %vm1530_vm3, 1.0, %v7797_v42  ;;  %v2733_v24 = vld [vmem:[%s7711_s4 + $0x1c0] sm:$0xff] }
 0x23b   : > { %4164 = vmatmul.msk.f32.gmra.mxu1 %vm346_vm2, %v4461_v23  ;;  %4197 = vmatmul.msk.f32.gmra.mxu2 %vm346_vm2, %v4461_v23 }
 0x23c   : > { %v5986_v4 = vpop.f32.mrf.mxu3  ;;  %3038 = vmatpush.msrb.mxu3 %v2717_v31  ;;  %3150 = vmatpush.msrb.mxu0 %v2734_v39  ;;  %v2678_v39 = vld [vmem:[%s7711_s4 + $0x8] sm:$0xff] }
 0x23d   : > { %7894 = vst [vmem:[#allocation173_spill] sm:$0xff] %v5986_v4  ;;  %2818 = vmatpush.msra.mxu1 %v2679_v36  ;;  %2931 = vmatpush.msra.mxu2 %v2695_v12  ;;  %v2694_v36 = vld [vmem:[%s7711_s4 + $0x88] sm:$0xff]  ;;  %v2677_v12 = vld [vmem:[%s7711_s4] sm:$0xff] }
 0x23e   : > { %v5992_v55 = vpop.f32.mrf.mxu0  ;;  %v5994_v32 = vpop.f32.mrf.mxu2  ;;  %3039 = vmatpush.msrb.mxu3 %v2716_v16  ;;  %3151 = vmatpush.msrb.mxu0 %v2733_v24  ;;  %v2731_v24 = vld [vmem:[%s7711_s4 + $0x1b0] sm:$0xff] }
 0x23f   : > { %7895 = vst [vmem:[#allocation174_spill] sm:$0xff] %v5992_v55  ;;  %2154 = vrot.lane.b32.xlu0 %v5992_v55, %s4548_s9  ;;  %2058 = vrot.lane.b32.xlu2 %v5992_v55, %s4549_s11 }
 0x240   : > { %7896 = vst [vmem:[#allocation175_spill] sm:$0xff] %v5994_v32  ;;  %2248 = vrot.lane.b32.xlu1 %v5942_v26, %s4547_s8  ;;  %v6009_v31 = vpop.f32.mrf.mxu1  ;;  %2819 = vmatpush.msra.mxu1 %v2678_v39  ;;  %v2693_v32 = vld [vmem:[%s7711_s4 + $0x80] sm:$0xff]  ;;  %v4262_v39 = vsel %vm1531_vm5, 1.0, %v7797_v42 }
 0x241   : > { %7897 = vst [vmem:[#allocation176_spill] sm:$0xff] %v6009_v31  ;;  %4229 = vmatmul.msk.f32.gmra.mxu3 %vm346_vm2, %v4460_v35  ;;  %v6012_v11 = vpop.permute.xlu2 %2036  ;;  %4325 = vmatmul.msk.f32.gmra.mxu0 %vm1792_vm4, %v4261_v15  ;;  %v2715_v35 = vld [vmem:[%s7711_s4 + $0x130] sm:$0xff]  ;;  %v2732_v15 = vld [vmem:[%s7711_s4 + $0x1b8] sm:$0xff] }
 0x242   : > { %v4462_v31 = vld [vmem:[%s4617_s10 + $0xf0] sm:$0xff]  ;;  %2932 = vmatpush.msra.mxu2 %v2694_v36  ;;  %3040 = vmatpush.msrb.mxu3 %v2715_v35  ;;  %v1498_v35 = vpop.permute.xlu0 %1497 }
 0x243   : > { %4165 = vmatmul.msk.f32.gmra.mxu1 %vm346_vm2, %v4462_v31  ;;  %4198 = vmatmul.msk.f32.gmra.mxu2 %vm346_vm2, %v4462_v31  ;;  %vm1532_vm6 = vcmp.eq.s32.totalorder %v5326_v49, %v1498_v35  ;;  %v2710_v35 = vld [vmem:[%s7711_s4 + $0x108] sm:$0xff] }
 0x244   : > { %v6036_v16 = vpop.f32.mrf.mxu3  ;;  %3152 = vmatpush.msrb.mxu0 %v2732_v15  ;;  %2820 = vmatpush.msra.mxu1 %v2677_v12  ;;  %v2713_v12 = vld [vmem:[%s7711_s4 + $0x120] sm:$0xff] }
 0x245   : > { %7898 = vst [vmem:[#allocation177_spill] sm:$0xff] %v6036_v16  ;;  %2933 = vmatpush.msra.mxu2 %v2693_v32  ;;  %3041 = vmatpush.msrb.mxu3 %v2714_v3  ;;  %v4463_v16 = vld [vmem:[%s4617_s10 + $0xf8] sm:$0xff]  ;;  %v2711_v3 = vld [vmem:[%s7711_s4 + $0x110] sm:$0xff] }
 0x246   : > { %v6043_v4 = vpop.f32.mrf.mxu0  ;;  %v6045_v26 = vpop.f32.mrf.mxu2  ;;  %3153 = vmatpush.msrb.mxu0 %v2731_v24  ;;  %v2712_v32 = vld [vmem:[%s7711_s4 + $0x118] sm:$0xff] }
 0x247   : > { %7899 = vst [vmem:[#allocation178_spill] sm:$0xff] %v6043_v4  ;;  %2156 = vrot.lane.b32.xlu0 %v6043_v4, %s4548_s9  ;;  %2060 = vrot.lane.b32.xlu2 %v6043_v4, %s4549_s11 }
 0x248   : > { %7900 = vst [vmem:[#allocation179_spill] sm:$0xff] %v6045_v26  ;;  %2250 = vrot.lane.b32.xlu1 %v5992_v55, %s4547_s8  ;;  %v6060_v36 = vpop.f32.mrf.mxu1  ;;  %v2730_v26 = vld [vmem:[%s7711_s4 + $0x1a8] sm:$0xff]  ;;  %3042 = vmatpush.msrb.mxu3 %v2713_v12  ;;  %v4263_v12 = vsel %vm1532_vm6, 1.0, %v7797_v42  ;;  %v2709_v55 = vld [vmem:[%s7711_s4 + $0x100] sm:$0xff] }
 0x249   : > { %7901 = vst [vmem:[#allocation180_spill] sm:$0xff] %v6060_v36  ;;  %4230 = vmatmul.msk.f32.gmra.mxu3 %vm346_vm2, %v4461_v23  ;;  %v6063_v15 = vpop.permute.xlu2 %2038  ;;  %4326 = vmatmul.msk.f32.gmra.mxu0 %vm1792_vm4, %v4262_v39  ;;  %v2729_v23 = vld [vmem:[%s7711_s4 + $0x1a0] sm:$0xff] }
 0x24a   : > { %3154 = vmatpush.msrb.mxu0 %v2730_v26  ;;  %3043 = vmatpush.msrb.mxu3 %v2712_v32  ;;  %v2728_v26 = vld [vmem:[%s7711_s4 + $0x198] sm:$0xff] }
 0x24b   : > { %4166 = vmatmul.msk.f32.gmra.mxu1 %vm346_vm2, %v4463_v16  ;;  %4199 = vmatmul.msk.f32.gmra.mxu2 %vm346_vm2, %v4463_v16 }
 0x24c   : > { %v6081_v39 = vpop.f32.mrf.mxu3  ;;  %3155 = vmatpush.msrb.mxu0 %v2729_v23  ;;  %3044 = vmatpush.msrb.mxu3 %v2711_v3  ;;  %v2726_v3 = vld [vmem:[%s7711_s4 + $0x188] sm:$0xff] }
 0x24d   : > { %7902 = vst [vmem:[#allocation181_spill] sm:$0xff] %v6081_v39  ;;  %v2727_v39 = vld [vmem:[%s7711_s4 + $0x190] sm:$0xff] }
 0x24e   : > { %v6087_v24 = vpop.f32.mrf.mxu0  ;;  %v6089_v36 = vpop.f32.mrf.mxu2  ;;  %3156 = vmatpush.msrb.mxu0 %v2728_v26  ;;  %3045 = vmatpush.msrb.mxu3 %v2710_v35 }
 0x24f   : > { %7903 = vst [vmem:[#allocation182_spill] sm:$0xff] %v6089_v36  ;;  %2158 = vrot.lane.b32.xlu0 %v6087_v24, %s4548_s9  ;;  %2062 = vrot.lane.b32.xlu2 %v6087_v24, %s4549_s11 }
 0x250   : > { %2252 = vrot.lane.b32.xlu1 %v6043_v4, %s4547_s8  ;;  %v6104_v32 = vpop.f32.mrf.mxu1  ;;  %3157 = vmatpush.msrb.mxu0 %v2727_v39 }
 0x251   : > { %7904 = vst [vmem:[#allocation183_spill] sm:$0xff] %v6104_v32  ;;  %4231 = vmatmul.msk.f32.gmra.mxu3 %vm346_vm2, %v4462_v31  ;;  %v2227_v23 = vpop.permute.xlu0 %2226  ;;  %v6107_v36 = vpop.permute.xlu2 %2040  ;;  %4327 = vmatmul.msk.f32.gmra.mxu0 %vm1792_vm4, %v4263_v12 }
 0x252   : > { %v2035_v32 = vpop.permute.xlu1 %2034  ;;  %3046 = vmatpush.msrb.mxu3 %v2709_v55  ;;  %3158 = vmatpush.msrb.mxu0 %v2726_v3  ;;  %v2725_v55 = vld [vmem:[%s7711_s4 + $0x180] sm:$0xff] }
 0x253   : > { %v2323_v31 = vsel %vm2322_vm8, %v5611_v8, %v2035_v32 }
 0x254   : > { %v2356_v12 = vsel %vm2355_vm7, %v2323_v31, %v5962_v9  ;;  %v6123_v4 = vpop.f32.mrf.mxu3  ;;  %3159 = vmatpush.msrb.mxu0 %v2725_v55 }
 0x255   : > { %v6126_v61 = vsel %vm2388_vm9, %v2356_v12, %v2227_v23 }
 0x256   : > { %v6128_v40 = vpop.f32.mrf.mxu0  ;;  %v2421_v26 = vmul.f32 %v6126_v61, %v4886_v48  ;;  %v2422_v8 = vmul.f32 %v6126_v61, %v5016_v56  ;;  %v6134_v35 = vpop.f32.mrf.mxu2 }
 0x257   : > { %2160 = vrot.lane.b32.xlu0 %v6128_v40, %s4548_s9  ;;  %2064 = vrot.lane.b32.xlu2 %v6128_v40, %s4549_s11 }
 0x258   : > { %2821 = vmatmul.f32.vlgmr.msra.gmra.mxu1 %v2421_v26  ;;  %2934 = vmatmul.f32.vlgmr.msra.gmra.mxu2 %v2422_v8  ;;  %v6143_v9 = vpop.f32.mrf.mxu1 }
 0x259   : > { %2254 = vrot.lane.b32.xlu1 %v6087_v24, %s4547_s8  ;;  %4232 = vmatmul.msk.f32.gmra.mxu3 %vm346_vm2, %v4463_v16  ;;  %v2133_v48 = vpop.permute.xlu0 %2132  ;;  %v6148_v56 = vpop.permute.xlu2 %2042  ;;  %v2423_v16 = vmul.f32 %v6126_v61, %v5032_v43  ;;  %v2424_v43 = vmul.f32 %v6126_v61, %v5064_v63 }
 0x25a   : > { %v1501_v39 = vpop.permute.xlu1 %1500 }
 0x25b   : > { %vm1533_vm10 = vcmp.eq.s32.totalorder %v5326_v49, %v1501_v39 }
 0x25c   : > { %v4264_v32 = vsel %vm1533_vm10, 1.0, %v7797_v42  ;;  %v6152_v23 = vpop.f32.mrf.mxu3  ;;  %v2324_v42 = vsel %vm2322_vm8, %v5633_v5, %v6012_v11 }
 0x25d   : > { %4328 = vmatmul.msk.f32.gmra.mxu0 %vm1792_vm4, %v4264_v32  ;;  %v2357_v55 = vsel %vm2355_vm7, %v2324_v42, %v2133_v48 }
 0x25e   : > { %v6155_v31 = vpop.f32.mrf.mxu0  ;;  %v6157_v3 = vpop.f32.mrf.mxu2 }
 0x25f   : > { %2162 = vrot.lane.b32.xlu0 %v6155_v31, %s4548_s9  ;;  %2066 = vrot.lane.b32.xlu2 %v6155_v31, %s4549_s11 }
 0x260   : > { %v6165_v12 = vpop.f32.mrf.mxu1 }
 0x261   : > { %2256 = vrot.lane.b32.xlu1 %v6128_v40, %s4547_s8  ;;  %3047 = vmatmul.f32.vlgmr.msrb.gmra.mxu3 %v2423_v16  ;;  %v2135_v26 = vpop.permute.xlu0 %2134  ;;  %v6172_v8 = vpop.permute.xlu2 %2044 }
 0x262   : > { %v2229_v39 = vpop.permute.xlu1 %2228 }
 0x263   : > { %v6176_v32 = vsel %vm2388_vm9, %v2357_v55, %v2229_v39 }
 0x264   : > { %v6180_v49 = vpop.f32.mrf.mxu3  ;;  %v2429_v5 = vmul.f32 %v6176_v32, %v4902_v53  ;;  %v2430_v11 = vmul.f32 %v6176_v32, %v5034_v21  ;;  %v2431_v63 = vmul.f32 %v6176_v32, %v5050_v57  ;;  %v2325_v21 = vsel %vm2322_vm8, %v5652_v41, %v6063_v15 }
 0x265   : > { %3160 = vmatmul.f32.vlgmr.msrb.gmra.mxu0 %v2424_v43  ;;  %v2358_v39 = vsel %vm2355_vm7, %v2325_v21, %v2135_v26  ;;  %v2432_v57 = vmul.f32 %v6176_v32, %v5081_v22 }
 0x266   : > { %2824 = vmatmul.f32.gmra.mxu1 %v2429_v5  ;;  %2937 = vmatmul.f32.gmra.mxu2 %v2430_v11  ;;  %v6186_v16 = vpop.f32.mrf.mxu0  ;;  %v6188_v48 = vpop.f32.mrf.mxu2 }
 0x267   : > { %2164 = vrot.lane.b32.xlu0 %v6186_v16, %s4548_s9  ;;  %2068 = vrot.lane.b32.xlu2 %v6186_v16, %s4549_s11 }
 0x268   : > { %v6196_v53 = vpop.f32.mrf.mxu1 }
 0x269   : > { %7905 = vst [vmem:[#allocation184_spill] sm:$0xff] %v6196_v53  ;;  %2258 = vrot.lane.b32.xlu1 %v6155_v31, %s4547_s8  ;;  %3050 = vmatmul.f32.gmra.mxu3 %v2431_v63  ;;  %v2137_v42 = vpop.permute.xlu0 %2136  ;;  %v6203_v55 = vpop.permute.xlu2 %2046 }
 0x26a   : > { %v2231_v43 = vpop.permute.xlu1 %2230 }
 0x26b   : > { %v6207_v5 = vsel %vm2388_vm9, %v2358_v39, %v2231_v43 }
 0x26c   : > { %v6211_v11 = vpop.f32.mrf.mxu3  ;;  %v2437_v41 = vmul.f32 %v6207_v5, %v4920_v59  ;;  %v2438_v15 = vmul.f32 %v6207_v5, %v5052_v51  ;;  %v2439_v22 = vmul.f32 %v6207_v5, %v5068_v58  ;;  %v2326_v51 = vsel %vm2322_vm8, %v5673_v25, %v6107_v36 }
 0x26d   : > { %3163 = vmatmul.f32.gmra.mxu0 %v2432_v57  ;;  %v2359_v43 = vsel %vm2355_vm7, %v2326_v51, %v2137_v42  ;;  %v2440_v58 = vmul.f32 %v6207_v5, %v5098_v6 }
 0x26e   : > { %2827 = vmatmul.f32.gmra.mxu1 %v2437_v41  ;;  %2940 = vmatmul.f32.gmra.mxu2 %v2438_v15  ;;  %v6217_v63 = vpop.f32.mrf.mxu0  ;;  %v6219_v26 = vpop.f32.mrf.mxu2 }
 0x26f   : > { %7906 = vst [vmem:[#allocation185_spill] sm:$0xff] %v6219_v26  ;;  %2166 = vrot.lane.b32.xlu0 %v6217_v63, %s4548_s9  ;;  %2070 = vrot.lane.b32.xlu2 %v6217_v63, %s4549_s11 }
 0x270   : > { %v6227_v59 = vpop.f32.mrf.mxu1 }
 0x271   : > { %7907 = vst [vmem:[#allocation186_spill] sm:$0xff] %v6227_v59  ;;  %2260 = vrot.lane.b32.xlu1 %v6186_v16, %s4547_s8  ;;  %3053 = vmatmul.f32.gmra.mxu3 %v2439_v22  ;;  %v2139_v21 = vpop.permute.xlu0 %2138  ;;  %v6234_v39 = vpop.permute.xlu2 %2048 }
 0x272   : > { %v2233_v57 = vpop.permute.xlu1 %2232 }
 0x273   : > { %v6238_v41 = vsel %vm2388_vm9, %v2359_v43, %v2233_v57 }
 0x274   : > { %v6242_v15 = vpop.f32.mrf.mxu3  ;;  %v2445_v25 = vmul.f32 %v6238_v41, %v4938_v1  ;;  %v2446_v36 = vmul.f32 %v6238_v41, %v5070_v0  ;;  %v2447_v6 = vmul.f32 %v6238_v41, %v5085_v50  ;;  %v2327_v0 = vsel %vm2322_vm8, %v5694_v37, %v6148_v56 }
 0x275   : > { %7908 = vst [vmem:[#allocation187_spill] sm:$0xff] %v6242_v15  ;;  %3166 = vmatmul.f32.gmra.mxu0 %v2440_v58  ;;  %v2360_v57 = vsel %vm2355_vm7, %v2327_v0, %v2139_v21  ;;  %v2448_v50 = vmul.f32 %v6238_v41, %v5115_v10  ;;  %v7992_v15 = vld [vmem:[#allocation77_spill] sm:$0xff] }
 0x276   : > { %2830 = vmatmul.f32.gmra.mxu1 %v2445_v25  ;;  %2943 = vmatmul.f32.gmra.mxu2 %v2446_v36  ;;  %v6248_v22 = vpop.f32.mrf.mxu0  ;;  %v6250_v42 = vpop.f32.mrf.mxu2 }
 0x277   : > { %7909 = vst [vmem:[#allocation188_spill] sm:$0xff] %v6250_v42  ;;  %2168 = vrot.lane.b32.xlu0 %v6248_v22, %s4548_s9  ;;  %2072 = vrot.lane.b32.xlu2 %v6248_v22, %s4549_s11 }
 0x278   : > { %v6258_v1 = vpop.f32.mrf.mxu1 }
 0x279   : > { %7910 = vst [vmem:[#allocation189_spill] sm:$0xff] %v6258_v1  ;;  %2262 = vrot.lane.b32.xlu1 %v6217_v63, %s4547_s8  ;;  %3056 = vmatmul.f32.gmra.mxu3 %v2447_v6  ;;  %v2141_v51 = vpop.permute.xlu0 %2140  ;;  %v6265_v43 = vpop.permute.xlu2 %2050 }
 0x27a   : > { %v2235_v58 = vpop.permute.xlu1 %2234 }
 0x27b   : > { %v6269_v25 = vsel %vm2388_vm9, %v2360_v57, %v2235_v58 }
 0x27c   : > { %v6273_v36 = vpop.f32.mrf.mxu3  ;;  %v2453_v37 = vmul.f32 %v6269_v25, %v4956_v27  ;;  %v2454_v56 = vmul.f32 %v6269_v25, %v5087_v46  ;;  %v2455_v10 = vmul.f32 %v6269_v25, %v5102_v28  ;;  %v2328_v46 = vsel %vm2322_vm8, %v5715_v17, %v6172_v8 }
 0x27d   : > { %7911 = vst [vmem:[#allocation190_spill] sm:$0xff] %v6273_v36  ;;  %3169 = vmatmul.f32.gmra.mxu0 %v2448_v50  ;;  %v2361_v58 = vsel %vm2355_vm7, %v2328_v46, %v2141_v51  ;;  %v2456_v28 = vmul.f32 %v6269_v25, %v5132_v14  ;;  %v7983_v36 = vld [vmem:[#allocation11_spill] sm:$0xff] }
 0x27e   : > { %2833 = vmatmul.f32.gmra.mxu1 %v2453_v37  ;;  %2946 = vmatmul.f32.gmra.mxu2 %v2454_v56  ;;  %v6279_v6 = vpop.f32.mrf.mxu0  ;;  %v6281_v21 = vpop.f32.mrf.mxu2 }
 0x27f   : > { %7912 = vst [vmem:[#allocation191_spill] sm:$0xff] %v6281_v21  ;;  %2170 = vrot.lane.b32.xlu0 %v6279_v6, %s4548_s9  ;;  %2074 = vrot.lane.b32.xlu2 %v6279_v6, %s4549_s11  ;;  %v7968_v21 = vld [vmem:[#allocation56_spill] sm:$0xff] }
 0x280   : > { %v6289_v27 = vpop.f32.mrf.mxu1 }
 0x281   : > { %7913 = vst [vmem:[#allocation192_spill] sm:$0xff] %v6289_v27  ;;  %2264 = vrot.lane.b32.xlu1 %v6248_v22, %s4547_s8  ;;  %3059 = vmatmul.f32.gmra.mxu3 %v2455_v10  ;;  %v2143_v0 = vpop.permute.xlu0 %2142  ;;  %v6296_v57 = vpop.permute.xlu2 %2052 }
 0x282   : > { %v2237_v50 = vpop.permute.xlu1 %2236 }
 0x283   : > { %v6300_v37 = vsel %vm2388_vm9, %v2361_v58, %v2237_v50 }
 0x284   : > { %v6304_v56 = vpop.f32.mrf.mxu3  ;;  %v2461_v17 = vmul.f32 %v6300_v37, %v4974_v45  ;;  %v2462_v8 = vmul.f32 %v6300_v37, %v5104_v2  ;;  %v2463_v14 = vmul.f32 %v6300_v37, %v5119_v60  ;;  %v2329_v2 = vsel %vm2322_vm8, %v5736_v33, %v6203_v55 }
 0x285   : > { %7914 = vst [vmem:[#allocation193_spill] sm:$0xff] %v6304_v56  ;;  %3172 = vmatmul.f32.gmra.mxu0 %v2456_v28  ;;  %v2362_v50 = vsel %vm2355_vm7, %v2329_v2, %v2143_v0  ;;  %v2464_v60 = vmul.f32 %v6300_v37, %v5149_v18 }
 0x286   : > { %2836 = vmatmul.f32.gmra.mxu1 %v2461_v17  ;;  %2949 = vmatmul.f32.gmra.mxu2 %v2462_v8  ;;  %v6310_v10 = vpop.f32.mrf.mxu0  ;;  %v6312_v51 = vpop.f32.mrf.mxu2 }
 0x287   : > { %7915 = vst [vmem:[#allocation194_spill] sm:$0xff] %v6312_v51  ;;  %2172 = vrot.lane.b32.xlu0 %v6310_v10, %s4548_s9  ;;  %2076 = vrot.lane.b32.xlu2 %v6310_v10, %s4549_s11 }
 0x288   : > { %v6320_v45 = vpop.f32.mrf.mxu1 }
 0x289   : > { %7916 = vst [vmem:[#allocation195_spill] sm:$0xff] %v6320_v45  ;;  %2266 = vrot.lane.b32.xlu1 %v6279_v6, %s4547_s8  ;;  %3062 = vmatmul.f32.gmra.mxu3 %v2463_v14  ;;  %v2145_v46 = vpop.permute.xlu0 %2144  ;;  %v6327_v58 = vpop.permute.xlu2 %2054 }
 0x28a   : > { %v2239_v28 = vpop.permute.xlu1 %2238 }
 0x28b   : > { %v6331_v17 = vsel %vm2388_vm9, %v2362_v50, %v2239_v28 }
 0x28c   : > { %v6335_v8 = vpop.f32.mrf.mxu3  ;;  %v2469_v33 = vmul.f32 %v6331_v17, %v4993_v62  ;;  %v2470_v55 = vmul.f32 %v6331_v17, %v5121_v54  ;;  %v2471_v18 = vmul.f32 %v6331_v17, %v5136_v20  ;;  %v2330_v54 = vsel %vm2322_vm8, %v5757_v13, %v6234_v39 }
 0x28d   : > { %7917 = vst [vmem:[#allocation196_spill] sm:$0xff] %v6335_v8  ;;  %3175 = vmatmul.f32.gmra.mxu0 %v2464_v60  ;;  %v2363_v28 = vsel %vm2355_vm7, %v2330_v54, %v2145_v46  ;;  %v2472_v20 = vmul.f32 %v6331_v17, %v5165_v34 }
 0x28e   : > { %2839 = vmatmul.f32.gmra.mxu1 %v2469_v33  ;;  %2952 = vmatmul.f32.gmra.mxu2 %v2470_v55  ;;  %v6341_v14 = vpop.f32.mrf.mxu0  ;;  %v6343_v0 = vpop.f32.mrf.mxu2 }
 0x28f   : > { %7918 = vst [vmem:[#allocation197_spill] sm:$0xff] %v6343_v0  ;;  %2174 = vrot.lane.b32.xlu0 %v6341_v14, %s4548_s9  ;;  %2078 = vrot.lane.b32.xlu2 %v6341_v14, %s4549_s11 }
 0x290   : > { %v6351_v62 = vpop.f32.mrf.mxu1 }
 0x291   : > { %7919 = vst [vmem:[#allocation198_spill] sm:$0xff] %v6351_v62  ;;  %2268 = vrot.lane.b32.xlu1 %v6310_v10, %s4547_s8  ;;  %3065 = vmatmul.f32.gmra.mxu3 %v2471_v18  ;;  %v2147_v2 = vpop.permute.xlu0 %2146  ;;  %v6358_v50 = vpop.permute.xlu2 %2056  ;;  %v7937_v62 = vld [vmem:[#allocation9_spill] sm:$0xff] }
 0x292   : > { %v2241_v60 = vpop.permute.xlu1 %2240 }
 0x293   : > { %v6362_v33 = vsel %vm2388_vm9, %v2363_v28, %v2241_v60 }
 0x294   : > { %v6366_v55 = vpop.f32.mrf.mxu3  ;;  %v2477_v13 = vmul.f32 %v6362_v33, %v5012_v52  ;;  %v2478_v39 = vmul.f32 %v6362_v33, %v5138_v47  ;;  %v2479_v34 = vmul.f32 %v6362_v33, %v5153_v29  ;;  %v2331_v47 = vsel %vm2322_vm8, %v5796_v7, %v6265_v43 }
 0x295   : > { %7920 = vst [vmem:[#allocation199_spill] sm:$0xff] %v6366_v55  ;;  %3178 = vmatmul.f32.gmra.mxu0 %v2472_v20  ;;  %v2364_v60 = vsel %vm2355_vm7, %v2331_v47, %v2147_v2  ;;  %v2480_v29 = vmul.f32 %v6362_v33, %v5181_v38  ;;  %v7952_v55 = vld [vmem:[#allocation15_spill] sm:$0xff] }
 0x296   : > { %2842 = vmatmul.f32.gmra.mxu1 %v2477_v13  ;;  %2955 = vmatmul.f32.gmra.mxu2 %v2478_v39  ;;  %v6372_v18 = vpop.f32.mrf.mxu0  ;;  %v6374_v46 = vpop.f32.mrf.mxu2 }
 0x297   : > { %7921 = vst [vmem:[#allocation200_spill] sm:$0xff] %v6374_v46  ;;  %2176 = vrot.lane.b32.xlu0 %v6372_v18, %s4548_s9  ;;  %2080 = vrot.lane.b32.xlu2 %v6372_v18, %s4549_s11 }
 0x298   : > { %v6382_v52 = vpop.f32.mrf.mxu1 }
 0x299   : > { %7922 = vst [vmem:[#allocation201_spill] sm:$0xff] %v6382_v52  ;;  %2270 = vrot.lane.b32.xlu1 %v6341_v14, %s4547_s8  ;;  %3068 = vmatmul.f32.gmra.mxu3 %v2479_v34  ;;  %v2149_v54 = vpop.permute.xlu0 %2148  ;;  %v6389_v28 = vpop.permute.xlu2 %2058  ;;  %v7929_v52 = vld [vmem:[#allocation6_spill] sm:$0xff] }
 0x29a   : > { %v2243_v20 = vpop.permute.xlu1 %2242 }
 0x29b   : > { %v6393_v13 = vsel %vm2388_vm9, %v2364_v60, %v2243_v20 }
 0x29c   : > { %v6397_v39 = vpop.f32.mrf.mxu3  ;;  %v2485_v7 = vmul.f32 %v6393_v13, %v5030_v44  ;;  %v2486_v43 = vmul.f32 %v6393_v13, %v5155_v19  ;;  %v2487_v38 = vmul.f32 %v6393_v13, %v5169_v30  ;;  %v7926_v19 = vld [vmem:[#allocation162_spill] sm:$0xff]  ;;  %v7927_v30 = vld [vmem:[#allocation41_spill] sm:$0xff] }
 0x29d   : > { %7923 = vst [vmem:[#allocation202_spill] sm:$0xff] %v6397_v39  ;;  %3181 = vmatmul.f32.gmra.mxu0 %v2480_v29  ;;  %v2332_v47 = vsel %vm2322_vm8, %v7926_v19, %v6296_v57  ;;  %v7930_v19 = vld [vmem:[#allocation37_spill] sm:$0xff] }
 0x29e   : > { %2845 = vmatmul.f32.gmra.mxu1 %v2485_v7  ;;  %2958 = vmatmul.f32.gmra.mxu2 %v2486_v43  ;;  %v6403_v34 = vpop.f32.mrf.mxu0  ;;  %v6405_v2 = vpop.f32.mrf.mxu2  ;;  %v2365_v29 = vsel %vm2355_vm7, %v2332_v47, %v2149_v54  ;;  %v7932_v47 = vld [vmem:[#allocation39_spill] sm:$0xff] }
 0x29f   : > { %7924 = vst [vmem:[#allocation203_spill] sm:$0xff] %v6405_v2  ;;  %2178 = vrot.lane.b32.xlu0 %v6403_v34, %s4548_s9  ;;  %2082 = vrot.lane.b32.xlu2 %v6403_v34, %s4549_s11 }
 0x2a0   : > { %v6413_v44 = vpop.f32.mrf.mxu1 }
 0x2a1   : > { %7925 = vst [vmem:[#allocation204_spill] sm:$0xff] %v6413_v44  ;;  %2272 = vrot.lane.b32.xlu1 %v6372_v18, %s4547_s8  ;;  %3071 = vmatmul.f32.gmra.mxu3 %v2487_v38  ;;  %v2151_v60 = vpop.permute.xlu0 %2150  ;;  %v6420_v20 = vpop.permute.xlu2 %2060  ;;  %v2488_v44 = vmul.f32 %v6393_v13, %v7927_v30 }
 0x2a2   : > { %v2245_v7 = vpop.permute.xlu1 %2244 }
 0x2a3   : > { %v6424_v43 = vsel %vm2388_vm9, %v2365_v29, %v2245_v7  ;;  %v7934_v7 = vld [vmem:[#allocation166_spill] sm:$0xff] }
 0x2a4   : > { %v6428_v2 = vpop.f32.mrf.mxu3  ;;  %v2493_v57 = vmul.f32 %v6424_v43, %v7929_v52  ;;  %v2494_v38 = vmul.f32 %v6424_v43, %v7930_v19  ;;  %v2495_v29 = vmul.f32 %v6424_v43, %v7932_v47  ;;  %v7935_v47 = vld [vmem:[#allocation45_spill] sm:$0xff] }
 0x2a5   : > { %7928 = vst [vmem:[#allocation162_spill] sm:$0xff] %v6428_v2  ;;  %3184 = vmatmul.f32.gmra.mxu0 %v2488_v44  ;;  %v2333_v44 = vsel %vm2322_vm8, %v7934_v7, %v6327_v58  ;;  %v7938_v7 = vld [vmem:[#allocation40_spill] sm:$0xff] }
 0x2a6   : > { %2848 = vmatmul.f32.gmra.mxu1 %v2493_v57  ;;  %2961 = vmatmul.f32.gmra.mxu2 %v2494_v38  ;;  %v6434_v46 = vpop.f32.mrf.mxu0  ;;  %v6436_v54 = vpop.f32.mrf.mxu2  ;;  %v2366_v19 = vsel %vm2355_vm7, %v2333_v44, %v2151_v60  ;;  %v7940_v44 = vld [vmem:[#allocation43_spill] sm:$0xff] }
 0x2a7   : > { %7931 = vst [vmem:[#allocation41_spill] sm:$0xff] %v6436_v54  ;;  %2180 = vrot.lane.b32.xlu0 %v6434_v46, %s4548_s9  ;;  %2084 = vrot.lane.b32.xlu2 %v6434_v46, %s4549_s11 }
 0x2a8   : > { %v6444_v52 = vpop.f32.mrf.mxu1 }
 0x2a9   : > { %7933 = vst [vmem:[#allocation6_spill] sm:$0xff] %v6444_v52  ;;  %2274 = vrot.lane.b32.xlu1 %v6403_v34, %s4547_s8  ;;  %3074 = vmatmul.f32.gmra.mxu3 %v2495_v29  ;;  %v2153_v30 = vpop.permute.xlu0 %2152  ;;  %v6451_v57 = vpop.permute.xlu2 %2062  ;;  %v2496_v52 = vmul.f32 %v6424_v43, %v7935_v47 }
 0x2aa   : > { %v2247_v38 = vpop.permute.xlu1 %2246 }
 0x2ab   : > { %v6455_v54 = vsel %vm2388_vm9, %v2366_v19, %v2247_v38 }
 0x2ac   : > { %v6459_v2 = vpop.f32.mrf.mxu3  ;;  %v2501_v58 = vmul.f32 %v6455_v54, %v7937_v62  ;;  %v2502_v29 = vmul.f32 %v6455_v54, %v7938_v7  ;;  %v2503_v19 = vmul.f32 %v6455_v54, %v7940_v44  ;;  %v7941_v62 = vld [vmem:[#allocation170_spill] sm:$0xff]  ;;  %v7943_v44 = vld [vmem:[#allocation49_spill] sm:$0xff] }
 0x2ad   : > { %7936 = vst [vmem:[#allocation37_spill] sm:$0xff] %v6459_v2  ;;  %3187 = vmatmul.f32.gmra.mxu0 %v2496_v52  ;;  %v2334_v38 = vsel %vm2322_vm8, %v7941_v62, %v6358_v50  ;;  %v2504_v2 = vmul.f32 %v6455_v54, %v7943_v44  ;;  %v7945_v50 = vld [vmem:[#allocation12_spill] sm:$0xff]  ;;  %v7949_v44 = vld [vmem:[#allocation174_spill] sm:$0xff] }
 0x2ae   : > { %2851 = vmatmul.f32.gmra.mxu1 %v2501_v58  ;;  %2964 = vmatmul.f32.gmra.mxu2 %v2502_v29  ;;  %v6465_v39 = vpop.f32.mrf.mxu0  ;;  %v6467_v60 = vpop.f32.mrf.mxu2  ;;  %v2367_v58 = vsel %vm2355_vm7, %v2334_v38, %v2153_v30  ;;  %v7947_v38 = vld [vmem:[#allocation47_spill] sm:$0xff] }
 0x2af   : > { %7939 = vst [vmem:[#allocation39_spill] sm:$0xff] %v6467_v60  ;;  %2182 = vrot.lane.b32.xlu0 %v6465_v39, %s4548_s9  ;;  %2086 = vrot.lane.b32.xlu2 %v6465_v39, %s4549_s11 }
 0x2b0   : > { %v6486_v60 = vpop.f32.mrf.mxu1 }
 0x2b1   : > { %2276 = vrot.lane.b32.xlu1 %v6434_v46, %s4547_s8  ;;  %3077 = vmatmul.f32.gmra.mxu3 %v2503_v19  ;;  %v2155_v52 = vpop.permute.xlu0 %2154  ;;  %v6480_v47 = vpop.permute.xlu2 %2064  ;;  %7942 = vst [vmem:[#allocation166_spill] sm:$0xff] %v6486_v60  ;;  %v7946_v19 = vld [vmem:[#allocation44_spill] sm:$0xff] }
 0x2b2   : > { %v2249_v7 = vpop.permute.xlu1 %2248 }
 0x2b3   : > { %v6484_v29 = vsel %vm2388_vm9, %v2367_v58, %v2249_v7 }
 0x2b4   : > { %v6490_v0 = vpop.f32.mrf.mxu3  ;;  %v2509_v62 = vmul.f32 %v6484_v29, %v7945_v50  ;;  %v2510_v45 = vmul.f32 %v6484_v29, %v7946_v19  ;;  %v2511_v58 = vmul.f32 %v6484_v29, %v7947_v38  ;;  %v2335_v50 = vsel %vm2322_vm8, %v7949_v44, %v6389_v28  ;;  %v7950_v38 = vld [vmem:[#allocation53_spill] sm:$0xff]  ;;  %v7953_v44 = vld [vmem:[#allocation48_spill] sm:$0xff] }
 0x2b5   : > { %7944 = vst [vmem:[#allocation45_spill] sm:$0xff] %v6490_v0  ;;  %3190 = vmatmul.f32.gmra.mxu0 %v2504_v2  ;;  %v2368_v2 = vsel %vm2355_vm7, %v2335_v50, %v2155_v52  ;;  %v7955_v50 = vld [vmem:[#allocation51_spill] sm:$0xff] }
 0x2b6   : > { %2854 = vmatmul.f32.gmra.mxu1 %v2509_v62  ;;  %2967 = vmatmul.f32.gmra.mxu2 %v2510_v45  ;;  %v6496_v30 = vpop.f32.mrf.mxu0  ;;  %v6504_v7 = vpop.f32.mrf.mxu2 }
 0x2b7   : > { %2184 = vrot.lane.b32.xlu0 %v6496_v30, %s4548_s9  ;;  %2088 = vrot.lane.b32.xlu2 %v6496_v30, %s4549_s11  ;;  %7948 = vst [vmem:[#allocation9_spill] sm:$0xff] %v6504_v7  ;;  %v2512_v7 = vmul.f32 %v6484_v29, %v7950_v38 }
 0x2b8   : > { %v6525_v51 = vpop.f32.mrf.mxu1 }
 0x2b9   : > { %2278 = vrot.lane.b32.xlu1 %v6465_v39, %s4547_s8  ;;  %3080 = vmatmul.f32.gmra.mxu3 %v2511_v58  ;;  %v2157_v45 = vpop.permute.xlu0 %2156  ;;  %v6512_v19 = vpop.permute.xlu2 %2066  ;;  %7954 = vst [vmem:[#allocation43_spill] sm:$0xff] %v6525_v51  ;;  %v7958_v51 = vld [vmem:[#allocation57_spill] sm:$0xff] }
 0x2ba   : > { %v2251_v62 = vpop.permute.xlu1 %2250 }
 0x2bb   : > { %v6515_v60 = vsel %vm2388_vm9, %v2368_v2, %v2251_v62 }
 0x2bc   : > { %v6519_v0 = vpop.f32.mrf.mxu3  ;;  %v2517_v28 = vmul.f32 %v6515_v60, %v7952_v55  ;;  %v2518_v58 = vmul.f32 %v6515_v60, %v7953_v44  ;;  %v2519_v2 = vmul.f32 %v6515_v60, %v7955_v50  ;;  %v7956_v55 = vld [vmem:[#allocation178_spill] sm:$0xff]  ;;  %v2520_v50 = vmul.f32 %v6515_v60, %v7958_v51  ;;  %v7963_v51 = vld [vmem:[#allocation55_spill] sm:$0xff] }
 0x2bd   : > { %7951 = vst [vmem:[#allocation40_spill] sm:$0xff] %v6519_v0  ;;  %3193 = vmatmul.f32.gmra.mxu0 %v2512_v7  ;;  %v2336_v62 = vsel %vm2322_vm8, %v7956_v55, %v6420_v20  ;;  %v7960_v20 = vld [vmem:[#allocation18_spill] sm:$0xff] }
 0x2be   : > { %2857 = vmatmul.f32.gmra.mxu1 %v2517_v28  ;;  %2970 = vmatmul.f32.gmra.mxu2 %v2518_v58  ;;  %v6527_v52 = vpop.f32.mrf.mxu0  ;;  %v2369_v38 = vsel %vm2355_vm7, %v2336_v62, %v2157_v45  ;;  %v6541_v44 = vpop.f32.mrf.mxu2 }
 0x2bf   : > { %2186 = vrot.lane.b32.xlu0 %v6527_v52, %s4548_s9  ;;  %2090 = vrot.lane.b32.xlu2 %v6527_v52, %s4549_s11  ;;  %7957 = vst [vmem:[#allocation170_spill] sm:$0xff] %v6541_v44 }
 0x2c0   : > { %v6558_v62 = vpop.f32.mrf.mxu1 }
 0x2c1   : > { %2280 = vrot.lane.b32.xlu1 %v6496_v30, %s4547_s8  ;;  %3083 = vmatmul.f32.gmra.mxu3 %v2519_v2  ;;  %v2159_v7 = vpop.permute.xlu0 %2158  ;;  %v6548_v0 = vpop.permute.xlu2 %2068  ;;  %v7961_v2 = vld [vmem:[#allocation52_spill] sm:$0xff]  ;;  %7962 = vst [vmem:[#allocation12_spill] sm:$0xff] %v6558_v62 }
 0x2c2   : > { %v2253_v28 = vpop.permute.xlu1 %2252 }
 0x2c3   : > { %v6544_v58 = vsel %vm2388_vm9, %v2369_v38, %v2253_v28 }
 0x2c4   : > { %v6550_v27 = vpop.f32.mrf.mxu3  ;;  %v2525_v55 = vmul.f32 %v6544_v58, %v7960_v20  ;;  %v2526_v8 = vmul.f32 %v6544_v58, %v7961_v2  ;;  %v2527_v38 = vmul.f32 %v6544_v58, %v7963_v51 }
 0x2c5   : > { %7959 = vst [vmem:[#allocation49_spill] sm:$0xff] %v6550_v27  ;;  %3196 = vmatmul.f32.gmra.mxu0 %v2520_v50 }
 0x2c6   : > { %2860 = vmatmul.f32.gmra.mxu1 %v2525_v55  ;;  %2973 = vmatmul.f32.gmra.mxu2 %v2526_v8  ;;  %v6556_v45 = vpop.f32.mrf.mxu0  ;;  %v2337_v8 = vsel %vm2322_vm8, %v6087_v24, %v6451_v57  ;;  %v7964_v55 = vld [vmem:[#allocation61_spill] sm:$0xff]  ;;  %v6577_v44 = vpop.f32.mrf.mxu2 }
 0x2c7   : > { %2188 = vrot.lane.b32.xlu0 %v6556_v45, %s4548_s9  ;;  %2092 = vrot.lane.b32.xlu2 %v6556_v45, %s4549_s11  ;;  %v2370_v50 = vsel %vm2355_vm7, %v2337_v8, %v2159_v7  ;;  %v2528_v2 = vmul.f32 %v6544_v58, %v7964_v55  ;;  %7965 = vst [vmem:[#allocation44_spill] sm:$0xff] %v6577_v44  ;;  %v7969_v8 = vld [vmem:[#allocation59_spill] sm:$0xff] }
 0x2c9   : > { %2282 = vrot.lane.b32.xlu1 %v6527_v52, %s4547_s8  ;;  %3086 = vmatmul.f32.gmra.mxu3 %v2527_v38  ;;  %v2161_v28 = vpop.permute.xlu0 %2160  ;;  %v7967_v38 = vld [vmem:[#allocation21_spill] sm:$0xff]  ;;  %v6585_v57 = vpop.permute.xlu2 %2070 }
 0x2cb   : > { %v2255_v20 = vpop.permute.xlu1 %2254 }
 0x2cc   : > { %v6575_v62 = vsel %vm2388_vm9, %v2370_v50, %v2255_v20  ;;  %v6579_v51 = vpop.f32.mrf.mxu3  ;;  %v6595_v20 = vpop.f32.mrf.mxu1 }
 0x2cd   : > { %7966 = vst [vmem:[#allocation47_spill] sm:$0xff] %v6579_v51  ;;  %3199 = vmatmul.f32.gmra.mxu0 %v2528_v2  ;;  %v2533_v27 = vmul.f32 %v6575_v62, %v7967_v38  ;;  %v2534_v24 = vmul.f32 %v6575_v62, %v7968_v21  ;;  %v2535_v50 = vmul.f32 %v6575_v62, %v7969_v8  ;;  %v7971_v38 = vld [vmem:[#allocation65_spill] sm:$0xff]  ;;  %v7974_v51 = vld [vmem:[#allocation60_spill] sm:$0xff] }
 0x2ce   : > { %v6587_v7 = vpop.f32.mrf.mxu0  ;;  %7970 = vst [vmem:[#allocation174_spill] sm:$0xff] %v6595_v20  ;;  %v7973_v20 = vld [vmem:[#allocation24_spill] sm:$0xff]  ;;  %v6614_v56 = vpop.f32.mrf.mxu2 }
 0x2cf   : > { %2863 = vmatmul.f32.gmra.mxu1 %v2533_v27  ;;  %2976 = vmatmul.f32.gmra.mxu2 %v2534_v24  ;;  %v2338_v27 = vsel %vm2322_vm8, %v6128_v40, %v6480_v47  ;;  %v2536_v24 = vmul.f32 %v6575_v62, %v7971_v38  ;;  %7975 = vst [vmem:[#allocation15_spill] sm:$0xff] %v6614_v56  ;;  %v7976_v40 = vld [vmem:[#allocation63_spill] sm:$0xff]  ;;  %v7977_v38 = vld [vmem:[#allocation70_spill] sm:$0xff] }
 0x2d0   : > { %2190 = vrot.lane.b32.xlu0 %v6587_v7, %s4548_s9  ;;  %2094 = vrot.lane.b32.xlu2 %v6587_v7, %s4549_s11  ;;  %v2371_v55 = vsel %vm2355_vm7, %v2338_v27, %v2161_v28 }
 0x2d1   : > { %2284 = vrot.lane.b32.xlu1 %v6556_v45, %s4547_s8  ;;  %3089 = vmatmul.f32.gmra.mxu3 %v2535_v50  ;;  %v2163_v21 = vpop.permute.xlu0 %2162  ;;  %v6618_v28 = vpop.permute.xlu2 %2072 }
 0x2d3   : > { %v2257_v2 = vpop.permute.xlu1 %2256 }
 0x2d4   : > { %v6606_v8 = vsel %vm2388_vm9, %v2371_v55, %v2257_v2  ;;  %v6608_v44 = vpop.f32.mrf.mxu3 }
 0x2d5   : > { %7972 = vst [vmem:[#allocation53_spill] sm:$0xff] %v6608_v44  ;;  %3202 = vmatmul.f32.gmra.mxu0 %v2536_v24  ;;  %v2541_v50 = vmul.f32 %v6606_v8, %v7973_v20  ;;  %v2542_v1 = vmul.f32 %v6606_v8, %v7974_v51  ;;  %v2543_v47 = vmul.f32 %v6606_v8, %v7976_v40  ;;  %v2822_v2 = vpop.f32.mrf.mxu1 }
 0x2d6   : > { %v2339_v20 = vsel %vm2322_vm8, %v6155_v31, %v6512_v19  ;;  %v2544_v24 = vmul.f32 %v6606_v8, %v7977_v38  ;;  %v7979_v31 = vld [vmem:[#allocation8_spill] sm:$0xff] }
 0x2d7   : > { %2866 = vmatmul.f32.gmra.mxu1 %v2541_v50  ;;  %2979 = vmatmul.f32.gmra.mxu2 %v2542_v1  ;;  %v2372_v51 = vsel %vm2355_vm7, %v2339_v20, %v2163_v21  ;;  %v7980_v21 = vld [vmem:[#allocation64_spill] sm:$0xff]  ;;  %v7981_v20 = vld [vmem:[#allocation67_spill] sm:$0xff] }
 0x2d9   : > { %2286 = vrot.lane.b32.xlu1 %v6587_v7, %s4547_s8  ;;  %3092 = vmatmul.f32.gmra.mxu3 %v2543_v47  ;;  %v2165_v27 = vpop.permute.xlu0 %2164  ;;  %v6650_v38 = vpop.permute.xlu2 %2074 }
 0x2da   : > { %v6625_v55 = vpop.f32.mrf.mxu0 }
 0x2db   : > { %v2259_v1 = vpop.permute.xlu1 %2258  ;;  %2192 = vrot.lane.b32.xlu0 %v6625_v55, %s4548_s9  ;;  %2096 = vrot.lane.b32.xlu2 %v6625_v55, %s4549_s11  ;;  %v2935_v44 = vpop.f32.mrf.mxu2 }
 0x2dc   : > { %v6635_v50 = vsel %vm2388_vm9, %v2372_v51, %v2259_v1  ;;  %v6637_v40 = vpop.f32.mrf.mxu3  ;;  %v2340_v1 = vsel %vm2322_vm8, %v6186_v16, %v6548_v0  ;;  %v7984_v0 = vld [vmem:[#allocation69_spill] sm:$0xff] }
 0x2dd   : > { %7978 = vst [vmem:[#allocation48_spill] sm:$0xff] %v6637_v40  ;;  %3205 = vmatmul.f32.gmra.mxu0 %v2544_v24  ;;  %v2549_v19 = vmul.f32 %v6635_v50, %v7979_v31  ;;  %v2550_v47 = vmul.f32 %v6635_v50, %v7980_v21  ;;  %v2551_v56 = vmul.f32 %v6635_v50, %v7981_v20  ;;  %v7982_v40 = vld [vmem:[#allocation74_spill] sm:$0xff] }
 0x2de   : > { %v2373_v31 = vsel %vm2355_vm7, %v2340_v1, %v2165_v27  ;;  %v2552_v20 = vmul.f32 %v6635_v50, %v7982_v40 }
 0x2df   : > { %2869 = vmatmul.f32.gmra.mxu1 %v2549_v19  ;;  %2982 = vmatmul.f32.gmra.mxu2 %v2550_v47  ;;  %v2936_v19 = vadd.f32 %v2935_v44, %v2822_v2  ;;  %v7985_v44 = vld [vmem:[#allocation72_spill] sm:$0xff] }
 0x2e1   : > { %2288 = vrot.lane.b32.xlu1 %v6625_v55, %s4547_s8  ;;  %3095 = vmatmul.f32.gmra.mxu3 %v2551_v56  ;;  %v2167_v51 = vpop.permute.xlu0 %2166 }
 0x2e2   : > { %v3161_v24 = vpop.f32.mrf.mxu0 }
 0x2e3   : > { %v2261_v21 = vpop.permute.xlu1 %2260  ;;  %v2825_v47 = vpop.f32.mrf.mxu1 }
 0x2e4   : > { %v6656_v42 = vsel %vm2388_vm9, %v2373_v31, %v2261_v21  ;;  %v3048_v56 = vpop.f32.mrf.mxu3  ;;  %v2341_v31 = vsel %vm2322_vm8, %v6217_v63, %v6585_v57  ;;  %v7988_v63 = vld [vmem:[#allocation73_spill] sm:$0xff] }
 0x2e5   : > { %v3049_v59 = vadd.f32 %v3048_v56, %v2936_v19  ;;  %3208 = vmatmul.f32.gmra.mxu0 %v2552_v20  ;;  %v2557_v16 = vmul.f32 %v6656_v42, %v7983_v36  ;;  %v2558_v26 = vmul.f32 %v6656_v42, %v7984_v0  ;;  %v2559_v27 = vmul.f32 %v6656_v42, %v7985_v44  ;;  %v2077_v0 = vpop.permute.xlu2 %2076 }
 0x2e6   : > { %v2374_v36 = vsel %vm2355_vm7, %v2341_v31, %v2167_v51  ;;  %v7989_v51 = vld [vmem:[#allocation76_spill] sm:$0xff] }
 0x2e7   : > { %2872 = vmatmul.f32.gmra.mxu1 %v2557_v16  ;;  %2985 = vmatmul.f32.gmra.mxu2 %v2558_v26  ;;  %v6664_v2 = vadd.f32 %v3161_v24, %v3049_v59  ;;  %v7986_v16 = vld [vmem:[#allocation78_spill] sm:$0xff] }
 0x2e8   : > { %v2560_v26 = vmul.f32 %v6656_v42, %v7986_v16 }
 0x2e9   : > { %v2938_v40 = vpop.f32.mrf.mxu2  ;;  %3098 = vmatmul.f32.gmra.mxu3 %v2559_v27  ;;  %v2169_v1 = vpop.permute.xlu0 %2168  ;;  %v7987_v27 = vld [vmem:[#allocation14_spill] sm:$0xff] }
 0x2ea   : > { %v2939_v19 = vadd.f32 %v2938_v40, %v2825_v47  ;;  %v3164_v21 = vpop.f32.mrf.mxu0 }
 0x2eb   : > { %v2263_v20 = vpop.permute.xlu1 %2262  ;;  %v2828_v56 = vpop.f32.mrf.mxu1 }
 0x2ec   : > { %v6673_v59 = vsel %vm2388_vm9, %v2374_v36, %v2263_v20  ;;  %v3051_v24 = vpop.f32.mrf.mxu3 }
 0x2ed   : > { %v3052_v44 = vadd.f32 %v3051_v24, %v2939_v19  ;;  %3211 = vmatmul.f32.gmra.mxu0 %v2560_v26  ;;  %v2565_v53 = vmul.f32 %v6673_v59, %v7987_v27  ;;  %v2566_v57 = vmul.f32 %v6673_v59, %v7988_v63  ;;  %v2567_v47 = vmul.f32 %v6673_v59, %v7989_v51  ;;  %v7991_v51 = vld [vmem:[#allocation17_spill] sm:$0xff] }
 0x2ee   : > { %v2342_v19 = vsel %vm2322_vm8, %v6248_v22, %v6618_v28  ;;  %v2079_v28 = vpop.permute.xlu2 %2078 }
 0x2ef   : > { %2875 = vmatmul.f32.gmra.mxu1 %v2565_v53  ;;  %2988 = vmatmul.f32.gmra.mxu2 %v2566_v57  ;;  %v6681_v40 = vadd.f32 %v3164_v21, %v3052_v44  ;;  %v2375_v26 = vsel %vm2355_vm7, %v2342_v19, %v2169_v1  ;;  %v7990_v53 = vld [vmem:[#allocation82_spill] sm:$0xff]  ;;  %v7993_v1 = vld [vmem:[#allocation80_spill] sm:$0xff] }
 0x2f0   : > { %v2568_v63 = vmul.f32 %v6673_v59, %v7990_v53 }
 0x2f1   : > { %v2941_v31 = vpop.f32.mrf.mxu2  ;;  %3101 = vmatmul.f32.gmra.mxu3 %v2567_v47  ;;  %v2171_v36 = vpop.permute.xlu0 %2170 }
 0x2f2   : > { %v2942_v20 = vadd.f32 %v2941_v31, %v2828_v56  ;;  %v3167_v16 = vpop.f32.mrf.mxu0 }
 0x2f3   : > { %v2265_v24 = vpop.permute.xlu1 %2264  ;;  %v2831_v27 = vpop.f32.mrf.mxu1 }
 0x2f4   : > { %v6690_v57 = vsel %vm2388_vm9, %v2375_v26, %v2265_v24  ;;  %v3054_v21 = vpop.f32.mrf.mxu3 }
 0x2f5   : > { %v3055_v44 = vadd.f32 %v3054_v21, %v2942_v20  ;;  %3214 = vmatmul.f32.gmra.mxu0 %v2568_v63  ;;  %v2573_v47 = vmul.f32 %v6690_v57, %v7991_v51  ;;  %v2574_v22 = vmul.f32 %v6690_v57, %v7992_v15  ;;  %v2575_v56 = vmul.f32 %v6690_v57, %v7993_v1  ;;  %v7995_v51 = vld [vmem:[#allocation86_spill] sm:$0xff]  ;;  %v7996_v1 = vld [vmem:[#allocation20_spill] sm:$0xff] }
 0x2f6   : > { %v2343_v20 = vsel %vm2322_vm8, %v6279_v6, %v6650_v38  ;;  %v7998_v38 = vld [vmem:[#allocation84_spill] sm:$0xff] }
 0x2f7   : > { %2878 = vmatmul.f32.gmra.mxu1 %v2573_v47  ;;  %2991 = vmatmul.f32.gmra.mxu2 %v2574_v22  ;;  %v6698_v31 = vadd.f32 %v3167_v16, %v3055_v44  ;;  %v2376_v63 = vsel %vm2355_vm7, %v2343_v20, %v2171_v36  ;;  %v2576_v47 = vmul.f32 %v6690_v57, %v7995_v51 }
 0x2f9   : > { %7994 = vst [vmem:[#allocation51_spill] sm:$0xff] %v6698_v31  ;;  %v2944_v19 = vpop.f32.mrf.mxu2  ;;  %3104 = vmatmul.f32.gmra.mxu3 %v2575_v56  ;;  %v2173_v26 = vpop.permute.xlu0 %2172  ;;  %v7997_v31 = vld [vmem:[#allocation81_spill] sm:$0xff] }
 0x2fa   : > { %v2945_v24 = vadd.f32 %v2944_v19, %v2831_v27  ;;  %v3170_v53 = vpop.f32.mrf.mxu0  ;;  %v2081_v19 = vpop.permute.xlu2 %2080 }
 0x2fb   : > { %v2267_v15 = vpop.permute.xlu1 %2266  ;;  %v2834_v21 = vpop.f32.mrf.mxu1 }
 0x2fc   : > { %v6707_v22 = vsel %vm2388_vm9, %v2376_v63, %v2267_v15  ;;  %v3057_v16 = vpop.f32.mrf.mxu3 }
 0x2fd   : > { %v3058_v44 = vadd.f32 %v3057_v16, %v2945_v24  ;;  %3217 = vmatmul.f32.gmra.mxu0 %v2576_v47  ;;  %v2581_v56 = vmul.f32 %v6707_v22, %v7996_v1  ;;  %v2582_v6 = vmul.f32 %v6707_v22, %v7997_v31  ;;  %v2583_v36 = vmul.f32 %v6707_v22, %v7998_v38  ;;  %v8000_v1 = vld [vmem:[#allocation90_spill] sm:$0xff]  ;;  %v8001_v38 = vld [vmem:[#allocation23_spill] sm:$0xff] }
 0x2fe   : > { %v2344_v24 = vsel %vm2322_vm8, %v6310_v10, %v2077_v0  ;;  %v8003_v0 = vld [vmem:[#allocation88_spill] sm:$0xff] }
 0x2ff   : > { %2881 = vmatmul.f32.gmra.mxu1 %v2581_v56  ;;  %2994 = vmatmul.f32.gmra.mxu2 %v2582_v6  ;;  %v6715_v27 = vadd.f32 %v3170_v53, %v3058_v44  ;;  %v2377_v47 = vsel %vm2355_vm7, %v2344_v24, %v2173_v26  ;;  %v2584_v56 = vmul.f32 %v6707_v22, %v8000_v1 }
 0x301   : > { %7999 = vst [vmem:[#allocation178_spill] sm:$0xff] %v6715_v27  ;;  %v2947_v20 = vpop.f32.mrf.mxu2  ;;  %3107 = vmatmul.f32.gmra.mxu3 %v2583_v36  ;;  %v2175_v63 = vpop.permute.xlu0 %2174  ;;  %v8002_v27 = vld [vmem:[#allocation85_spill] sm:$0xff] }
 0x302   : > { %v2948_v15 = vadd.f32 %v2947_v20, %v2834_v21  ;;  %v3173_v51 = vpop.f32.mrf.mxu0 }
 0x303   : > { %v2269_v16 = vpop.permute.xlu1 %2268  ;;  %v2837_v31 = vpop.f32.mrf.mxu1 }
 0x304   : > { %v6723_v6 = vsel %vm2388_vm9, %v2377_v47, %v2269_v16  ;;  %v3060_v53 = vpop.f32.mrf.mxu3  ;;  %v2083_v47 = vpop.permute.xlu2 %2082 }
 0x305   : > { %v3061_v44 = vadd.f32 %v3060_v53, %v2948_v15  ;;  %3220 = vmatmul.f32.gmra.mxu0 %v2584_v56  ;;  %v2589_v36 = vmul.f32 %v6723_v6, %v8001_v38  ;;  %v2590_v10 = vmul.f32 %v6723_v6, %v8002_v27  ;;  %v2591_v26 = vmul.f32 %v6723_v6, %v8003_v0  ;;  %v8004_v38 = vld [vmem:[#allocation94_spill] sm:$0xff] }
 0x306   : > { %v2345_v15 = vsel %vm2322_vm8, %v6341_v14, %v2079_v28  ;;  %v8005_v0 = vld [vmem:[#allocation26_spill] sm:$0xff]  ;;  %v8006_v14 = vld [vmem:[#allocation89_spill] sm:$0xff] }
 0x307   : > { %2884 = vmatmul.f32.gmra.mxu1 %v2589_v36  ;;  %2997 = vmatmul.f32.gmra.mxu2 %v2590_v10  ;;  %v6731_v21 = vadd.f32 %v3173_v51, %v3061_v44  ;;  %v2378_v56 = vsel %vm2355_vm7, %v2345_v15, %v2175_v63  ;;  %v2592_v36 = vmul.f32 %v6723_v6, %v8004_v38  ;;  %v8007_v63 = vld [vmem:[#allocation92_spill] sm:$0xff] }
 0x309   : > { %v2950_v20 = vpop.f32.mrf.mxu2  ;;  %3110 = vmatmul.f32.gmra.mxu3 %v2591_v26  ;;  %v2177_v24 = vpop.permute.xlu0 %2176 }
 0x30a   : > { %v2951_v16 = vadd.f32 %v2950_v20, %v2837_v31  ;;  %v3176_v1 = vpop.f32.mrf.mxu0 }
 0x30b   : > { %v2271_v53 = vpop.permute.xlu1 %2270  ;;  %v2840_v27 = vpop.f32.mrf.mxu1 }
 0x30c   : > { %v6739_v10 = vsel %vm2388_vm9, %v2378_v56, %v2271_v53  ;;  %v3063_v51 = vpop.f32.mrf.mxu3 }
 0x30d   : > { %v3064_v44 = vadd.f32 %v3063_v51, %v2951_v16  ;;  %3223 = vmatmul.f32.gmra.mxu0 %v2592_v36  ;;  %v2597_v26 = vmul.f32 %v6739_v10, %v8005_v0  ;;  %v2598_v28 = vmul.f32 %v6739_v10, %v8006_v14  ;;  %v2599_v31 = vmul.f32 %v6739_v10, %v8007_v63  ;;  %v8009_v14 = vld [vmem:[#allocation98_spill] sm:$0xff] }
 0x30e   : > { %v2346_v16 = vsel %vm2322_vm8, %v6372_v18, %v2081_v19  ;;  %v8011_v18 = vld [vmem:[#allocation93_spill] sm:$0xff] }
 0x30f   : > { %2887 = vmatmul.f32.gmra.mxu1 %v2597_v26  ;;  %3000 = vmatmul.f32.gmra.mxu2 %v2598_v28  ;;  %v6747_v20 = vadd.f32 %v3176_v1, %v3064_v44  ;;  %v2379_v36 = vsel %vm2355_vm7, %v2346_v16, %v2177_v24  ;;  %v2600_v26 = vmul.f32 %v6739_v10, %v8009_v14  ;;  %v2085_v28 = vpop.permute.xlu2 %2084  ;;  %v8012_v24 = vld [vmem:[#allocation96_spill] sm:$0xff] }
 0x311   : > { %8008 = vst [vmem:[#allocation57_spill] sm:$0xff] %v6747_v20  ;;  %v2953_v15 = vpop.f32.mrf.mxu2  ;;  %3113 = vmatmul.f32.gmra.mxu3 %v2599_v31  ;;  %v2179_v56 = vpop.permute.xlu0 %2178  ;;  %v8010_v31 = vld [vmem:[#allocation7_spill] sm:$0xff] }
 0x312   : > { %v2954_v53 = vadd.f32 %v2953_v15, %v2840_v27  ;;  %v3179_v38 = vpop.f32.mrf.mxu0 }
 0x313   : > { %v2273_v51 = vpop.permute.xlu1 %2272  ;;  %v2843_v0 = vpop.f32.mrf.mxu1 }
 0x314   : > { %v6755_v63 = vsel %vm2388_vm9, %v2379_v36, %v2273_v51  ;;  %v3066_v1 = vpop.f32.mrf.mxu3 }
 0x315   : > { %v3067_v44 = vadd.f32 %v3066_v1, %v2954_v53  ;;  %3226 = vmatmul.f32.gmra.mxu0 %v2600_v26  ;;  %v2605_v20 = vmul.f32 %v6755_v63, %v8010_v31  ;;  %v2606_v19 = vmul.f32 %v6755_v63, %v8011_v18  ;;  %v2607_v27 = vmul.f32 %v6755_v63, %v8012_v24  ;;  %v8014_v18 = vld [vmem:[#allocation102_spill] sm:$0xff] }
 0x316   : > { %v2347_v53 = vsel %vm2322_vm8, %v6403_v34, %v2083_v47  ;;  %v8016_v24 = vld [vmem:[#allocation10_spill] sm:$0xff] }
 0x317   : > { %2890 = vmatmul.f32.gmra.mxu1 %v2605_v20  ;;  %3003 = vmatmul.f32.gmra.mxu2 %v2606_v19  ;;  %v6763_v15 = vadd.f32 %v3179_v38, %v3067_v44  ;;  %v2380_v26 = vsel %vm2355_vm7, %v2347_v53, %v2179_v56  ;;  %v2608_v20 = vmul.f32 %v6755_v63, %v8014_v18  ;;  %v2087_v47 = vpop.permute.xlu2 %2086  ;;  %v8018_v56 = vld [vmem:[#allocation100_spill] sm:$0xff]  ;;  %v2772_v53 = vld [vmem:[%s7711_s4 + $0x2f8] sm:$0xff] }
 0x318   : > { %3370 = vmatpush.msra.mxu2 %v2772_v53 }
 0x319   : > { %8013 = vst [vmem:[#allocation18_spill] sm:$0xff] %v6763_v15  ;;  %v2956_v16 = vpop.f32.mrf.mxu2  ;;  %3116 = vmatmul.f32.gmra.mxu3 %v2607_v27  ;;  %v2181_v36 = vpop.permute.xlu0 %2180  ;;  %v8017_v15 = vld [vmem:[#allocation97_spill] sm:$0xff] }
 0x31a   : > { %v2957_v51 = vadd.f32 %v2956_v16, %v2843_v0  ;;  %v3182_v14 = vpop.f32.mrf.mxu0  ;;  %v2756_v16 = vld [vmem:[%s7711_s4 + $0x278] sm:$0xff] }
 0x31b   : > { %v2275_v1 = vpop.permute.xlu1 %2274  ;;  %v2846_v31 = vpop.f32.mrf.mxu1  ;;  %3257 = vmatpush.msra.mxu1 %v2756_v16  ;;  %v8021_v16 = vld [vmem:[#allocation13_spill] sm:$0xff] }
 0x31c   : > { %v6771_v19 = vsel %vm2388_vm9, %v2380_v26, %v2275_v1  ;;  %v3069_v38 = vpop.f32.mrf.mxu3  ;;  %v2348_v1 = vsel %vm2322_vm8, %v6434_v46, %v2085_v28 }
 0x31d   : > { %8015 = vst [vmem:[#allocation52_spill] sm:$0xff] %v6771_v19  ;;  %v3070_v44 = vadd.f32 %v3069_v38, %v2957_v51  ;;  %3229 = vmatmul.f32.gmra.mxu0 %v2608_v20  ;;  %v2613_v27 = vmul.f32 %v6771_v19, %v8016_v24  ;;  %v2614_v34 = vmul.f32 %v6771_v19, %v8017_v15  ;;  %v2755_v38 = vld [vmem:[%s7711_s4 + $0x270] sm:$0xff] }
 0x31e   : > { %v2615_v0 = vmul.f32 %v6771_v19, %v8018_v56  ;;  %v2771_v24 = vld [vmem:[%s7711_s4 + $0x2f0] sm:$0xff]  ;;  %3258 = vmatpush.msra.mxu1 %v2755_v38  ;;  %v2788_v38 = vld [vmem:[%s7711_s4 + $0x378] sm:$0xff] }
 0x31f   : > { %2893 = vmatmul.f32.gmra.mxu1 %v2613_v27  ;;  %3006 = vmatmul.f32.gmra.mxu2 %v2614_v34  ;;  %v6785_v51 = vadd.f32 %v3182_v14, %v3070_v44  ;;  %v2381_v14 = vsel %vm2355_vm7, %v2348_v1, %v2181_v36  ;;  %v8020_v34 = vld [vmem:[#allocation106_spill] sm:$0xff] }
 0x320   : > { %v2616_v56 = vmul.f32 %v6771_v19, %v8020_v34  ;;  %3371 = vmatpush.msra.mxu2 %v2771_v24  ;;  %v2753_v24 = vld [vmem:[%s7711_s4 + $0x260] sm:$0xff]  ;;  %v2787_v34 = vld [vmem:[%s7711_s4 + $0x370] sm:$0xff]  ;;  %3483 = vmatpush.msra.mxu3 %v2788_v38 }
 0x321   : > { %8019 = vst [vmem:[#allocation55_spill] sm:$0xff] %v6785_v51  ;;  %v2959_v26 = vpop.f32.mrf.mxu2  ;;  %3119 = vmatmul.f32.gmra.mxu3 %v2615_v0  ;;  %v2183_v15 = vpop.permute.xlu0 %2182  ;;  %v2770_v0 = vld [vmem:[%s7711_s4 + $0x2e8] sm:$0xff]  ;;  %v2751_v51 = vld [vmem:[%s7711_s4 + $0x250] sm:$0xff] }
 0x322   : > { %v2960_v18 = vadd.f32 %v2959_v26, %v2846_v31  ;;  %v3185_v20 = vpop.f32.mrf.mxu0  ;;  %v2754_v31 = vld [vmem:[%s7711_s4 + $0x268] sm:$0xff]  ;;  %v8022_v26 = vld [vmem:[#allocation101_spill] sm:$0xff]  ;;  %3372 = vmatpush.msra.mxu2 %v2770_v0  ;;  %3484 = vmatpush.msra.mxu3 %v2787_v34  ;;  %v8026_v34 = vld [vmem:[#allocation16_spill] sm:$0xff] }
 0x323   : > { %v2277_v44 = vpop.permute.xlu1 %2276  ;;  %v2849_v27 = vpop.f32.mrf.mxu1  ;;  %3259 = vmatpush.msra.mxu1 %v2754_v31  ;;  %v2752_v0 = vld [vmem:[%s7711_s4 + $0x258] sm:$0xff] }
 0x324   : > { %v6799_v46 = vsel %vm2388_vm9, %v2381_v14, %v2277_v44  ;;  %v3072_v28 = vpop.f32.mrf.mxu3  ;;  %v8023_v14 = vld [vmem:[#allocation104_spill] sm:$0xff]  ;;  %v2089_v31 = vpop.permute.xlu2 %2088 }
 0x325   : > { %v3073_v36 = vadd.f32 %v3072_v28, %v2960_v18  ;;  %3232 = vmatmul.f32.gmra.mxu0 %v2616_v56  ;;  %v2621_v53 = vmul.f32 %v6799_v46, %v8021_v16  ;;  %v2622_v1 = vmul.f32 %v6799_v46, %v8022_v26  ;;  %v2769_v18 = vld [vmem:[%s7711_s4 + $0x2e0] sm:$0xff]  ;;  %v2623_v44 = vmul.f32 %v6799_v46, %v8023_v14  ;;  %v2804_v56 = vld [vmem:[%s7711_s4 + $0x3f8] sm:$0xff]  ;;  %v2786_v26 = vld [vmem:[%s7711_s4 + $0x368] sm:$0xff] }
 0x326   : > { %3260 = vmatpush.msra.mxu1 %v2753_v24  ;;  %v2768_v16 = vld [vmem:[%s7711_s4 + $0x2d8] sm:$0xff]  ;;  %3373 = vmatpush.msra.mxu2 %v2769_v18 }
 0x327   : > { %2896 = vmatmul.f32.gmra.mxu1 %v2621_v53  ;;  %3009 = vmatmul.f32.gmra.mxu2 %v2622_v1  ;;  %v6828_v28 = vadd.f32 %v3185_v20, %v3073_v36  ;;  %v2803_v20 = vld [vmem:[%s7711_s4 + $0x3f0] sm:$0xff]  ;;  %v2349_v36 = vsel %vm2322_vm8, %v6465_v39, %v2087_v47 }
 0x328   : > { %3596 = vmatpush.msra.mxu0 %v2804_v56  ;;  %v2382_v14 = vsel %vm2355_vm7, %v2349_v36, %v2183_v15  ;;  %3261 = vmatpush.msra.mxu1 %v2752_v0  ;;  %v2767_v39 = vld [vmem:[%s7711_s4 + $0x2d0] sm:$0xff]  ;;  %v2766_v36 = vld [vmem:[%s7711_s4 + $0x2c8] sm:$0xff] }
 0x329   : > { %8024 = vst [vmem:[#allocation61_spill] sm:$0xff] %v6828_v28  ;;  %v2962_v53 = vpop.f32.mrf.mxu2  ;;  %3122 = vmatmul.f32.gmra.mxu3 %v2623_v44  ;;  %v2185_v38 = vpop.permute.xlu0 %2184  ;;  %v8025_v28 = vld [vmem:[#allocation110_spill] sm:$0xff]  ;;  %3374 = vmatpush.msra.mxu2 %v2768_v16 }
 0x32a   : > { %v2963_v1 = vadd.f32 %v2962_v53, %v2849_v27  ;;  %v3188_v24 = vpop.f32.mrf.mxu0  ;;  %v2624_v19 = vmul.f32 %v6799_v46, %v8025_v28  ;;  %3485 = vmatpush.msra.mxu3 %v2786_v26  ;;  %3597 = vmatpush.msra.mxu0 %v2803_v20  ;;  %v8027_v28 = vld [vmem:[#allocation105_spill] sm:$0xff]  ;;  %v2785_v16 = vld [vmem:[%s7711_s4 + $0x360] sm:$0xff]  ;;  %v2802_v53 = vld [vmem:[%s7711_s4 + $0x3e8] sm:$0xff] }
 0x32b   : > { %v2279_v44 = vpop.permute.xlu1 %2278  ;;  %v2852_v18 = vpop.f32.mrf.mxu1  ;;  %3262 = vmatpush.msra.mxu1 %v2751_v51  ;;  %3375 = vmatpush.msra.mxu2 %v2767_v39  ;;  %v8028_v26 = vld [vmem:[#allocation108_spill] sm:$0xff]  ;;  %v2801_v51 = vld [vmem:[%s7711_s4 + $0x3e0] sm:$0xff] }
 0x32c   : > { %v6854_v47 = vsel %vm2388_vm9, %v2382_v14, %v2279_v44  ;;  %v3075_v27 = vpop.f32.mrf.mxu3  ;;  %3486 = vmatpush.msra.mxu3 %v2785_v16  ;;  %3598 = vmatpush.msra.mxu0 %v2802_v53  ;;  %v2749_v44 = vld [vmem:[%s7711_s4 + $0x240] sm:$0xff] }
 0x32d   : > { %v3076_v15 = vadd.f32 %v3075_v27, %v2963_v1  ;;  %3235 = vmatmul.f32.gmra.mxu0 %v2624_v19  ;;  %v2629_v56 = vmul.f32 %v6854_v47, %v8026_v34  ;;  %v2630_v0 = vmul.f32 %v6854_v47, %v8027_v28  ;;  %v2750_v19 = vld [vmem:[%s7711_s4 + $0x248] sm:$0xff]  ;;  %v2631_v20 = vmul.f32 %v6854_v47, %v8028_v26  ;;  %v2784_v1 = vld [vmem:[%s7711_s4 + $0x358] sm:$0xff]  ;;  %v2765_v27 = vld [vmem:[%s7711_s4 + $0x2c0] sm:$0xff]  ;;  %v2091_v34 = vpop.permute.xlu2 %2090 }
 0x32e   : > { %3263 = vmatpush.msra.mxu1 %v2750_v19  ;;  %3376 = vmatpush.msra.mxu2 %v2766_v36  ;;  %v8030_v19 = vld [vmem:[#allocation114_spill] sm:$0xff] }
 0x32f   : > { %2899 = vmatmul.f32.gmra.mxu1 %v2629_v56  ;;  %3012 = vmatmul.f32.gmra.mxu2 %v2630_v0  ;;  %v6877_v14 = vadd.f32 %v3188_v24, %v3076_v15  ;;  %v2783_v24 = vld [vmem:[%s7711_s4 + $0x350] sm:$0xff]  ;;  %v2350_v15 = vsel %vm2322_vm8, %v6496_v30, %v2089_v31  ;;  %v2632_v26 = vmul.f32 %v6854_v47, %v8030_v19  ;;  %v2748_v30 = vld [vmem:[%s7711_s4 + $0x238] sm:$0xff] }
 0x330   : > { %3487 = vmatpush.msra.mxu3 %v2784_v1  ;;  %v2383_v0 = vsel %vm2355_vm7, %v2350_v15, %v2185_v38  ;;  %3599 = vmatpush.msra.mxu0 %v2801_v51  ;;  %v8031_v1 = vld [vmem:[#allocation19_spill] sm:$0xff]  ;;  %v2764_v15 = vld [vmem:[%s7711_s4 + $0x2b8] sm:$0xff]  ;;  %v2763_v19 = vld [vmem:[%s7711_s4 + $0x2b0] sm:$0xff] }
 0x331   : > { %8029 = vst [vmem:[#allocation21_spill] sm:$0xff] %v6877_v14  ;;  %v2965_v39 = vpop.f32.mrf.mxu2  ;;  %3125 = vmatmul.f32.gmra.mxu3 %v2631_v20  ;;  %3264 = vmatpush.msra.mxu1 %v2749_v44  ;;  %v2800_v20 = vld [vmem:[%s7711_s4 + $0x3d8] sm:$0xff]  ;;  %v2759_v14 = vld [vmem:[%s7711_s4 + $0x290] sm:$0xff] }
 0x332   : > { %v2966_v56 = vadd.f32 %v2965_v39, %v2852_v18  ;;  %v3191_v28 = vpop.f32.mrf.mxu0  ;;  %v2187_v18 = vpop.permute.xlu0 %2186  ;;  %3377 = vmatpush.msra.mxu2 %v2765_v27  ;;  %3488 = vmatpush.msra.mxu3 %v2783_v24  ;;  %v8032_v44 = vld [vmem:[#allocation109_spill] sm:$0xff]  ;;  %v2799_v27 = vld [vmem:[%s7711_s4 + $0x3d0] sm:$0xff] }
 0x333   : > { %v2281_v16 = vpop.permute.xlu1 %2280  ;;  %v2855_v53 = vpop.f32.mrf.mxu1  ;;  %3600 = vmatpush.msra.mxu0 %v2800_v20  ;;  %3265 = vmatpush.msra.mxu1 %v2748_v30  ;;  %v8033_v24 = vld [vmem:[#allocation112_spill] sm:$0xff]  ;;  %v2781_v20 = vld [vmem:[%s7711_s4 + $0x340] sm:$0xff]  ;;  %v2798_v30 = vld [vmem:[%s7711_s4 + $0x3c8] sm:$0xff] }
 0x334   : > { %v6903_v31 = vsel %vm2388_vm9, %v2383_v0, %v2281_v16  ;;  %v3078_v38 = vpop.f32.mrf.mxu3  ;;  %v2782_v0 = vld [vmem:[%s7711_s4 + $0x348] sm:$0xff]  ;;  %v2747_v16 = vld [vmem:[%s7711_s4 + $0x230] sm:$0xff]  ;;  %3378 = vmatpush.msra.mxu2 %v2764_v15 }
 0x335   : > { %v3079_v36 = vadd.f32 %v3078_v38, %v2966_v56  ;;  %3238 = vmatmul.f32.gmra.mxu0 %v2632_v26  ;;  %v2637_v51 = vmul.f32 %v6903_v31, %v8031_v1  ;;  %v2638_v39 = vmul.f32 %v6903_v31, %v8032_v44  ;;  %v2639_v56 = vmul.f32 %v6903_v31, %v8033_v24  ;;  %v2746_v1 = vld [vmem:[%s7711_s4 + $0x228] sm:$0xff] }
 0x336   : > { %3489 = vmatpush.msra.mxu3 %v2782_v0  ;;  %3601 = vmatpush.msra.mxu0 %v2799_v27  ;;  %v8035_v27 = vld [vmem:[#allocation118_spill] sm:$0xff] }
 0x337   : > { %2902 = vmatmul.f32.gmra.mxu1 %v2637_v51  ;;  %3015 = vmatmul.f32.gmra.mxu2 %v2638_v39  ;;  %v6926_v26 = vadd.f32 %v3191_v28, %v3079_v36  ;;  %v2762_v28 = vld [vmem:[%s7711_s4 + $0x2a8] sm:$0xff]  ;;  %v2351_v36 = vsel %vm2322_vm8, %v6527_v52, %v2091_v34  ;;  %v2640_v24 = vmul.f32 %v6903_v31, %v8035_v27  ;;  %v2797_v52 = vld [vmem:[%s7711_s4 + $0x3c0] sm:$0xff]  ;;  %v2779_v27 = vld [vmem:[%s7711_s4 + $0x330] sm:$0xff] }
 0x338   : > { %3266 = vmatpush.msra.mxu1 %v2747_v16  ;;  %3379 = vmatpush.msra.mxu2 %v2763_v19  ;;  %v2384_v39 = vsel %vm2355_vm7, %v2351_v36, %v2187_v18  ;;  %v2093_v18 = vpop.permute.xlu2 %2092  ;;  %v8036_v19 = vld [vmem:[#allocation22_spill] sm:$0xff] }
 0x339   : > { %8034 = vst [vmem:[#allocation56_spill] sm:$0xff] %v6926_v26  ;;  %v2968_v38 = vpop.f32.mrf.mxu2  ;;  %3128 = vmatmul.f32.gmra.mxu3 %v2639_v56  ;;  %3602 = vmatpush.msra.mxu0 %v2798_v30  ;;  %v2780_v56 = vld [vmem:[%s7711_s4 + $0x338] sm:$0xff]  ;;  %v2745_v36 = vld [vmem:[%s7711_s4 + $0x220] sm:$0xff] }
 0x33a   : > { %v2969_v51 = vadd.f32 %v2968_v38, %v2855_v53  ;;  %v3194_v44 = vpop.f32.mrf.mxu0  ;;  %3490 = vmatpush.msra.mxu3 %v2781_v20  ;;  %3267 = vmatpush.msra.mxu1 %v2746_v1  ;;  %v8037_v30 = vld [vmem:[#allocation113_spill] sm:$0xff] }
 0x33b   : > { %v2283_v15 = vpop.permute.xlu1 %2282  ;;  %v2858_v0 = vpop.f32.mrf.mxu1  ;;  %3380 = vmatpush.msra.mxu2 %v2762_v28  ;;  %3603 = vmatpush.msra.mxu0 %v2797_v52  ;;  %v2796_v1 = vld [vmem:[%s7711_s4 + $0x3b8] sm:$0xff]  ;;  %v8038_v28 = vld [vmem:[#allocation116_spill] sm:$0xff] }
 0x33c   : > { %v6952_v34 = vsel %vm2388_vm9, %v2384_v39, %v2283_v15  ;;  %v3081_v53 = vpop.f32.mrf.mxu3  ;;  %v2761_v39 = vld [vmem:[%s7711_s4 + $0x2a0] sm:$0xff]  ;;  %v2189_v15 = vpop.permute.xlu0 %2188  ;;  %3491 = vmatpush.msra.mxu3 %v2780_v56  ;;  %3268 = vmatpush.msra.mxu1 %v2745_v36  ;;  %v2760_v56 = vld [vmem:[%s7711_s4 + $0x298] sm:$0xff]  ;;  %v2795_v52 = vld [vmem:[%s7711_s4 + $0x3b0] sm:$0xff] }
 0x33d   : > { %v3082_v16 = vadd.f32 %v3081_v53, %v2969_v51  ;;  %3241 = vmatmul.f32.gmra.mxu0 %v2640_v24  ;;  %v2645_v20 = vmul.f32 %v6952_v34, %v8036_v19  ;;  %v2646_v38 = vmul.f32 %v6952_v34, %v8037_v30  ;;  %v2647_v51 = vmul.f32 %v6952_v34, %v8038_v28  ;;  %v2744_v24 = vld [vmem:[%s7711_s4 + $0x218] sm:$0xff] }
 0x33e   : > { %3381 = vmatpush.msra.mxu2 %v2761_v39  ;;  %3604 = vmatpush.msra.mxu0 %v2796_v1  ;;  %v8040_v1 = vld [vmem:[#allocation122_spill] sm:$0xff]  ;;  %v8053_v26 = vld [vmem:[#allocation29_spill] sm:$0xff] }
 0x33f   : > { %2905 = vmatmul.f32.gmra.mxu1 %v2645_v20  ;;  %3018 = vmatmul.f32.gmra.mxu2 %v2646_v38  ;;  %v6975_v53 = vadd.f32 %v3194_v44, %v3082_v16  ;;  %v2778_v20 = vld [vmem:[%s7711_s4 + $0x328] sm:$0xff]  ;;  %v2743_v44 = vld [vmem:[%s7711_s4 + $0x210] sm:$0xff]  ;;  %v2352_v16 = vsel %vm2322_vm8, %v6556_v45, %v2093_v18  ;;  %v2777_v45 = vld [vmem:[%s7711_s4 + $0x320] sm:$0xff] }
 0x340   : > { %3492 = vmatpush.msra.mxu3 %v2779_v27  ;;  %3269 = vmatpush.msra.mxu1 %v2744_v24  ;;  %v2385_v36 = vsel %vm2355_vm7, %v2352_v16, %v2189_v15  ;;  %v8041_v27 = vld [vmem:[#allocation25_spill] sm:$0xff]  ;;  %v2742_v16 = vld [vmem:[%s7711_s4 + $0x208] sm:$0xff] }
 0x341   : > { %8039 = vst [vmem:[#allocation59_spill] sm:$0xff] %v6975_v53  ;;  %v2971_v19 = vpop.f32.mrf.mxu2  ;;  %3131 = vmatmul.f32.gmra.mxu3 %v2647_v51  ;;  %v2648_v51 = vmul.f32 %v6952_v34, %v8040_v1  ;;  %3382 = vmatpush.msra.mxu2 %v2760_v56  ;;  %v8042_v56 = vld [vmem:[#allocation117_spill] sm:$0xff]  ;;  %v2793_v1 = vld [vmem:[%s7711_s4 + $0x3a0] sm:$0xff] }
 0x342   : > { %v2972_v30 = vadd.f32 %v2971_v19, %v2858_v0  ;;  %v3197_v38 = vpop.f32.mrf.mxu0  ;;  %3605 = vmatpush.msra.mxu0 %v2795_v52  ;;  %3493 = vmatpush.msra.mxu3 %v2778_v20  ;;  %v2794_v19 = vld [vmem:[%s7711_s4 + $0x3a8] sm:$0xff]  ;;  %v8057_v53 = vld [vmem:[#allocation30_spill] sm:$0xff] }
 0x343   : > { %v2285_v39 = vpop.permute.xlu1 %2284  ;;  %v2861_v28 = vpop.f32.mrf.mxu1  ;;  %3270 = vmatpush.msra.mxu1 %v2743_v44  ;;  %3383 = vmatpush.msra.mxu2 %v2759_v14  ;;  %v2758_v20 = vld [vmem:[%s7711_s4 + $0x288] sm:$0xff] }
 0x344   : > { %v7001_v0 = vsel %vm2388_vm9, %v2385_v36, %v2285_v39  ;;  %v3084_v18 = vpop.f32.mrf.mxu3  ;;  %3494 = vmatpush.msra.mxu3 %v2777_v45  ;;  %v2095_v44 = vpop.permute.xlu2 %2094  ;;  %v2776_v39 = vld [vmem:[%s7711_s4 + $0x318] sm:$0xff]  ;;  %3606 = vmatpush.msra.mxu0 %v2794_v19  ;;  %v2741_v45 = vld [vmem:[%s7711_s4 + $0x200] sm:$0xff] }
 0x345   : > { %v3085_v15 = vadd.f32 %v3084_v18, %v2972_v30  ;;  %3244 = vmatmul.f32.gmra.mxu0 %v2648_v51  ;;  %v2653_v24 = vmul.f32 %v7001_v0, %v8041_v27  ;;  %v2654_v52 = vmul.f32 %v7001_v0, %v8042_v56  ;;  %v8043_v30 = vld [vmem:[#allocation120_spill] sm:$0xff]  ;;  %v2191_v51 = vpop.permute.xlu0 %2190  ;;  %3271 = vmatpush.msra.mxu1 %v2742_v16  ;;  %v2757_v18 = vld [vmem:[%s7711_s4 + $0x280] sm:$0xff] }
 0x346   : > { %v2655_v36 = vmul.f32 %v7001_v0, %v8043_v30  ;;  %3384 = vmatpush.msra.mxu2 %v2758_v20  ;;  %3495 = vmatpush.msra.mxu3 %v2776_v39  ;;  %v8044_v30 = vld [vmem:[#allocation126_spill] sm:$0xff] }
 0x347   : > { %2908 = vmatmul.f32.gmra.mxu1 %v2653_v24  ;;  %3021 = vmatmul.f32.gmra.mxu2 %v2654_v52  ;;  %v7024_v14 = vadd.f32 %v3197_v38, %v3085_v15  ;;  %v2775_v24 = vld [vmem:[%s7711_s4 + $0x310] sm:$0xff]  ;;  %v2792_v38 = vld [vmem:[%s7711_s4 + $0x398] sm:$0xff]  ;;  %v2353_v15 = vsel %vm2322_vm8, %v6587_v7, %v2095_v44  ;;  %v2656_v20 = vmul.f32 %v7001_v0, %v8044_v30 }
 0x348   : > { %3607 = vmatpush.msra.mxu0 %v2793_v1  ;;  %v2386_v19 = vsel %vm2355_vm7, %v2353_v15, %v2191_v51  ;;  %3272 = vmatpush.msra.mxu1 %v2741_v45  ;;  %v2791_v7 = vld [vmem:[%s7711_s4 + $0x390] sm:$0xff]  ;;  %v8045_v51 = vld [vmem:[#allocation27_spill] sm:$0xff]  ;;  %v2773_v15 = vld [vmem:[%s7711_s4 + $0x300] sm:$0xff] }
 0x349   : > { %v2974_v27 = vpop.f32.mrf.mxu2  ;;  %3134 = vmatmul.f32.gmra.mxu3 %v2655_v36  ;;  %3385 = vmatpush.msra.mxu2 %v2757_v18  ;;  %v2774_v36 = vld [vmem:[%s7711_s4 + $0x308] sm:$0xff]  ;;  %v8046_v18 = vld [vmem:[#allocation121_spill] sm:$0xff] }
 0x34a   : > { %v2975_v56 = vadd.f32 %v2974_v27, %v2861_v28  ;;  %v3200_v52 = vpop.f32.mrf.mxu0  ;;  %3496 = vmatpush.msra.mxu3 %v2775_v24  ;;  %3608 = vmatpush.msra.mxu0 %v2792_v38  ;;  %v8047_v38 = vld [vmem:[#allocation124_spill] sm:$0xff] }
 0x34b   : > { %v2287_v16 = vpop.permute.xlu1 %2286 }
 0x34c   : > { %v7050_v28 = vsel %vm2388_vm9, %v2386_v19, %v2287_v16  ;;  %v2864_v44 = vpop.f32.mrf.mxu1  ;;  %v3087_v39 = vpop.f32.mrf.mxu3  ;;  %v2790_v19 = vld [vmem:[%s7711_s4 + $0x388] sm:$0xff]  ;;  %3497 = vmatpush.msra.mxu3 %v2774_v36  ;;  %3609 = vmatpush.msra.mxu0 %v2791_v7  ;;  %v2789_v16 = vld [vmem:[%s7711_s4 + $0x380] sm:$0xff] }
 0x34d   : > { %v3088_v1 = vadd.f32 %v3087_v39, %v2975_v56  ;;  %3247 = vmatmul.f32.gmra.mxu0 %v2656_v20  ;;  %v2661_v45 = vmul.f32 %v7050_v28, %v8045_v51  ;;  %v2662_v27 = vmul.f32 %v7050_v28, %v8046_v18  ;;  %v2097_v24 = vpop.permute.xlu2 %2096  ;;  %v2663_v56 = vmul.f32 %v7050_v28, %v8047_v38  ;;  %v2193_v20 = vpop.permute.xlu0 %2192 }
 0x34e   : > { %3498 = vmatpush.msra.mxu3 %v2773_v15  ;;  %3610 = vmatpush.msra.mxu0 %v2790_v19  ;;  %v2354_v36 = vsel %vm2322_vm8, %v6625_v55, %v2097_v24  ;;  %v8050_v24 = vld [vmem:[#allocation125_spill] sm:$0xff] }
 0x34f   : > { %2911 = vmatmul.f32.gmra.mxu1 %v2661_v45  ;;  %3024 = vmatmul.f32.gmra.mxu2 %v2662_v27  ;;  %v7067_v30 = vadd.f32 %v3200_v52, %v3088_v1  ;;  %v2387_v51 = vsel %vm2355_vm7, %v2354_v36, %v2193_v20  ;;  %v8048_v27 = vld [vmem:[#allocation130_spill] sm:$0xff] }
 0x350   : > { %3611 = vmatpush.msra.mxu0 %v2789_v16  ;;  %v2664_v38 = vmul.f32 %v7050_v28, %v8048_v27  ;;  %v8052_v27 = vld [vmem:[#allocation134_spill] sm:$0xff] }
 0x351   : > { %3137 = vmatmul.f32.gmra.mxu3 %v2663_v56  ;;  %v8049_v56 = vld [vmem:[#allocation28_spill] sm:$0xff] }
 0x352   : > { %v2977_v7 = vpop.f32.mrf.mxu2  ;;  %v3203_v39 = vpop.f32.mrf.mxu0 }
 0x353   : > { %v2978_v45 = vadd.f32 %v2977_v7, %v2864_v44  ;;  %v2289_v18 = vpop.permute.xlu1 %2288  ;;  %v8051_v44 = vld [vmem:[#allocation128_spill] sm:$0xff] }
 0x354   : > { %v7075_v52 = vsel %vm2388_vm9, %v2387_v51, %v2289_v18  ;;  %v2867_v1 = vpop.f32.mrf.mxu1  ;;  %v3090_v15 = vpop.f32.mrf.mxu3 }
 0x355   : > { %v3091_v19 = vadd.f32 %v3090_v15, %v2978_v45  ;;  %3250 = vmatmul.f32.gmra.mxu0 %v2664_v38  ;;  %v2669_v55 = vmul.f32 %v7075_v52, %v8049_v56  ;;  %v2670_v16 = vmul.f32 %v7075_v52, %v8050_v24  ;;  %v2671_v20 = vmul.f32 %v7075_v52, %v8051_v44  ;;  %v8054_v24 = vld [vmem:[#allocation129_spill] sm:$0xff] }
 0x356   : > { %v2672_v45 = vmul.f32 %v7075_v52, %v8052_v27  ;;  %v8056_v27 = vld [vmem:[#allocation137_spill] sm:$0xff] }
 0x357   : > { %2914 = vmatmul.f32.gmra.mxu1 %v2669_v55  ;;  %3027 = vmatmul.f32.gmra.mxu2 %v2670_v16  ;;  %v7083_v36 = vadd.f32 %v3203_v39, %v3091_v19  ;;  %v2425_v55 = vmul.f32 %v6126_v61, %v8053_v26  ;;  %v2426_v16 = vmul.f32 %v6126_v61, %v8054_v24  ;;  %v8055_v39 = vld [vmem:[#allocation132_spill] sm:$0xff]  ;;  %v8058_v24 = vld [vmem:[#allocation133_spill] sm:$0xff] }
 0x358   : > { %v2427_v19 = vmul.f32 %v6126_v61, %v8055_v39 }
 0x359   : > { %3140 = vmatmul.f32.gmra.mxu3 %v2671_v20 }
 0x35a   : > { %v2980_v7 = vpop.f32.mrf.mxu2  ;;  %v3206_v51 = vpop.f32.mrf.mxu0 }
 0x35b   : > { %v2981_v18 = vadd.f32 %v2980_v7, %v2867_v1 }
 0x35c   : > { %v2870_v38 = vpop.f32.mrf.mxu1  ;;  %v3093_v15 = vpop.f32.mrf.mxu3 }
 0x35d   : > { %v3094_v56 = vadd.f32 %v3093_v15, %v2981_v18  ;;  %3253 = vmatmul.f32.gmra.mxu0 %v2672_v45  ;;  %v2428_v18 = vmul.f32 %v6126_v61, %v8056_v27 }
 0x35f   : > { %3273 = vmatmul.f32.vlgmr.msra.gmra.mxu1 %v2425_v55  ;;  %3386 = vmatmul.f32.vlgmr.msra.gmra.mxu2 %v2426_v16  ;;  %v7093_v44 = vadd.f32 %v3206_v51, %v3094_v56  ;;  %v2433_v55 = vmul.f32 %v6176_v32, %v8057_v53  ;;  %v2434_v16 = vmul.f32 %v6176_v32, %v8058_v24  ;;  %v8059_v51 = vld [vmem:[#allocation135_spill] sm:$0xff]  ;;  %v8062_v24 = vld [vmem:[#allocation136_spill] sm:$0xff] }
 0x360   : > { %v2435_v56 = vmul.f32 %v6176_v32, %v8059_v51 }
 0x361   : > { %3499 = vmatmul.f32.vlgmr.msra.gmra.mxu3 %v2427_v19 }
 0x362   : > { %v2983_v1 = vpop.f32.mrf.mxu2  ;;  %v3209_v20 = vpop.f32.mrf.mxu0 }
 0x363   : > { %v2984_v7 = vadd.f32 %v2983_v1, %v2870_v38  ;;  %v8060_v1 = vld [vmem:[#allocation140_spill] sm:$0xff] }
 0x364   : > { %v2873_v45 = vpop.f32.mrf.mxu1  ;;  %v3096_v15 = vpop.f32.mrf.mxu3 }
 0x365   : > { %v3097_v26 = vadd.f32 %v3096_v15, %v2984_v7  ;;  %3612 = vmatmul.f32.vlgmr.msra.gmra.mxu0 %v2428_v18  ;;  %v2436_v7 = vmul.f32 %v6176_v32, %v8060_v1  ;;  %v8061_v15 = vld [vmem:[#allocation31_spill] sm:$0xff] }
 0x367   : > { %3276 = vmatmul.f32.gmra.mxu1 %v2433_v55  ;;  %3389 = vmatmul.f32.gmra.mxu2 %v2434_v16  ;;  %v7103_v39 = vadd.f32 %v3209_v20, %v3097_v26  ;;  %v2441_v55 = vmul.f32 %v6207_v5, %v8061_v15  ;;  %v2442_v16 = vmul.f32 %v6207_v5, %v8062_v24  ;;  %v8063_v20 = vld [vmem:[#allocation138_spill] sm:$0xff]  ;;  %v8065_v15 = vld [vmem:[#allocation32_spill] sm:$0xff]  ;;  %v8066_v24 = vld [vmem:[#allocation139_spill] sm:$0xff] }
 0x368   : > { %v2443_v26 = vmul.f32 %v6207_v5, %v8063_v20 }
 0x369   : > { %3502 = vmatmul.f32.gmra.mxu3 %v2435_v56 }
 0x36a   : > { %v2986_v38 = vpop.f32.mrf.mxu2  ;;  %v3212_v61 = vpop.f32.mrf.mxu0 }
 0x36b   : > { %v2987_v19 = vadd.f32 %v2986_v38, %v2873_v45  ;;  %v8064_v38 = vld [vmem:[#allocation143_spill] sm:$0xff] }
 0x36c   : > { %v2876_v27 = vpop.f32.mrf.mxu1  ;;  %v3099_v18 = vpop.f32.mrf.mxu3 }
 0x36d   : > { %v3100_v53 = vadd.f32 %v3099_v18, %v2987_v19  ;;  %3615 = vmatmul.f32.gmra.mxu0 %v2436_v7  ;;  %v2444_v19 = vmul.f32 %v6207_v5, %v8064_v38 }
 0x36f   : > { %3279 = vmatmul.f32.gmra.mxu1 %v2441_v55  ;;  %3392 = vmatmul.f32.gmra.mxu2 %v2442_v16  ;;  %v7113_v51 = vadd.f32 %v3212_v61, %v3100_v53  ;;  %v2449_v55 = vmul.f32 %v6238_v41, %v8065_v15  ;;  %v2450_v16 = vmul.f32 %v6238_v41, %v8066_v24  ;;  %v8067_v61 = vld [vmem:[#allocation141_spill] sm:$0xff]  ;;  %v8070_v24 = vld [vmem:[#allocation142_spill] sm:$0xff] }
 0x370   : > { %v2451_v53 = vmul.f32 %v6238_v41, %v8067_v61  ;;  %v8069_v15 = vld [vmem:[#allocation33_spill] sm:$0xff] }
 0x371   : > { %3505 = vmatmul.f32.gmra.mxu3 %v2443_v26 }
 0x372   : > { %v2989_v45 = vpop.f32.mrf.mxu2  ;;  %v3215_v32 = vpop.f32.mrf.mxu0 }
 0x373   : > { %v2990_v56 = vadd.f32 %v2989_v45, %v2876_v27  ;;  %v8068_v45 = vld [vmem:[#allocation146_spill] sm:$0xff] }
 0x374   : > { %v2879_v1 = vpop.f32.mrf.mxu1  ;;  %v3102_v7 = vpop.f32.mrf.mxu3 }
 0x375   : > { %v3103_v18 = vadd.f32 %v3102_v7, %v2990_v56  ;;  %3618 = vmatmul.f32.gmra.mxu0 %v2444_v19  ;;  %v2452_v56 = vmul.f32 %v6238_v41, %v8068_v45 }
 0x377   : > { %3282 = vmatmul.f32.gmra.mxu1 %v2449_v55  ;;  %3395 = vmatmul.f32.gmra.mxu2 %v2450_v16  ;;  %v7123_v20 = vadd.f32 %v3215_v32, %v3103_v18  ;;  %v2457_v55 = vmul.f32 %v6269_v25, %v8069_v15  ;;  %v2458_v16 = vmul.f32 %v6269_v25, %v8070_v24  ;;  %v8071_v32 = vld [vmem:[#allocation144_spill] sm:$0xff]  ;;  %v8074_v15 = vld [vmem:[#allocation34_spill] sm:$0xff]  ;;  %v8075_v24 = vld [vmem:[#allocation145_spill] sm:$0xff] }
 0x378   : > { %v2459_v18 = vmul.f32 %v6269_v25, %v8071_v32 }
 0x379   : > { %3508 = vmatmul.f32.gmra.mxu3 %v2451_v53 }
 0x37a   : > { %v2992_v27 = vpop.f32.mrf.mxu2  ;;  %v3218_v5 = vpop.f32.mrf.mxu0 }
 0x37b   : > { %v2993_v26 = vadd.f32 %v2992_v27, %v2879_v1  ;;  %v8073_v27 = vld [vmem:[#allocation149_spill] sm:$0xff] }
 0x37c   : > { %v2882_v38 = vpop.f32.mrf.mxu1  ;;  %v3105_v19 = vpop.f32.mrf.mxu3 }
 0x37d   : > { %v3106_v7 = vadd.f32 %v3105_v19, %v2993_v26  ;;  %3621 = vmatmul.f32.gmra.mxu0 %v2452_v56  ;;  %v2460_v26 = vmul.f32 %v6269_v25, %v8073_v27 }
 0x37f   : > { %3285 = vmatmul.f32.gmra.mxu1 %v2457_v55  ;;  %3398 = vmatmul.f32.gmra.mxu2 %v2458_v16  ;;  %v7133_v61 = vadd.f32 %v3218_v5, %v3106_v7  ;;  %v2465_v55 = vmul.f32 %v6300_v37, %v8074_v15  ;;  %v2466_v16 = vmul.f32 %v6300_v37, %v8075_v24  ;;  %v8076_v5 = vld [vmem:[#allocation147_spill] sm:$0xff]  ;;  %v8080_v24 = vld [vmem:[#allocation148_spill] sm:$0xff] }
 0x380   : > { %v2467_v7 = vmul.f32 %v6300_v37, %v8076_v5  ;;  %v8079_v15 = vld [vmem:[#allocation35_spill] sm:$0xff] }
 0x381   : > { %8072 = vst [vmem:[#allocation65_spill] sm:$0xff] %v7133_v61  ;;  %3511 = vmatmul.f32.gmra.mxu3 %v2459_v18 }
 0x382   : > { %v2995_v1 = vpop.f32.mrf.mxu2  ;;  %v3221_v41 = vpop.f32.mrf.mxu0 }
 0x383   : > { %v2996_v53 = vadd.f32 %v2995_v1, %v2882_v38  ;;  %v8078_v1 = vld [vmem:[#allocation152_spill] sm:$0xff] }
 0x384   : > { %v2885_v45 = vpop.f32.mrf.mxu1  ;;  %v3108_v56 = vpop.f32.mrf.mxu3 }
 0x385   : > { %v3109_v19 = vadd.f32 %v3108_v56, %v2996_v53  ;;  %3624 = vmatmul.f32.gmra.mxu0 %v2460_v26  ;;  %v2468_v53 = vmul.f32 %v6300_v37, %v8078_v1 }
 0x387   : > { %3288 = vmatmul.f32.gmra.mxu1 %v2465_v55  ;;  %3401 = vmatmul.f32.gmra.mxu2 %v2466_v16  ;;  %v7143_v32 = vadd.f32 %v3221_v41, %v3109_v19  ;;  %v2473_v55 = vmul.f32 %v6331_v17, %v8079_v15  ;;  %v2474_v16 = vmul.f32 %v6331_v17, %v8080_v24  ;;  %v8081_v41 = vld [vmem:[#allocation150_spill] sm:$0xff]  ;;  %v8084_v15 = vld [vmem:[#allocation36_spill] sm:$0xff]  ;;  %v8085_v24 = vld [vmem:[#allocation151_spill] sm:$0xff] }
 0x388   : > { %v2475_v19 = vmul.f32 %v6331_v17, %v8081_v41 }
 0x389   : > { %8077 = vst [vmem:[#allocation24_spill] sm:$0xff] %v7143_v32  ;;  %3514 = vmatmul.f32.gmra.mxu3 %v2467_v7 }
 0x38a   : > { %v2998_v38 = vpop.f32.mrf.mxu2  ;;  %v3224_v25 = vpop.f32.mrf.mxu0 }
 0x38b   : > { %v2999_v18 = vadd.f32 %v2998_v38, %v2885_v45  ;;  %v8083_v38 = vld [vmem:[#allocation155_spill] sm:$0xff] }
 0x38c   : > { %v2888_v27 = vpop.f32.mrf.mxu1  ;;  %v3111_v26 = vpop.f32.mrf.mxu3 }
 0x38d   : > { %v3112_v56 = vadd.f32 %v3111_v26, %v2999_v18  ;;  %3627 = vmatmul.f32.gmra.mxu0 %v2468_v53  ;;  %v2476_v18 = vmul.f32 %v6331_v17, %v8083_v38 }
 0x38f   : > { %3291 = vmatmul.f32.gmra.mxu1 %v2473_v55  ;;  %3404 = vmatmul.f32.gmra.mxu2 %v2474_v16  ;;  %v7153_v5 = vadd.f32 %v3224_v25, %v3112_v56  ;;  %v2481_v55 = vmul.f32 %v6362_v33, %v8084_v15  ;;  %v2482_v16 = vmul.f32 %v6362_v33, %v8085_v24  ;;  %v8086_v25 = vld [vmem:[#allocation153_spill] sm:$0xff]  ;;  %v8089_v15 = vld [vmem:[#allocation38_spill] sm:$0xff] }
 0x390   : > { %v2483_v56 = vmul.f32 %v6362_v33, %v8086_v25  ;;  %v8090_v24 = vld [vmem:[#allocation154_spill] sm:$0xff] }
 0x391   : > { %8082 = vst [vmem:[#allocation60_spill] sm:$0xff] %v7153_v5  ;;  %3517 = vmatmul.f32.gmra.mxu3 %v2475_v19  ;;  %v8192_v5 = vld [vmem:[#allocation127_spill] sm:$0xff] }
 0x392   : > { %v3001_v45 = vpop.f32.mrf.mxu2  ;;  %v3227_v37 = vpop.f32.mrf.mxu0 }
 0x393   : > { %v3002_v7 = vadd.f32 %v3001_v45, %v2888_v27  ;;  %v8088_v45 = vld [vmem:[#allocation158_spill] sm:$0xff] }
 0x394   : > { %v2891_v1 = vpop.f32.mrf.mxu1  ;;  %v3114_v53 = vpop.f32.mrf.mxu3 }
 0x395   : > { %v3115_v26 = vadd.f32 %v3114_v53, %v3002_v7  ;;  %3630 = vmatmul.f32.gmra.mxu0 %v2476_v18  ;;  %v2484_v7 = vmul.f32 %v6362_v33, %v8088_v45 }
 0x397   : > { %3294 = vmatmul.f32.gmra.mxu1 %v2481_v55  ;;  %3407 = vmatmul.f32.gmra.mxu2 %v2482_v16  ;;  %v7163_v41 = vadd.f32 %v3227_v37, %v3115_v26  ;;  %v2489_v55 = vmul.f32 %v6393_v13, %v8089_v15  ;;  %v2490_v16 = vmul.f32 %v6393_v13, %v8090_v24  ;;  %v8091_v37 = vld [vmem:[#allocation156_spill] sm:$0xff]  ;;  %v8094_v15 = vld [vmem:[#allocation42_spill] sm:$0xff]  ;;  %v8095_v24 = vld [vmem:[#allocation157_spill] sm:$0xff] }
 0x398   : > { %v2491_v26 = vmul.f32 %v6393_v13, %v8091_v37 }
 0x399   : > { %8087 = vst [vmem:[#allocation63_spill] sm:$0xff] %v7163_v41  ;;  %3520 = vmatmul.f32.gmra.mxu3 %v2483_v56 }
 0x39a   : > { %v3004_v27 = vpop.f32.mrf.mxu2  ;;  %v3230_v17 = vpop.f32.mrf.mxu0 }
 0x39b   : > { %v3005_v19 = vadd.f32 %v3004_v27, %v2891_v1  ;;  %v8093_v27 = vld [vmem:[#allocation161_spill] sm:$0xff] }
 0x39c   : > { %v2894_v38 = vpop.f32.mrf.mxu1  ;;  %v3117_v18 = vpop.f32.mrf.mxu3 }
 0x39d   : > { %v3118_v53 = vadd.f32 %v3117_v18, %v3005_v19  ;;  %3633 = vmatmul.f32.gmra.mxu0 %v2484_v7  ;;  %v2492_v19 = vmul.f32 %v6393_v13, %v8093_v27 }
 0x39f   : > { %3297 = vmatmul.f32.gmra.mxu1 %v2489_v55  ;;  %3410 = vmatmul.f32.gmra.mxu2 %v2490_v16  ;;  %v7173_v25 = vadd.f32 %v3230_v17, %v3118_v53  ;;  %v2497_v55 = vmul.f32 %v6424_v43, %v8094_v15  ;;  %v2498_v16 = vmul.f32 %v6424_v43, %v8095_v24  ;;  %v8096_v17 = vld [vmem:[#allocation159_spill] sm:$0xff]  ;;  %v8099_v15 = vld [vmem:[#allocation46_spill] sm:$0xff]  ;;  %v8100_v24 = vld [vmem:[#allocation160_spill] sm:$0xff] }
 0x3a0   : > { %v2499_v53 = vmul.f32 %v6424_v43, %v8096_v17 }
 0x3a1   : > { %8092 = vst [vmem:[#allocation70_spill] sm:$0xff] %v7173_v25  ;;  %3523 = vmatmul.f32.gmra.mxu3 %v2491_v26 }
 0x3a2   : > { %v3007_v1 = vpop.f32.mrf.mxu2  ;;  %v3233_v33 = vpop.f32.mrf.mxu0 }
 0x3a3   : > { %v3008_v56 = vadd.f32 %v3007_v1, %v2894_v38  ;;  %v8098_v1 = vld [vmem:[#allocation165_spill] sm:$0xff] }
 0x3a4   : > { %v2897_v45 = vpop.f32.mrf.mxu1  ;;  %v3120_v7 = vpop.f32.mrf.mxu3 }
 0x3a5   : > { %v3121_v18 = vadd.f32 %v3120_v7, %v3008_v56  ;;  %3636 = vmatmul.f32.gmra.mxu0 %v2492_v19  ;;  %v2500_v56 = vmul.f32 %v6424_v43, %v8098_v1 }
 0x3a7   : > { %3300 = vmatmul.f32.gmra.mxu1 %v2497_v55  ;;  %3413 = vmatmul.f32.gmra.mxu2 %v2498_v16  ;;  %v7183_v37 = vadd.f32 %v3233_v33, %v3121_v18  ;;  %v2505_v55 = vmul.f32 %v6455_v54, %v8099_v15  ;;  %v2506_v16 = vmul.f32 %v6455_v54, %v8100_v24  ;;  %v8101_v33 = vld [vmem:[#allocation163_spill] sm:$0xff] }
 0x3a8   : > { %v2507_v18 = vmul.f32 %v6455_v54, %v8101_v33 }
 0x3a9   : > { %8097 = vst [vmem:[#allocation8_spill] sm:$0xff] %v7183_v37  ;;  %3526 = vmatmul.f32.gmra.mxu3 %v2499_v53 }
 0x3aa   : > { %v3010_v38 = vpop.f32.mrf.mxu2  ;;  %v3236_v13 = vpop.f32.mrf.mxu0 }
 0x3ab   : > { %v3011_v26 = vadd.f32 %v3010_v38, %v2897_v45  ;;  %v8103_v38 = vld [vmem:[#allocation169_spill] sm:$0xff] }
 0x3ac   : > { %v2900_v27 = vpop.f32.mrf.mxu1  ;;  %v3123_v19 = vpop.f32.mrf.mxu3 }
 0x3ad   : > { %v3124_v7 = vadd.f32 %v3123_v19, %v3011_v26  ;;  %3639 = vmatmul.f32.gmra.mxu0 %v2500_v56  ;;  %v2508_v26 = vmul.f32 %v6455_v54, %v8103_v38  ;;  %v4550_v19 = vmov 1   ;;  %v8106_v54 = vld [vmem:[#allocation167_spill] sm:$0xff] }
 0x3ae   : > { %4447 = vset.pattern.permute.xlu1 %v4550_v19  ;;  %4446 = vset.pattern.permute.xlu0 %v4550_v19  ;;  %v2515_v33 = vmul.f32 %v6484_v29, %v8106_v54  ;;  %v4468_v54 = vld [vmem:[%s4612_s30 + $0xd8] sm:$0xff] }
 0x3af   : > { %3303 = vmatmul.f32.gmra.mxu1 %v2505_v55  ;;  %3416 = vmatmul.f32.gmra.mxu2 %v2506_v16  ;;  %v7193_v45 = vadd.f32 %v3236_v13, %v3124_v7  ;;  %v8104_v55 = vld [vmem:[#allocation50_spill] sm:$0xff]  ;;  %v8105_v7 = vld [vmem:[#allocation164_spill] sm:$0xff]  ;;  %v4464_v16 = vld [vmem:[%s4612_s30 + $0xe8] sm:$0xff] }
 0x3b0   : > { %v2513_v13 = vmul.f32 %v6484_v29, %v8104_v55  ;;  %v2514_v24 = vmul.f32 %v6484_v29, %v8105_v7  ;;  %1686 = vperm.xlu1 %4447, %v4464_v16   ;;  %4445 = vset.pattern.permute.xlu2 %v4550_v19 }
 0x3b1   : > { %8102 = vst [vmem:[#allocation64_spill] sm:$0xff] %v7193_v45  ;;  %3529 = vmatmul.f32.gmra.mxu3 %v2507_v18 }
 0x3b2   : > { %v3013_v43 = vpop.f32.mrf.mxu2  ;;  %v3239_v17 = vpop.f32.mrf.mxu0 }
 0x3b3   : > { %v3014_v53 = vadd.f32 %v3013_v43, %v2900_v27  ;;  %v4465_v27 = vld [vmem:[%s4612_s30 + $0xf0] sm:$0xff]  ;;  %v4466_v43 = vld [vmem:[%s4612_s30 + $0xf8] sm:$0xff] }
 0x3b4   : > { %v2903_v1 = vpop.f32.mrf.mxu1  ;;  %v3126_v56 = vpop.f32.mrf.mxu3  ;;  %1689 = vperm.xlu0 %4446, %v4465_v27   ;;  %1692 = vperm.xlu2 %4445, %v4466_v43   ;;  %v4467_v27 = vld [vmem:[%s4612_s30 + $0xe0] sm:$0xff]  ;;  %v4469_v43 = vld [vmem:[%s4612_s30 + $0x78] sm:$0xff] }
 0x3b5   : > { %v3127_v15 = vadd.f32 %v3126_v56, %v3014_v53  ;;  %3642 = vmatmul.f32.gmra.mxu0 %v2508_v26  ;;  %v8108_v56 = vld [vmem:[#allocation173_spill] sm:$0xff] }
 0x3b6   : > { %v2516_v55 = vmul.f32 %v6484_v29, %v8108_v56 }
 0x3b7   : > { %3306 = vmatmul.f32.gmra.mxu1 %v2513_v13  ;;  %3419 = vmatmul.f32.gmra.mxu2 %v2514_v24  ;;  %v7205_v18 = vadd.f32 %v3239_v17, %v3127_v15  ;;  %v8109_v24 = vld [vmem:[#allocation54_spill] sm:$0xff]  ;;  %v8110_v17 = vld [vmem:[#allocation168_spill] sm:$0xff] }
 0x3b8   : > { %v2521_v16 = vmul.f32 %v6515_v60, %v8109_v24  ;;  %v2522_v15 = vmul.f32 %v6515_v60, %v8110_v17  ;;  %1683 = vperm.xlu1 %4447, %v4467_v27  }
 0x3b9   : > { %8107 = vst [vmem:[#allocation67_spill] sm:$0xff] %v7205_v18  ;;  %3532 = vmatmul.f32.gmra.mxu3 %v2515_v33 }
 0x3ba   : > { %v3016_v53 = vpop.f32.mrf.mxu2  ;;  %v3242_v38 = vpop.f32.mrf.mxu0 }
 0x3bb   : > { %v3017_v26 = vadd.f32 %v3016_v53, %v2903_v1  ;;  %v8111_v1 = vld [vmem:[#allocation171_spill] sm:$0xff] }
 0x3bc   : > { %v2906_v19 = vpop.f32.mrf.mxu1  ;;  %v3129_v13 = vpop.f32.mrf.mxu3  ;;  %1680 = vperm.xlu0 %4446, %v4468_v54   ;;  %v2523_v29 = vmul.f32 %v6515_v60, %v8111_v1  ;;  %1644 = vperm.xlu2 %4445, %v4469_v43   ;;  %v4470_v54 = vld [vmem:[%s4612_s30 + $0x68] sm:$0xff]  ;;  %v4471_v1 = vld [vmem:[%s4612_s30 + $0x60] sm:$0xff]  ;;  %v4472_v43 = vld [vmem:[%s4612_s30 + $0x70] sm:$0xff] }
 0x3bd   : > { %v3130_v7 = vadd.f32 %v3129_v13, %v3017_v26  ;;  %3645 = vmatmul.f32.gmra.mxu0 %v2516_v55  ;;  %v8113_v55 = vld [vmem:[#allocation177_spill] sm:$0xff] }
 0x3be   : > { %v2524_v13 = vmul.f32 %v6515_v60, %v8113_v55 }
 0x3bf   : > { %3309 = vmatmul.f32.gmra.mxu1 %v2521_v16  ;;  %3422 = vmatmul.f32.gmra.mxu2 %v2522_v15  ;;  %v7218_v33 = vadd.f32 %v3242_v38, %v3130_v7  ;;  %v8114_v15 = vld [vmem:[#allocation58_spill] sm:$0xff]  ;;  %v8115_v38 = vld [vmem:[#allocation172_spill] sm:$0xff] }
 0x3c0   : > { %v2529_v27 = vmul.f32 %v6544_v58, %v8114_v15  ;;  %v2530_v7 = vmul.f32 %v6544_v58, %v8115_v38  ;;  %1638 = vperm.xlu1 %4447, %v4470_v54  }
 0x3c1   : > { %8112 = vst [vmem:[#allocation74_spill] sm:$0xff] %v7218_v33  ;;  %3535 = vmatmul.f32.gmra.mxu3 %v2523_v29 }
 0x3c2   : > { %v3019_v53 = vpop.f32.mrf.mxu2  ;;  %v3245_v26 = vpop.f32.mrf.mxu0 }
 0x3c3   : > { %v3020_v56 = vadd.f32 %v3019_v53, %v2906_v19  ;;  %v8116_v19 = vld [vmem:[#allocation175_spill] sm:$0xff] }
 0x3c4   : > { %v2909_v24 = vpop.f32.mrf.mxu1  ;;  %v3132_v16 = vpop.f32.mrf.mxu3  ;;  %1635 = vperm.xlu0 %4446, %v4471_v1   ;;  %v2531_v60 = vmul.f32 %v6544_v58, %v8116_v19  ;;  %1641 = vperm.xlu2 %4445, %v4472_v43   ;;  %v4473_v1 = vld [vmem:[%s4612_s30 + $0xc8] sm:$0xff]  ;;  %v4474_v19 = vld [vmem:[%s4612_s30 + $0xc0] sm:$0xff]  ;;  %v4475_v43 = vld [vmem:[%s4612_s30 + $0xd0] sm:$0xff] }
 0x3c5   : > { %v3133_v17 = vadd.f32 %v3132_v16, %v3020_v56  ;;  %3648 = vmatmul.f32.gmra.mxu0 %v2524_v13  ;;  %v8118_v13 = vld [vmem:[#allocation181_spill] sm:$0xff] }
 0x3c6   : > { %v2532_v16 = vmul.f32 %v6544_v58, %v8118_v13 }
 0x3c7   : > { %3312 = vmatmul.f32.gmra.mxu1 %v2529_v27  ;;  %3425 = vmatmul.f32.gmra.mxu2 %v2530_v7  ;;  %v7231_v29 = vadd.f32 %v3245_v26, %v3133_v17  ;;  %v8119_v7 = vld [vmem:[#allocation62_spill] sm:$0xff]  ;;  %v8120_v26 = vld [vmem:[#allocation176_spill] sm:$0xff] }
 0x3c8   : > { %v2537_v54 = vmul.f32 %v6575_v62, %v8119_v7  ;;  %v2538_v17 = vmul.f32 %v6575_v62, %v8120_v26  ;;  %1674 = vperm.xlu1 %4447, %v4473_v1   ;;  %v8123_v26 = vld [vmem:[#allocation66_spill] sm:$0xff]  ;;  %v4476_v1 = vld [vmem:[%s4612_s30 + $0x50] sm:$0xff] }
 0x3c9   : > { %8117 = vst [vmem:[#allocation11_spill] sm:$0xff] %v7231_v29  ;;  %3538 = vmatmul.f32.gmra.mxu3 %v2531_v60 }
 0x3ca   : > { %v3022_v53 = vpop.f32.mrf.mxu2  ;;  %v3248_v56 = vpop.f32.mrf.mxu0 }
 0x3cb   : > { %v3023_v55 = vadd.f32 %v3022_v53, %v2909_v24  ;;  %v8121_v24 = vld [vmem:[#allocation179_spill] sm:$0xff] }
 0x3cc   : > { %v2912_v15 = vpop.f32.mrf.mxu1  ;;  %v3135_v27 = vpop.f32.mrf.mxu3  ;;  %1671 = vperm.xlu0 %4446, %v4474_v19   ;;  %v2539_v58 = vmul.f32 %v6575_v62, %v8121_v24  ;;  %1677 = vperm.xlu2 %4445, %v4475_v43   ;;  %v4477_v19 = vld [vmem:[%s4612_s30 + $0x48] sm:$0xff]  ;;  %v4478_v24 = vld [vmem:[%s4612_s30 + $0x58] sm:$0xff] }
 0x3cd   : > { %v3136_v38 = vadd.f32 %v3135_v27, %v3023_v55  ;;  %3651 = vmatmul.f32.gmra.mxu0 %v2532_v16  ;;  %v2540_v16 = vmul.f32 %v6575_v62, %v6123_v4 }
 0x3cf   : > { %3315 = vmatmul.f32.gmra.mxu1 %v2537_v54  ;;  %3428 = vmatmul.f32.gmra.mxu2 %v2538_v17  ;;  %v7244_v60 = vadd.f32 %v3248_v56, %v3136_v38  ;;  %v2545_v17 = vmul.f32 %v6606_v8, %v8123_v26  ;;  %v8124_v56 = vld [vmem:[#allocation180_spill] sm:$0xff] }
 0x3d0   : > { %v2546_v38 = vmul.f32 %v6606_v8, %v8124_v56  ;;  %1629 = vperm.xlu1 %4447, %v4476_v1   ;;  %v4480_v1 = vld [vmem:[%s4612_s30 + $0xa8] sm:$0xff] }
 0x3d1   : > { %8122 = vst [vmem:[#allocation69_spill] sm:$0xff] %v7244_v60  ;;  %3541 = vmatmul.f32.gmra.mxu3 %v2539_v58 }
 0x3d2   : > { %v3025_v53 = vpop.f32.mrf.mxu2  ;;  %v3251_v55 = vpop.f32.mrf.mxu0 }
 0x3d3   : > { %v3026_v13 = vadd.f32 %v3025_v53, %v2912_v15  ;;  %v8125_v15 = vld [vmem:[#allocation182_spill] sm:$0xff] }
 0x3d4   : > { %v2915_v27 = vpop.f32.mrf.mxu1  ;;  %v3138_v7 = vpop.f32.mrf.mxu3  ;;  %1626 = vperm.xlu0 %4446, %v4477_v19   ;;  %v2547_v4 = vmul.f32 %v6606_v8, %v8125_v15  ;;  %1632 = vperm.xlu2 %4445, %v4478_v24  }
 0x3d5   : > { %v3139_v54 = vadd.f32 %v3138_v7, %v3026_v13  ;;  %3654 = vmatmul.f32.gmra.mxu0 %v2540_v16  ;;  %v2548_v13 = vmul.f32 %v6606_v8, %v6152_v23  ;;  %v4481_v8 = vld [vmem:[%s4612_s30 + $0xb8] sm:$0xff] }
 0x3d7   : > { %3318 = vmatmul.f32.gmra.mxu1 %v2545_v17  ;;  %3431 = vmatmul.f32.gmra.mxu2 %v2546_v38  ;;  %v7257_v62 = vadd.f32 %v3251_v55, %v3139_v54  ;;  %v8127_v17 = vld [vmem:[#allocation71_spill] sm:$0xff]  ;;  %v4479_v38 = vld [vmem:[%s4612_s30 + $0xb0] sm:$0xff] }
 0x3d8   : > { %v2553_v56 = vmul.f32 %v6635_v50, %v8127_v17  ;;  %v8128_v55 = vld [vmem:[#allocation183_spill] sm:$0xff]  ;;  %1665 = vperm.xlu1 %4447, %v4479_v38   ;;  %v4482_v17 = vld [vmem:[%s4612_s30 + $0x38] sm:$0xff]  ;;  %v2564_v38 = vmul.f32 %v6656_v42, %v6211_v11  ;;  %v2571_v11 = vmul.f32 %v6673_v59, %v6188_v48 }
 0x3d9   : > { %8126 = vst [vmem:[#allocation72_spill] sm:$0xff] %v7257_v62  ;;  %3544 = vmatmul.f32.gmra.mxu3 %v2547_v4  ;;  %v2554_v54 = vmul.f32 %v6635_v50, %v8128_v55 }
 0x3da   : > { %v3028_v58 = vpop.f32.mrf.mxu2  ;;  %v3254_v43 = vpop.f32.mrf.mxu0 }
 0x3db   : > { %v3029_v53 = vadd.f32 %v3028_v58, %v2915_v27  ;;  %v2555_v27 = vmul.f32 %v6635_v50, %v6134_v35  ;;  %v2556_v58 = vmul.f32 %v6635_v50, %v6180_v49  ;;  %v8130_v35 = vld [vmem:[#allocation75_spill] sm:$0xff]  ;;  %v2563_v49 = vmul.f32 %v6656_v42, %v6157_v3  ;;  %v4484_v50 = vld [vmem:[%s4612_s30 + $0x40] sm:$0xff] }
 0x3dc   : > { %v3274_v16 = vpop.f32.mrf.mxu1  ;;  %v3141_v7 = vpop.f32.mrf.mxu3  ;;  %1662 = vperm.xlu0 %4446, %v4480_v1   ;;  %1668 = vperm.xlu2 %4445, %v4481_v8  }
 0x3dd   : > { %v3142_v26 = vadd.f32 %v3141_v7, %v3029_v53  ;;  %3657 = vmatmul.f32.gmra.mxu0 %v2548_v13  ;;  %v3275_v19 = vadd.f32 %v3274_v16, %v6664_v2  ;;  %v4483_v2 = vld [vmem:[%s4612_s30 + $0x30] sm:$0xff] }
 0x3df   : > { %3321 = vmatmul.f32.gmra.mxu1 %v2553_v56  ;;  %3434 = vmatmul.f32.gmra.mxu2 %v2554_v54  ;;  %v7270_v23 = vadd.f32 %v3254_v43, %v3142_v26  ;;  %v2561_v43 = vmul.f32 %v6656_v42, %v8130_v35  ;;  %v2562_v26 = vmul.f32 %v6656_v42, %v6143_v9  ;;  %v4487_v42 = vld [vmem:[%s4612_s30 + $0xa0] sm:$0xff]  ;;  %v8135_v35 = vld [vmem:[#allocation187_spill] sm:$0xff] }
 0x3e0   : > { %1620 = vperm.xlu1 %4447, %v4482_v17  }
 0x3e1   : > { %8129 = vst [vmem:[#allocation78_spill] sm:$0xff] %v7270_v23  ;;  %3547 = vmatmul.f32.gmra.mxu3 %v2555_v27  ;;  %v8190_v23 = vld [vmem:[#allocation170_spill] sm:$0xff] }
 0x3e2   : > { %v3387_v15 = vpop.f32.mrf.mxu2  ;;  %v3613_v4 = vpop.f32.mrf.mxu0  ;;  %v2659_v62 = vmul.f32 %v7001_v0, %v8190_v23 }
 0x3e3   : > { %v3388_v24 = vadd.f32 %v3387_v15, %v3275_v19  ;;  %v8132_v19 = vld [vmem:[#allocation79_spill] sm:$0xff]  ;;  %v2570_v15 = vmul.f32 %v6673_v59, %v6165_v12 }
 0x3e4   : > { %v3277_v53 = vpop.f32.mrf.mxu1  ;;  %v3500_v13 = vpop.f32.mrf.mxu3  ;;  %1617 = vperm.xlu0 %4446, %v4483_v2   ;;  %1623 = vperm.xlu2 %4445, %v4484_v50   ;;  %v2569_v3 = vmul.f32 %v6673_v59, %v8132_v19  ;;  %v8137_v50 = vld [vmem:[#allocation184_spill] sm:$0xff] }
 0x3e5   : > { %v3501_v7 = vadd.f32 %v3500_v13, %v3388_v24  ;;  %3660 = vmatmul.f32.gmra.mxu0 %v2556_v58  ;;  %v3278_v56 = vadd.f32 %v3277_v53, %v6681_v40  ;;  %v4486_v40 = vld [vmem:[%s4612_s30 + $0x90] sm:$0xff]  ;;  %v8134_v58 = vld [vmem:[#allocation51_spill] sm:$0xff] }
 0x3e7   : > { %v7282_v16 = vadd.f32 %v3613_v4, %v3501_v7  ;;  %3324 = vmatmul.f32.gmra.mxu1 %v2561_v43  ;;  %3437 = vmatmul.f32.gmra.mxu2 %v2562_v26  ;;  %v4485_v4 = vld [vmem:[%s4612_s30 + $0x98] sm:$0xff]  ;;  %v2572_v43 = vmul.f32 %v6673_v59, %v8135_v35  ;;  %v4491_v35 = vld [vmem:[%s4612_s30 + $0x80] sm:$0xff] }
 0x3e8   : > { %1656 = vperm.xlu1 %4447, %v4485_v4   ;;  %v8141_v4 = vld [vmem:[#allocation190_spill] sm:$0xff] }
 0x3e9   : > { %8131 = vst [vmem:[#allocation14_spill] sm:$0xff] %v7282_v16  ;;  %3550 = vmatmul.f32.gmra.mxu3 %v2563_v49  ;;  %v8136_v49 = vld [vmem:[#allocation83_spill] sm:$0xff] }
 0x3ea   : > { %v3390_v55 = vpop.f32.mrf.mxu2  ;;  %v3616_v9 = vpop.f32.mrf.mxu0  ;;  %v2577_v48 = vmul.f32 %v6690_v57, %v8136_v49 }
 0x3eb   : > { %v3391_v54 = vadd.f32 %v3390_v55, %v3278_v56  ;;  %v2578_v56 = vmul.f32 %v6690_v57, %v8137_v50  ;;  %v4488_v55 = vld [vmem:[%s4612_s30 + $0x20] sm:$0xff] }
 0x3ec   : > { %v3280_v1 = vpop.f32.mrf.mxu1  ;;  %v3503_v27 = vpop.f32.mrf.mxu3  ;;  %1653 = vperm.xlu0 %4446, %v4486_v40   ;;  %1659 = vperm.xlu2 %4445, %v4487_v42   ;;  %v2580_v40 = vmul.f32 %v6690_v57, %v8141_v4  ;;  %v8150_v4 = vld [vmem:[#allocation191_spill] sm:$0xff] }
 0x3ed   : > { %v3504_v8 = vadd.f32 %v3503_v27, %v3391_v54  ;;  %3663 = vmatmul.f32.gmra.mxu0 %v2564_v38  ;;  %v3281_v53 = vadd.f32 %v3280_v1, %v8134_v58  ;;  %v8139_v38 = vld [vmem:[#allocation185_spill] sm:$0xff]  ;;  %v4490_v1 = vld [vmem:[%s4612_s30 + $0x28] sm:$0xff]  ;;  %v8140_v27 = vld [vmem:[#allocation178_spill] sm:$0xff] }
 0x3ee   : > { %v2579_v59 = vmul.f32 %v6690_v57, %v8139_v38 }
 0x3ef   : > { %v7296_v24 = vadd.f32 %v3616_v9, %v3504_v8  ;;  %3327 = vmatmul.f32.gmra.mxu1 %v2569_v3  ;;  %3440 = vmatmul.f32.gmra.mxu2 %v2570_v15  ;;  %v4489_v9 = vld [vmem:[%s4612_s30 + $0x18] sm:$0xff] }
 0x3f0   : > { %1611 = vperm.xlu1 %4447, %v4488_v55   ;;  %v8146_v55 = vld [vmem:[#allocation193_spill] sm:$0xff] }
 0x3f1   : > { %8133 = vst [vmem:[#allocation73_spill] sm:$0xff] %v7296_v24  ;;  %3553 = vmatmul.f32.gmra.mxu3 %v2571_v11 }
 0x3f2   : > { %v3393_v13 = vpop.f32.mrf.mxu2  ;;  %v3619_v12 = vpop.f32.mrf.mxu0 }
 0x3f3   : > { %v3394_v7 = vadd.f32 %v3393_v13, %v3281_v53  ;;  %v8142_v53 = vld [vmem:[#allocation87_spill] sm:$0xff] }
 0x3f4   : > { %v3283_v26 = vpop.f32.mrf.mxu1  ;;  %v3506_v17 = vpop.f32.mrf.mxu3  ;;  %1608 = vperm.xlu0 %4446, %v4489_v9   ;;  %1614 = vperm.xlu2 %4445, %v4490_v1   ;;  %v2585_v13 = vmul.f32 %v6707_v22, %v8142_v53  ;;  %v2588_v9 = vmul.f32 %v6707_v22, %v8146_v55 }
 0x3f5   : > { %v3507_v2 = vadd.f32 %v3506_v17, %v3394_v7  ;;  %3666 = vmatmul.f32.gmra.mxu0 %v2572_v43  ;;  %v3284_v8 = vadd.f32 %v3283_v26, %v8140_v27  ;;  %v4492_v43 = vld [vmem:[%s4612_s30 + $0x8] sm:$0xff]  ;;  %v8145_v17 = vld [vmem:[#allocation188_spill] sm:$0xff] }
 0x3f6   : > { %v2587_v57 = vmul.f32 %v6707_v22, %v8145_v17  ;;  %v8147_v27 = vld [vmem:[#allocation91_spill] sm:$0xff] }
 0x3f7   : > { %v7310_v54 = vadd.f32 %v3619_v12, %v3507_v2  ;;  %3330 = vmatmul.f32.gmra.mxu1 %v2577_v48  ;;  %3443 = vmatmul.f32.gmra.mxu2 %v2578_v56  ;;  %v8143_v12 = vld [vmem:[#allocation186_spill] sm:$0xff]  ;;  %v4493_v2 = vld [vmem:[%s4612_s30 + $0x88] sm:$0xff] }
 0x3f8   : > { %v2586_v7 = vmul.f32 %v6707_v22, %v8143_v12  ;;  %1647 = vperm.xlu1 %4447, %v4491_v35   ;;  %v4495_v22 = vld [vmem:[%s4612_s30 + $0x10] sm:$0xff] }
 0x3f9   : > { %8138 = vst [vmem:[#allocation76_spill] sm:$0xff] %v7310_v54  ;;  %3556 = vmatmul.f32.gmra.mxu3 %v2579_v59  ;;  %v8152_v12 = vld [vmem:[#allocation196_spill] sm:$0xff]  ;;  %v8195_v54 = vld [vmem:[#allocation53_spill] sm:$0xff] }
 0x3fa   : > { %v3396_v19 = vpop.f32.mrf.mxu2  ;;  %v3622_v3 = vpop.f32.mrf.mxu0 }
 0x3fb   : > { %v3397_v15 = vadd.f32 %v3396_v19, %v3284_v8  ;;  %v2593_v8 = vmul.f32 %v6723_v6, %v8147_v27  ;;  %v8148_v19 = vld [vmem:[#allocation189_spill] sm:$0xff]  ;;  %v8158_v27 = vld [vmem:[#allocation199_spill] sm:$0xff] }
 0x3fc   : > { %v3286_v11 = vpop.f32.mrf.mxu1  ;;  %v3509_v42 = vpop.f32.mrf.mxu3  ;;  %1602 = vperm.xlu0 %4446, %v4492_v43   ;;  %1650 = vperm.xlu2 %4445, %v4493_v2  }
 0x3fd   : > { %v3510_v58 = vadd.f32 %v3509_v42, %v3397_v15  ;;  %3669 = vmatmul.f32.gmra.mxu0 %v2580_v40  ;;  %v3287_v49 = vadd.f32 %v3286_v11, %v6731_v21  ;;  %v4494_v15 = vld [vmem:[%s4612_s30] sm:$0xff]  ;;  %v2595_v40 = vmul.f32 %v6723_v6, %v8150_v4  ;;  %v8151_v11 = vld [vmem:[#allocation57_spill] sm:$0xff]  ;;  %v8159_v4 = vld [vmem:[#allocation99_spill] sm:$0xff] }
 0x3ff   : > { %v7324_v26 = vadd.f32 %v3622_v3, %v3510_v58  ;;  %3333 = vmatmul.f32.gmra.mxu1 %v2585_v13  ;;  %3446 = vmatmul.f32.gmra.mxu2 %v2586_v7  ;;  %v2594_v3 = vmul.f32 %v6723_v6, %v8148_v19  ;;  %v2596_v7 = vmul.f32 %v6723_v6, %v8152_v12 }
 0x400   : > { %1599 = vperm.xlu1 %4447, %v4494_v15  }
 0x401   : > { %8144 = vst [vmem:[#allocation82_spill] sm:$0xff] %v7324_v26  ;;  %3559 = vmatmul.f32.gmra.mxu3 %v2587_v57  ;;  %v8153_v57 = vld [vmem:[#allocation95_spill] sm:$0xff] }
 0x402   : > { %v3399_v48 = vpop.f32.mrf.mxu2  ;;  %v3625_v50 = vpop.f32.mrf.mxu0  ;;  %v2601_v2 = vmul.f32 %v6739_v10, %v8153_v57 }
 0x403   : > { %v3400_v56 = vadd.f32 %v3399_v48, %v3287_v49  ;;  %v8154_v49 = vld [vmem:[#allocation192_spill] sm:$0xff] }
 0x404   : > { %v3289_v38 = vpop.f32.mrf.mxu1  ;;  %v3512_v59 = vpop.f32.mrf.mxu3  ;;  %1605 = vperm.xlu2 %4445, %v4495_v22   ;;  %v2602_v48 = vmul.f32 %v6739_v10, %v8154_v49  ;;  %v8160_v22 = vld [vmem:[#allocation195_spill] sm:$0xff] }
 0x405   : > { %v3513_v1 = vadd.f32 %v3512_v59, %v3400_v56  ;;  %3672 = vmatmul.f32.gmra.mxu0 %v2588_v9  ;;  %v3290_v42 = vadd.f32 %v3289_v38, %v8151_v11  ;;  %v8156_v56 = vld [vmem:[#allocation194_spill] sm:$0xff]  ;;  %v2610_v11 = vmul.f32 %v6755_v63, %v8160_v22 }
 0x406   : > { %v2603_v55 = vmul.f32 %v6739_v10, %v8156_v56  ;;  %v8157_v9 = vld [vmem:[#allocation18_spill] sm:$0xff]  ;;  %v8166_v56 = vld [vmem:[#allocation52_spill] sm:$0xff] }
 0x407   : > { %v7337_v21 = vadd.f32 %v3625_v50, %v3513_v1  ;;  %3336 = vmatmul.f32.gmra.mxu1 %v2593_v8  ;;  %3449 = vmatmul.f32.gmra.mxu2 %v2594_v3  ;;  %v2604_v8 = vmul.f32 %v6739_v10, %v8158_v27  ;;  %v8170_v27 = vld [vmem:[#allocation61_spill] sm:$0xff] }
 0x409   : > { %8149 = vst [vmem:[#allocation17_spill] sm:$0xff] %v7337_v21  ;;  %3562 = vmatmul.f32.gmra.mxu3 %v2595_v40  ;;  %v2609_v40 = vmul.f32 %v6755_v63, %v8159_v4 }
 0x40a   : > { %v3402_v58 = vpop.f32.mrf.mxu2  ;;  %v3628_v53 = vpop.f32.mrf.mxu0 }
 0x40b   : > { %v3403_v13 = vadd.f32 %v3402_v58, %v3290_v42  ;;  %v8162_v58 = vld [vmem:[#allocation197_spill] sm:$0xff] }
 0x40c   : > { %v3292_v35 = vpop.f32.mrf.mxu1  ;;  %v3515_v43 = vpop.f32.mrf.mxu3 }
 0x40d   : > { %v3516_v17 = vadd.f32 %v3515_v43, %v3403_v13  ;;  %3675 = vmatmul.f32.gmra.mxu0 %v2596_v7  ;;  %v3293_v38 = vadd.f32 %v3292_v35, %v8157_v9  ;;  %v8163_v13 = vld [vmem:[#allocation55_spill] sm:$0xff]  ;;  %v8164_v43 = vld [vmem:[#allocation202_spill] sm:$0xff] }
 0x40e   : > { %v8167_v9 = vld [vmem:[#allocation198_spill] sm:$0xff] }
 0x40f   : > { %v7349_v50 = vadd.f32 %v3628_v53, %v3516_v17  ;;  %3339 = vmatmul.f32.gmra.mxu1 %v2601_v2  ;;  %3452 = vmatmul.f32.gmra.mxu2 %v2602_v48  ;;  %v2611_v53 = vmul.f32 %v6755_v63, %v8162_v58  ;;  %v2612_v17 = vmul.f32 %v6755_v63, %v8164_v43  ;;  %v8165_v48 = vld [vmem:[#allocation103_spill] sm:$0xff] }
 0x411   : > { %8155 = vst [vmem:[#allocation77_spill] sm:$0xff] %v7349_v50  ;;  %3565 = vmatmul.f32.gmra.mxu3 %v2603_v55  ;;  %v2617_v55 = vmul.f32 %v8166_v56, %v8165_v48 }
 0x412   : > { %v3405_v6 = vpop.f32.mrf.mxu2  ;;  %v3631_v59 = vpop.f32.mrf.mxu0 }
 0x413   : > { %v3406_v1 = vadd.f32 %v3405_v6, %v3293_v38  ;;  %v2618_v38 = vmul.f32 %v8166_v56, %v8167_v9 }
 0x414   : > { %v3295_v19 = vpop.f32.mrf.mxu1  ;;  %v3518_v3 = vpop.f32.mrf.mxu3 }
 0x415   : > { %v3519_v15 = vadd.f32 %v3518_v3, %v3406_v1  ;;  %3678 = vmatmul.f32.gmra.mxu0 %v2604_v8  ;;  %v3296_v12 = vadd.f32 %v3295_v19, %v8163_v13 }
 0x417   : > { %v7360_v42 = vadd.f32 %v3631_v59, %v3519_v15  ;;  %3342 = vmatmul.f32.gmra.mxu1 %v2609_v40  ;;  %3455 = vmatmul.f32.gmra.mxu2 %v2610_v11  ;;  %v8169_v59 = vld [vmem:[#allocation200_spill] sm:$0xff]  ;;  %v8171_v15 = vld [vmem:[#allocation162_spill] sm:$0xff]  ;;  %v7378_v40 = vpop.permute.xlu2 %1692 }
 0x418   : > { %v2619_v1 = vmul.f32 %v8166_v56, %v8169_v59  ;;  %v2620_v4 = vmul.f32 %v8166_v56, %v8171_v15 }
 0x419   : > { %8161 = vst [vmem:[#allocation80_spill] sm:$0xff] %v7360_v42  ;;  %3568 = vmatmul.f32.gmra.mxu3 %v2611_v53  ;;  %v8172_v53 = vld [vmem:[#allocation107_spill] sm:$0xff] }
 0x41a   : > { %v3408_v10 = vpop.f32.mrf.mxu2  ;;  %v3634_v7 = vpop.f32.mrf.mxu0  ;;  %v2625_v13 = vmul.f32 %v6799_v46, %v8172_v53 }
 0x41b   : > { %v3409_v35 = vadd.f32 %v3408_v10, %v3296_v12  ;;  %v8173_v12 = vld [vmem:[#allocation201_spill] sm:$0xff] }
 0x41c   : > { %v3298_v57 = vpop.f32.mrf.mxu1  ;;  %v3521_v2 = vpop.f32.mrf.mxu3  ;;  %v2626_v10 = vmul.f32 %v6799_v46, %v8173_v12  ;;  %v8180_v12 = vld [vmem:[#allocation115_spill] sm:$0xff] }
 0x41d   : > { %v3522_v49 = vadd.f32 %v3521_v2, %v3409_v35  ;;  %3681 = vmatmul.f32.gmra.mxu0 %v2612_v17  ;;  %v3299_v8 = vadd.f32 %v3298_v57, %v8170_v27  ;;  %v8174_v35 = vld [vmem:[#allocation203_spill] sm:$0xff] }
 0x41e   : > { %v2627_v43 = vmul.f32 %v6799_v46, %v8174_v35  ;;  %v8181_v35 = vld [vmem:[#allocation6_spill] sm:$0xff] }
 0x41f   : > { %v7371_v6 = vadd.f32 %v3634_v7, %v3522_v49  ;;  %3345 = vmatmul.f32.gmra.mxu1 %v2617_v55  ;;  %3458 = vmatmul.f32.gmra.mxu2 %v2618_v38  ;;  %v8175_v49 = vld [vmem:[#allocation37_spill] sm:$0xff]  ;;  %v7398_v56 = vpop.permute.xlu2 %1644  ;;  %v8176_v38 = vld [vmem:[#allocation111_spill] sm:$0xff] }
 0x420   : > { %v2628_v48 = vmul.f32 %v6799_v46, %v8175_v49  ;;  %v2633_v59 = vmul.f32 %v6854_v47, %v8176_v38 }
 0x421   : > { %8168 = vst [vmem:[#allocation86_spill] sm:$0xff] %v7371_v6  ;;  %3571 = vmatmul.f32.gmra.mxu3 %v2619_v1  ;;  %v8177_v1 = vld [vmem:[#allocation204_spill] sm:$0xff] }
 0x422   : > { %v3411_v63 = vpop.f32.mrf.mxu2  ;;  %v3637_v19 = vpop.f32.mrf.mxu0  ;;  %v2634_v27 = vmul.f32 %v6854_v47, %v8177_v1  ;;  %v8200_v6 = vld [vmem:[#allocation48_spill] sm:$0xff] }
 0x423   : > { %v3412_v3 = vadd.f32 %v3411_v63, %v3299_v8  ;;  %v7390_v17 = vpop.permute.xlu1 %1686  ;;  %v8178_v63 = vld [vmem:[#allocation41_spill] sm:$0xff] }
 0x424   : > { %v7380_v22 = vpop.f32.mrf.mxu1  ;;  %v3524_v11 = vpop.f32.mrf.mxu3  ;;  %v2635_v46 = vmul.f32 %v6854_v47, %v8178_v63 }
 0x425   : > { %v3525_v58 = vadd.f32 %v3524_v11, %v3412_v3  ;;  %3684 = vmatmul.f32.gmra.mxu0 %v2620_v4  ;;  %v8179_v4 = vld [vmem:[#allocation45_spill] sm:$0xff] }
 0x426   : > { %v7408_v8 = vpop.permute.xlu0 %1689  ;;  %v2636_v11 = vmul.f32 %v6854_v47, %v8179_v4 }
 0x427   : > { %v7386_v7 = vadd.f32 %v3637_v19, %v3525_v58  ;;  %3348 = vmatmul.f32.gmra.mxu1 %v2625_v13  ;;  %3461 = vmatmul.f32.gmra.mxu2 %v2626_v10  ;;  %v7420_v58 = vpop.permute.xlu2 %1641  ;;  %v2641_v10 = vmul.f32 %v6903_v31, %v8180_v12  ;;  %v8184_v12 = vld [vmem:[#allocation119_spill] sm:$0xff] }
 0x429   : > { %3574 = vmatmul.f32.gmra.mxu3 %v2627_v43  ;;  %v2642_v43 = vmul.f32 %v6903_v31, %v8181_v35  ;;  %v8185_v35 = vld [vmem:[#allocation166_spill] sm:$0xff] }
 0x42a   : > { %v7392_v57 = vpop.f32.mrf.mxu2  ;;  %v7394_v2 = vpop.f32.mrf.mxu0 }
 0x42b   : > { %v7412_v19 = vpop.permute.xlu1 %1683 }
 0x42c   : > { %v7400_v55 = vpop.f32.mrf.mxu1  ;;  %v7402_v9 = vpop.f32.mrf.mxu3 }
 0x42d   : > { %3687 = vmatmul.f32.gmra.mxu0 %v2628_v48  ;;  %v8182_v48 = vld [vmem:[#allocation39_spill] sm:$0xff] }
 0x42e   : > { %v7430_v49 = vpop.permute.xlu0 %1680  ;;  %v2643_v47 = vmul.f32 %v6903_v31, %v8182_v48 }
 0x42f   : > { %3351 = vmatmul.f32.gmra.mxu1 %v2633_v59  ;;  %3464 = vmatmul.f32.gmra.mxu2 %v2634_v27  ;;  %v8183_v27 = vld [vmem:[#allocation40_spill] sm:$0xff] }
 0x430   : > { %v2644_v63 = vmul.f32 %v6903_v31, %v8183_v27 }
 0x431   : > { %3577 = vmatmul.f32.gmra.mxu3 %v2635_v46  ;;  %v7442_v46 = vpop.permute.xlu2 %1677 }
 0x432   : > { %v7414_v3 = vpop.f32.mrf.mxu2  ;;  %v7416_v15 = vpop.f32.mrf.mxu0 }
 0x433   : > { %v7434_v38 = vpop.permute.xlu1 %1638 }
 0x434   : > { %v7422_v53 = vpop.f32.mrf.mxu1  ;;  %v7424_v13 = vpop.f32.mrf.mxu3 }
 0x435   : > { %3690 = vmatmul.f32.gmra.mxu0 %v2636_v11 }
 0x436   : > { %v7452_v48 = vpop.permute.xlu0 %1635 }
 0x437   : > { %3354 = vmatmul.f32.gmra.mxu1 %v2641_v10  ;;  %3467 = vmatmul.f32.gmra.mxu2 %v2642_v43  ;;  %v2649_v10 = vmul.f32 %v6952_v34, %v8184_v12  ;;  %v2650_v43 = vmul.f32 %v6952_v34, %v8185_v35 }
 0x439   : > { %3580 = vmatmul.f32.gmra.mxu3 %v2643_v47  ;;  %v8186_v47 = vld [vmem:[#allocation9_spill] sm:$0xff]  ;;  %v7464_v33 = vpop.permute.xlu2 %1632 }
 0x43a   : > { %v7436_v59 = vpop.f32.mrf.mxu2  ;;  %v7438_v1 = vpop.f32.mrf.mxu0  ;;  %v2651_v31 = vmul.f32 %v6952_v34, %v8186_v47  ;;  %v8189_v47 = vld [vmem:[#allocation43_spill] sm:$0xff] }
 0x43b   : > { %v7456_v27 = vpop.permute.xlu1 %1674  ;;  %v2658_v60 = vmul.f32 %v7001_v0, %v8189_v47 }
 0x43c   : > { %v7444_v4 = vpop.f32.mrf.mxu1  ;;  %v7446_v11 = vpop.f32.mrf.mxu3 }
 0x43d   : > { %3693 = vmatmul.f32.gmra.mxu0 %v2644_v63  ;;  %v8187_v63 = vld [vmem:[#allocation49_spill] sm:$0xff] }
 0x43e   : > { %v2652_v12 = vmul.f32 %v6952_v34, %v8187_v63 }
 0x43f   : > { %3357 = vmatmul.f32.gmra.mxu1 %v2649_v10  ;;  %3470 = vmatmul.f32.gmra.mxu2 %v2650_v43  ;;  %v8188_v10 = vld [vmem:[#allocation123_spill] sm:$0xff] }
 0x440   : > { %v2657_v43 = vmul.f32 %v7001_v0, %v8188_v10 }
 0x441   : > { %3583 = vmatmul.f32.gmra.mxu3 %v2651_v31  ;;  %v7472_v31 = vpop.permute.xlu0 %1671  ;;  %v7482_v10 = vpop.permute.xlu2 %1668 }
 0x442   : > { %v7458_v45 = vpop.f32.mrf.mxu2  ;;  %v7460_v18 = vpop.f32.mrf.mxu0 }
 0x443   : > { %v7476_v34 = vpop.permute.xlu1 %1629 }
 0x444   : > { %v3313_v35 = vpop.f32.mrf.mxu1  ;;  %v7466_v29 = vpop.f32.mrf.mxu3 }
 0x445   : > { %3696 = vmatmul.f32.gmra.mxu0 %v2652_v12  ;;  %v8191_v12 = vld [vmem:[#allocation47_spill] sm:$0xff] }
 0x446   : > { %v2660_v25 = vmul.f32 %v7001_v0, %v8191_v12 }
 0x447   : > { %3360 = vmatmul.f32.gmra.mxu1 %v2657_v43  ;;  %3473 = vmatmul.f32.gmra.mxu2 %v2658_v60  ;;  %v2665_v60 = vmul.f32 %v7050_v28, %v8192_v5  ;;  %v8193_v43 = vld [vmem:[#allocation12_spill] sm:$0xff] }
 0x448   : > { %v2666_v23 = vmul.f32 %v7050_v28, %v8193_v43  ;;  %v8196_v43 = vld [vmem:[#allocation131_spill] sm:$0xff] }
 0x449   : > { %3586 = vmatmul.f32.gmra.mxu3 %v2659_v62  ;;  %v7488_v16 = vpop.permute.xlu0 %1626  ;;  %v8194_v62 = vld [vmem:[#allocation44_spill] sm:$0xff]  ;;  %v7496_v26 = vpop.permute.xlu2 %1623 }
 0x44a   : > { %v3426_v63 = vpop.f32.mrf.mxu2  ;;  %v7478_v37 = vpop.f32.mrf.mxu0  ;;  %v2667_v24 = vmul.f32 %v7050_v28, %v8194_v62 }
 0x44b   : > { %v7492_v32 = vpop.permute.xlu1 %1665 }
 0x44c   : > { %v3316_v41 = vpop.f32.mrf.mxu1  ;;  %v3539_v47 = vpop.f32.mrf.mxu3 }
 0x44d   : > { %3699 = vmatmul.f32.gmra.mxu0 %v2660_v25  ;;  %v2668_v25 = vmul.f32 %v7050_v28, %v8195_v54  ;;  %v8199_v28 = vld [vmem:[#allocation68_spill] sm:$0xff]  ;;  %v3317_v54 = vadd.f32 %v3316_v41, %v7083_v36  ;;  %v2676_v36 = vmul.f32 %v7075_v52, %v8200_v6 }
 0x44e   : > { %vm1725_vm2 = vcmp.eq.s32.totalorder %v8199_v28, %v7378_v40  ;;  %vm1724_vm4 = vcmp.eq.s32.totalorder %v8199_v28, %v7408_v8  ;;  %vm1709_vm11 = vcmp.eq.s32.totalorder %v8199_v28, %v7398_v56  ;;  %vm1723_vm12 = vcmp.eq.s32.totalorder %v8199_v28, %v7390_v17 }
 0x44f   : > { %3363 = vmatmul.f32.gmra.mxu1 %v2665_v60  ;;  %3476 = vmatmul.f32.gmra.mxu2 %v2666_v23  ;;  %v2673_v60 = vmul.f32 %v7075_v52, %v8196_v43  ;;  %v8197_v23 = vld [vmem:[#allocation174_spill] sm:$0xff]  ;;  %v4551_v43 = vmov 1.0   ;;  %vm1708_vm13 = vcmp.eq.s32.totalorder %v8199_v28, %v7420_v58  ;;  %vm1722_vm14 = vcmp.eq.s32.totalorder %v8199_v28, %v7412_v19  ;;  %v8202_v19 = vld [vmem:[#allocation56_spill] sm:$0xff] }
 0x450   : > { %v2674_v50 = vmul.f32 %v7075_v52, %v8197_v23  ;;  %4400 = vmatpush.lsf.msk.msk.msrb.mxu2 %vm1725_vm2, %v4551_v43  ;;  %v3314_v23 = vadd.f32 %v3313_v35, %v7067_v30  ;;  %4384 = vmatpush.lsf.msk.msk.msrb.mxu1 %vm1709_vm11, %v4551_v43  ;;  %v3311_v30 = vadd.f32 %v7444_v4, %v7024_v14  ;;  %v8201_v14 = vld [vmem:[#allocation59_spill] sm:$0xff] }
 0x451   : > { %3589 = vmatmul.f32.gmra.mxu3 %v2667_v24  ;;  %v7502_v62 = vpop.permute.xlu0 %1662  ;;  %v8198_v24 = vld [vmem:[#allocation15_spill] sm:$0xff]  ;;  %vm1707_vm15 = vcmp.eq.s32.totalorder %v8199_v28, %v7434_v38  ;;  %v3308_v17 = vadd.f32 %v7422_v53, %v8201_v14  ;;  %vm1721_vm0 = vcmp.eq.s32.totalorder %v8199_v28, %v7430_v49  ;;  %vm1706_vm1 = vcmp.eq.s32.totalorder %v8199_v28, %v7452_v48 }
 0x452   : > { %v3429_v0 = vpop.f32.mrf.mxu2  ;;  %v3655_v12 = vpop.f32.mrf.mxu0  ;;  %v2675_v61 = vmul.f32 %v7075_v52, %v8198_v24  ;;  %4401 = vmatpush.lsf.msk.msk.msrb.mxu2 %vm1724_vm4, %v4551_v43  ;;  %4385 = vmatpush.lsf.msk.msk.msrb.mxu1 %vm1708_vm13, %v4551_v43  ;;  %v3305_v38 = vadd.f32 %v7400_v55, %v8202_v19  ;;  %vm1720_vm3 = vcmp.eq.s32.totalorder %v8199_v28, %v7442_v46  ;;  %v8211_v19 = vld [vmem:[#allocation24_spill] sm:$0xff] }
 0x453   : > { %v7506_v42 = vpop.permute.xlu1 %1620  ;;  %v3430_v24 = vadd.f32 %v3429_v0, %v3317_v54  ;;  %v3421_v53 = vadd.f32 %v7436_v59, %v3308_v17  ;;  %vm1705_vm5 = vcmp.eq.s32.totalorder %v8199_v28, %v7464_v33  ;;  %vm1719_vm6 = vcmp.eq.s32.totalorder %v8199_v28, %v7456_v27 }
 0x454   : > { %v3319_v5 = vpop.f32.mrf.mxu1  ;;  %v3542_v21 = vpop.f32.mrf.mxu3  ;;  %4402 = vmatpush.lsf.msk.msk.msrb.mxu2 %vm1723_vm12, %v4551_v43  ;;  %4386 = vmatpush.lsf.msk.msk.msrb.mxu1 %vm1707_vm15, %v4551_v43  ;;  %v3418_v55 = vadd.f32 %v7414_v3, %v3305_v38  ;;  %vm1704_vm7 = vcmp.eq.s32.totalorder %v8199_v28, %v7476_v34  ;;  %vm1718_vm9 = vcmp.eq.s32.totalorder %v8199_v28, %v7472_v31 }
 0x455   : > { %3702 = vmatmul.f32.gmra.mxu0 %v2668_v25  ;;  %v3320_v25 = vadd.f32 %v3319_v5, %v7093_v44  ;;  %v7522_v44 = vpop.permute.xlu2 %1659  ;;  %v3543_v56 = vadd.f32 %v3542_v21, %v3430_v24  ;;  %v3424_v21 = vadd.f32 %v7458_v45, %v3311_v30  ;;  %vm1703_vm10 = vcmp.eq.s32.totalorder %v8199_v28, %v7488_v16 }
 0x456   : > { %4403 = vmatpush.lsf.msk.msk.msrb.mxu2 %vm1722_vm14, %v4551_v43  ;;  %vm1717_vm2 = vcmp.eq.s32.totalorder %v8199_v28, %v7482_v10  ;;  %vm1702_vm4 = vcmp.eq.s32.totalorder %v8199_v28, %v7496_v26  ;;  %vm1716_vm11 = vcmp.eq.s32.totalorder %v8199_v28, %v7492_v32  ;;  %vm1701_vm12 = vcmp.eq.s32.totalorder %v8199_v28, %v7506_v42 }
 0x457   : > { %3366 = vmatmul.f32.gmra.mxu1 %v2673_v60  ;;  %3479 = vmatmul.f32.gmra.mxu2 %v2674_v50  ;;  %v3537_v45 = vadd.f32 %v7466_v29, %v3424_v21  ;;  %v3534_v29 = vadd.f32 %v7446_v11, %v3421_v53  ;;  %vm1715_vm13 = vcmp.eq.s32.totalorder %v8199_v28, %v7502_v62  ;;  %v8212_v53 = vld [vmem:[#allocation73_spill] sm:$0xff] }
 0x458   : > { %4404 = vmatpush.lsf.msk.msk.msrb.mxu2 %vm1721_vm0, %v4551_v43  ;;  %vm1714_vm15 = vcmp.eq.s32.totalorder %v8199_v28, %v7522_v44  ;;  %v8206_v44 = vld [vmem:[#allocation65_spill] sm:$0xff] }
 0x459   : > { %3592 = vmatmul.f32.gmra.mxu3 %v2675_v61  ;;  %v3427_v61 = vadd.f32 %v3426_v63, %v3314_v23  ;;  %v7531_v35 = vpop.permute.xlu0 %1617  ;;  %v3656_v63 = vadd.f32 %v3655_v12, %v3543_v56  ;;  %v3650_v33 = vadd.f32 %v7460_v18, %v3537_v45 }
 0x45a   : > { %v3432_v60 = vpop.f32.mrf.mxu2  ;;  %v3658_v50 = vpop.f32.mrf.mxu0  ;;  %4405 = vmatpush.lsf.msk.msk.msrb.mxu2 %vm1720_vm3, %v4551_v43  ;;  %vm1700_vm14 = vcmp.eq.s32.totalorder %v8199_v28, %v7531_v35  ;;  %v8209_v35 = vld [vmem:[#allocation82_spill] sm:$0xff] }
 0x45b   : > { %v3433_v40 = vadd.f32 %v3432_v60, %v3320_v25  ;;  %v7542_v4 = vpop.permute.xlu1 %1656 }
 0x45c   : > { %v3322_v41 = vpop.f32.mrf.mxu1  ;;  %v3545_v8 = vpop.f32.mrf.mxu3  ;;  %4406 = vmatpush.lsf.msk.msk.msrb.mxu2 %vm1719_vm6, %v4551_v43 }
 0x45d   : > { %v3323_v52 = vadd.f32 %v3322_v41, %v7103_v39  ;;  %v3546_v6 = vadd.f32 %v3545_v8, %v3433_v40  ;;  %3705 = vmatmul.f32.gmra.mxu0 %v2676_v36  ;;  %v3540_v39 = vadd.f32 %v3539_v47, %v3427_v61  ;;  %v8203_v47 = vld [vmem:[#allocation21_spill] sm:$0xff] }
 0x45e   : > { %v3302_v0 = vadd.f32 %v7380_v22, %v8203_v47  ;;  %v1615_v22 = vpop.permute.xlu2 %1614  ;;  %4407 = vmatpush.lsf.msk.msk.msrb.mxu2 %vm1718_vm9, %v4551_v43  ;;  %v8207_v41 = vld [vmem:[#allocation77_spill] sm:$0xff] }
 0x45f   : > { %v3659_v58 = vadd.f32 %v3658_v50, %v3546_v6  ;;  %v3653_v49 = vadd.f32 %v7478_v37, %v3540_v39  ;;  %v3531_v37 = vadd.f32 %v7424_v13, %v3418_v55  ;;  %v3647_v13 = vadd.f32 %v7438_v1, %v3534_v29  ;;  %v8205_v50 = vld [vmem:[#allocation80_spill] sm:$0xff] }
 0x460   : > { %v3415_v48 = vadd.f32 %v7392_v57, %v3302_v0  ;;  %4408 = vmatpush.lsf.msk.msk.msrb.mxu2 %vm1717_vm2, %v4551_v43  ;;  %vm1699_vm0 = vcmp.eq.s32.totalorder %v8199_v28, %v1615_v22  ;;  %v8210_v39 = vld [vmem:[#allocation76_spill] sm:$0xff] }
 0x461   : > { %3773 = vmatpush.msra.mxu1 %v3659_v58  ;;  %v1654_v11 = vpop.permute.xlu0 %1653  ;;  %v3644_v16 = vadd.f32 %v7416_v15, %v3531_v37  ;;  %v8214_v55 = vld [vmem:[#allocation60_spill] sm:$0xff] }
 0x462   : > { %v3435_v5 = vpop.f32.mrf.mxu2  ;;  %v3661_v54 = vpop.f32.mrf.mxu0  ;;  %v3528_v46 = vadd.f32 %v7402_v9, %v3415_v48  ;;  %4409 = vmatpush.lsf.msk.msk.msrb.mxu2 %vm1716_vm11, %v4551_v43 }
 0x463   : > { %4387 = vmatpush.lsf.msk.msk.msrb.mxu1 %vm1706_vm1, %v4551_v43  ;;  %v3436_v59 = vadd.f32 %v3435_v5, %v3323_v52  ;;  %vm1713_vm1 = vcmp.eq.s32.totalorder %v8199_v28, %v7542_v4  ;;  %v8208_v52 = vld [vmem:[#allocation17_spill] sm:$0xff] }
 0x464   : > { %v3325_v12 = vpop.f32.mrf.mxu1  ;;  %v3548_v25 = vpop.f32.mrf.mxu3  ;;  %v3641_v26 = vadd.f32 %v7394_v2, %v3528_v46  ;;  %4410 = vmatpush.lsf.msk.msk.msrb.mxu2 %vm1715_vm13, %v4551_v43 }
 0x465   : > { %3774 = vmatpush.msra.mxu1 %v3656_v63  ;;  %v3326_v57 = vadd.f32 %v3325_v12, %v7113_v51  ;;  %v3549_v3 = vadd.f32 %v3548_v25, %v3436_v59  ;;  %v1612_v51 = vpop.permute.xlu1 %1611  ;;  %v8213_v63 = vld [vmem:[#allocation14_spill] sm:$0xff] }
 0x466   : > { %v1651_v31 = vpop.permute.xlu2 %1650  ;;  %vm1698_vm3 = vcmp.eq.s32.totalorder %v8199_v28, %v1612_v51  ;;  %4411 = vmatpush.lsf.msk.msk.msrb.mxu2 %vm1714_vm15, %v4551_v43 }
 0x467   : > { %4388 = vmatpush.lsf.msk.msk.msrb.mxu1 %vm1705_vm5, %v4551_v43  ;;  %v7586_v18 = vadd.f32 %v3661_v54, %v3549_v3  ;;  %vm1712_vm5 = vcmp.eq.s32.totalorder %v8199_v28, %v1654_v11 }
 0x468   : > { %4412 = vmatpush.lsf.msk.msk.msrb.mxu2 %vm1713_vm1, %v4551_v43 }
 0x469   : > { %3775 = vmatpush.msra.mxu1 %v3653_v49  ;;  %v1609_v2 = vpop.permute.xlu0 %1608 }
 0x46a   : > { %v3438_v9 = vpop.f32.mrf.mxu2  ;;  %v3664_v27 = vpop.f32.mrf.mxu0  ;;  %vm1697_vm6 = vcmp.eq.s32.totalorder %v8199_v28, %v1609_v2  ;;  %4413 = vmatpush.lsf.msk.msk.msrb.mxu2 %vm1712_vm5, %v4551_v43 }
 0x46b   : > { %4389 = vmatpush.lsf.msk.msk.msrb.mxu1 %vm1704_vm7, %v4551_v43  ;;  %v3439_v1 = vadd.f32 %v3438_v9, %v3326_v57  ;;  %vm1711_vm7 = vcmp.eq.s32.totalorder %v8199_v28, %v1651_v31 }
 0x46c   : > { %v3328_v34 = vpop.f32.mrf.mxu1  ;;  %v3551_v15 = vpop.f32.mrf.mxu3  ;;  %4414 = vmatpush.lsf.msk.msk.msrb.mxu2 %vm1711_vm7, %v4551_v43 }
 0x46d   : > { %3776 = vmatpush.msra.mxu1 %v3650_v33  ;;  %v3329_v32 = vadd.f32 %v3328_v34, %v7123_v20  ;;  %v3552_v42 = vadd.f32 %v3551_v15, %v3439_v1  ;;  %v1648_v62 = vpop.permute.xlu1 %1647  ;;  %v8204_v20 = vld [vmem:[#allocation86_spill] sm:$0xff]  ;;  %v8215_v33 = vld [vmem:[#allocation63_spill] sm:$0xff] }
 0x46e   : > { %v1606_v24 = vpop.permute.xlu2 %1605  ;;  %vm1710_vm2 = vcmp.eq.s32.totalorder %v8199_v28, %v1648_v62  ;;  %v8217_v62 = vld [vmem:[#allocation8_spill] sm:$0xff] }
 0x46f   : > { %4390 = vmatpush.lsf.msk.msk.msrb.mxu1 %vm1703_vm10, %v4551_v43  ;;  %v7614_v10 = vadd.f32 %v3664_v27, %v3552_v42  ;;  %vm1696_vm9 = vcmp.eq.s32.totalorder %v8199_v28, %v1606_v24  ;;  %4415 = vmatpush.lsf.msk.msk.msrb.mxu2 %vm1710_vm2, %v4551_v43  ;;  %v8216_v27 = vld [vmem:[#allocation70_spill] sm:$0xff] }
 0x470   : > { %4381 = vllmr.2.mxu2 }
 0x471   : > { %3777 = vmatpush.msra.mxu1 %v3647_v13  ;;  %v1603_v8 = vpop.permute.xlu0 %1602 }
 0x472   : > { %v3441_v23 = vpop.f32.mrf.mxu2  ;;  %v3667_v60 = vpop.f32.mrf.mxu0  ;;  %vm1695_vm10 = vcmp.eq.s32.totalorder %v8199_v28, %v1603_v8 }
 0x473   : > { %4391 = vmatpush.lsf.msk.msk.msrb.mxu1 %vm1702_vm4, %v4551_v43 }
 0x474   : > { %v3331_v40 = vpop.f32.mrf.mxu1  ;;  %v3554_v36 = vpop.f32.mrf.mxu3 }
 0x475   : > { %3778 = vmatpush.msra.mxu1 %v3644_v16  ;;  %v3332_v30 = vadd.f32 %v3331_v40, %v8206_v44  ;;  %v1600_v6 = vpop.permute.xlu1 %1599 }
 0x476   : > { %vm1694_vm4 = vcmp.eq.s32.totalorder %v8199_v28, %v1600_v6 }
 0x477   : > { %4392 = vmatpush.lsf.msk.msk.msrb.mxu1 %vm1701_vm12, %v4551_v43 }
 0x479   : > { %3779 = vmatpush.msra.mxu1 %v3641_v26 }
 0x47a   : > { %v3444_v14 = vpop.f32.mrf.mxu2  ;;  %v3670_v17 = vpop.f32.mrf.mxu0 }
 0x47b   : > { %4393 = vmatpush.lsf.msk.msk.msrb.mxu1 %vm1700_vm14, %v4551_v43  ;;  %v3445_v21 = vadd.f32 %v3444_v14, %v3332_v30 }
 0x47c   : > { %v3334_v58 = vpop.f32.mrf.mxu1  ;;  %v3557_v4 = vpop.f32.mrf.mxu3 }
 0x47d   : > { %3780 = vmatpush.msra.mxu1 %v7386_v7  ;;  %v3442_v7 = vadd.f32 %v3441_v23, %v3329_v32  ;;  %v3335_v38 = vadd.f32 %v3334_v58, %v8211_v19  ;;  %v3558_v28 = vadd.f32 %v3557_v4, %v3445_v21 }
 0x47f   : > { %4394 = vmatpush.lsf.msk.msk.msrb.mxu1 %vm1699_vm0, %v4551_v43  ;;  %v3555_v61 = vadd.f32 %v3554_v36, %v3442_v7  ;;  %v7649_v45 = vadd.f32 %v3670_v17, %v3558_v28 }
 0x481   : > { %3781 = vmatpush.msra.mxu1 %v8204_v20  ;;  %v7637_v56 = vadd.f32 %v3667_v60, %v3555_v61 }
 0x482   : > { %v3447_v47 = vpop.f32.mrf.mxu2  ;;  %v3673_v0 = vpop.f32.mrf.mxu0 }
 0x483   : > { %4395 = vmatpush.lsf.msk.msk.msrb.mxu1 %vm1698_vm3, %v4551_v43  ;;  %v3448_v5 = vadd.f32 %v3447_v47, %v3335_v38 }
 0x484   : > { %v3560_v54 = vpop.f32.mrf.mxu3 }
 0x485   : > { %3782 = vmatpush.msra.mxu1 %v8205_v50  ;;  %v3561_v49 = vadd.f32 %v3560_v54, %v3448_v5 }
 0x487   : > { %4396 = vmatpush.lsf.msk.msk.msrb.mxu1 %vm1697_vm6, %v4551_v43  ;;  %v7653_v59 = vadd.f32 %v3673_v0, %v3561_v49  ;;  %v8218_v49 = vld [vmem:[#allocation72_spill] sm:$0xff] }
 0x489   : > { %3783 = vmatpush.msra.mxu1 %v8207_v41 }
 0x48a   : > { %v3450_v22 = vpop.f32.mrf.mxu2  ;;  %v3676_v48 = vpop.f32.mrf.mxu0 }
 0x48b   : > { %4397 = vmatpush.lsf.msk.msk.msrb.mxu1 %vm1696_vm9, %v4551_v43 }
 0x48c   : > { %v3563_v37 = vpop.f32.mrf.mxu3 }
 0x48d   : > { %3784 = vmatpush.msra.mxu1 %v8208_v52 }
 0x48f   : > { %4398 = vmatpush.lsf.msk.msk.msrb.mxu1 %vm1695_vm10, %v4551_v43 }
 0x491   : > { %3785 = vmatpush.msra.mxu1 %v8209_v35 }
 0x492   : > { %v3453_v46 = vpop.f32.mrf.mxu2  ;;  %v3679_v13 = vpop.f32.mrf.mxu0 }
 0x493   : > { %4399 = vmatpush.lsf.msk.msk.msrb.mxu1 %vm1694_vm4, %v4551_v43  ;;  %v3337_v43 = vpop.f32.mrf.mxu1 }
 0x494   : > { %4359 = vllmr.2.mxu1  ;;  %v3338_v29 = vadd.f32 %v3337_v43, %v8214_v55  ;;  %v3566_v9 = vpop.f32.mrf.mxu3 }
 0x495   : > { %3786 = vmatpush.msra.mxu1 %v8210_v39 }
 0x496   : > { %v3451_v12 = vadd.f32 %v3450_v22, %v3338_v29 }
 0x497   : > { %3787 = vmatpush.msra.mxu1 %v8212_v53 }
 0x498   : > { %v3564_v3 = vadd.f32 %v3563_v37, %v3451_v12  ;;  %v8220_v37 = vld [vmem:[#allocation69_spill] sm:$0xff] }
 0x499   : > { %3788 = vmatpush.msra.mxu1 %v8213_v63 }
 0x49a   : > { %v7656_v11 = vadd.f32 %v3676_v48, %v3564_v3  ;;  %v3456_v34 = vpop.f32.mrf.mxu2  ;;  %v3682_v15 = vpop.f32.mrf.mxu0  ;;  %v8219_v48 = vld [vmem:[#allocation78_spill] sm:$0xff] }
 0x49b   : > { %v3340_v25 = vpop.f32.mrf.mxu1 }
 0x49c   : > { %v3341_v57 = vadd.f32 %v3340_v25, %v8215_v33  ;;  %v3569_v2 = vpop.f32.mrf.mxu3 }
 0x49e   : > { %v3454_v51 = vadd.f32 %v3453_v46, %v3341_v57 }
 0x4a0   : > { %v3567_v1 = vadd.f32 %v3566_v9, %v3454_v51 }
 0x4a2   : > { %v7659_v31 = vadd.f32 %v3679_v13, %v3567_v1  ;;  %v3459_v7 = vpop.f32.mrf.mxu2  ;;  %v3685_v50 = vpop.f32.mrf.mxu0  ;;  %v8221_v13 = vld [vmem:[#allocation11_spill] sm:$0xff]  ;;  %v8222_v1 = vld [vmem:[#allocation74_spill] sm:$0xff] }
 0x4a3   : > { %v3343_v16 = vpop.f32.mrf.mxu1 }
 0x4a4   : > { %v3344_v26 = vadd.f32 %v3343_v16, %v8216_v27  ;;  %v3572_v36 = vpop.f32.mrf.mxu3 }
 0x4a6   : > { %v3457_v32 = vadd.f32 %v3456_v34, %v3344_v26 }
 0x4a8   : > { %v3570_v23 = vadd.f32 %v3569_v2, %v3457_v32  ;;  %v8223_v2 = vld [vmem:[#allocation67_spill] sm:$0xff] }
 0x4aa   : > { %v7662_v60 = vadd.f32 %v3682_v15, %v3570_v23  ;;  %v3462_v61 = vpop.f32.mrf.mxu2  ;;  %v3688_v41 = vpop.f32.mrf.mxu0 }
 0x4ab   : > { %v3346_v42 = vpop.f32.mrf.mxu1 }
 0x4ac   : > { %v3347_v20 = vadd.f32 %v3346_v42, %v8217_v62  ;;  %v3575_v52 = vpop.f32.mrf.mxu3 }
 0x4ae   : > { %v3460_v24 = vadd.f32 %v3459_v7, %v3347_v20 }
 0x4b0   : > { %v3573_v44 = vadd.f32 %v3572_v36, %v3460_v24 }
 0x4b2   : > { %v3686_v30 = vadd.f32 %v3685_v50, %v3573_v44  ;;  %v3465_v6 = vpop.f32.mrf.mxu2  ;;  %v3691_v35 = vpop.f32.mrf.mxu0  ;;  %v8224_v50 = vld [vmem:[#allocation64_spill] sm:$0xff] }
 0x4b3   : > { %v3349_v40 = vpop.f32.mrf.mxu1 }
 0x4b4   : > { %v3578_v17 = vpop.f32.mrf.mxu3  ;;  %v3350_v24 = vadd.f32 %v3349_v40, %v8224_v50 }
 0x4b5   : > { %4360 = vmatmul.lmr.bf16.vlgmr.msra.gmra.2.mxu1 }
 0x4ba   : > { %v3468_v21 = vpop.f32.mrf.mxu2  ;;  %v3694_v39 = vpop.f32.mrf.mxu0 }
 0x4bb   : > { %v3352_v8 = vpop.f32.mrf.mxu1 }
 0x4bc   : > { %v3581_v4 = vpop.f32.mrf.mxu3  ;;  %v3353_v62 = vadd.f32 %v3352_v8, %v8223_v2 }
 0x4bd   : > { %4361 = vmatmul.lmr.bf16.gmra.2.mxu1 }
 0x4be   : > { %v3466_v36 = vadd.f32 %v3465_v6, %v3353_v62 }
 0x4c2   : > { %v3471_v19 = vpop.f32.mrf.mxu2  ;;  %v3697_v38 = vpop.f32.mrf.mxu0 }
 0x4c3   : > { %v3355_v14 = vpop.f32.mrf.mxu1 }
 0x4c4   : > { %v3584_v53 = vpop.f32.mrf.mxu3  ;;  %v3356_v34 = vadd.f32 %v3355_v14, %v8222_v1 }
 0x4c6   : > { %v3469_v20 = vadd.f32 %v3468_v21, %v3356_v34 }
 0x4c8   : > { %v3582_v44 = vadd.f32 %v3581_v4, %v3469_v20 }
 0x4ca   : > { %v3474_v63 = vpop.f32.mrf.mxu2  ;;  %v3700_v47 = vpop.f32.mrf.mxu0 }
 0x4cb   : > { %v3358_v58 = vpop.f32.mrf.mxu1 }
 0x4cc   : > { %v3587_v5 = vpop.f32.mrf.mxu3  ;;  %v3359_v51 = vadd.f32 %v3358_v58, %v8221_v13 }
 0x4ce   : > { %v3472_v15 = vadd.f32 %v3471_v19, %v3359_v51  ;;  %v3695_v19 = vadd.f32 %v3694_v39, %v3582_v44 }
 0x4d0   : > { %v3585_v23 = vadd.f32 %v3584_v53, %v3472_v15 }
 0x4d2   : > { %v3477_v43 = vpop.f32.mrf.mxu2  ;;  %v3703_v54 = vpop.f32.mrf.mxu0 }
 0x4d3   : > { %v3361_v28 = vpop.f32.mrf.mxu1 }
 0x4d4   : > { %v3590_v55 = vpop.f32.mrf.mxu3  ;;  %v3362_v33 = vadd.f32 %v3361_v28, %v8220_v37  ;;  %v3463_v28 = vadd.f32 %v3462_v61, %v3350_v24 }
 0x4d6   : > { %v3475_v16 = vadd.f32 %v3474_v63, %v3362_v33  ;;  %v3579_v63 = vadd.f32 %v3578_v17, %v3466_v36  ;;  %v3576_v14 = vadd.f32 %v3575_v52, %v3463_v28 }
 0x4d8   : > { %v3588_v32 = vadd.f32 %v3587_v5, %v3475_v16  ;;  %v3692_v5 = vadd.f32 %v3691_v35, %v3579_v63  ;;  %v3689_v8 = vadd.f32 %v3688_v41, %v3576_v14 }
 0x4da   : > { %v3480_v25 = vpop.f32.mrf.mxu2  ;;  %v3706_v26 = vpop.f32.mrf.mxu0  ;;  %v3701_v58 = vadd.f32 %v3700_v47, %v3588_v32 }
 0x4db   : > { %v3364_v0 = vpop.f32.mrf.mxu1 }
 0x4dc   : > { %v3365_v22 = vadd.f32 %v3364_v0, %v8218_v49  ;;  %v3593_v46 = vpop.f32.mrf.mxu3  ;;  %v3698_v0 = vadd.f32 %v3697_v38, %v3585_v23 }
 0x4de   : > { %v3478_v57 = vadd.f32 %v3477_v43, %v3365_v22 }
 0x4e0   : > { %v3591_v9 = vadd.f32 %v3590_v55, %v3478_v57 }
 0x4e2   : > { %v3704_v7 = vadd.f32 %v3703_v54, %v3591_v9 }
 0x4e3   : > { %v3367_v29 = vpop.f32.mrf.mxu1 }
 0x4e4   : > { %v3368_v12 = vadd.f32 %v3367_v29, %v8219_v48 }
 0x4e6   : > { %v3481_v3 = vadd.f32 %v3480_v25, %v3368_v12 }
 0x4e8   : > { %v3594_v27 = vadd.f32 %v3593_v46, %v3481_v3 }
 0x4ea   : > { %v3707_v42 = vadd.f32 %v3706_v26, %v3594_v27 }
 0x4ec   : > { %3796 = vmatpush.msra.mxu2 %v3707_v42 }
 0x4ee   : > { %3797 = vmatpush.msra.mxu2 %v3704_v7 }
 0x4f0   : > { %3798 = vmatpush.msra.mxu2 %v3701_v58 }
 0x4f2   : > { %3799 = vmatpush.msra.mxu2 %v3698_v0 }
 0x4f4   : > { %3800 = vmatpush.msra.mxu2 %v3695_v19 }
 0x4f6   : > { %3801 = vmatpush.msra.mxu2 %v3692_v5 }
 0x4f8   : > { %3802 = vmatpush.msra.mxu2 %v3689_v8 }
 0x4fa   : > { %3803 = vmatpush.msra.mxu2 %v3686_v30  ;;  %v296_v30 = vld [vmem:[#allocation2] sm:$0xff] }
 0x4fc   : > { %3804 = vmatpush.msra.mxu2 %v7662_v60 }
 0x4fe   : > { %3805 = vmatpush.msra.mxu2 %v7659_v31  ;;  %v297_v31 = vld [vmem:[#allocation2 + $0x8] sm:$0xff] }
 0x500   : > { %3806 = vmatpush.msra.mxu2 %v7656_v11 }
 0x502   : > { %3807 = vmatpush.msra.mxu2 %v7653_v59 }
 0x504   : > { %3808 = vmatpush.msra.mxu2 %v7649_v45 }
 0x506   : > { %3809 = vmatpush.msra.mxu2 %v7637_v56 }
 0x508   : > { %3810 = vmatpush.msra.mxu2 %v7614_v10 }
 0x50a   : > { %3811 = vmatpush.msra.mxu2 %v7586_v18 }
 0x50b   : > { %4382 = vmatmul.lmr.bf16.vlgmr.msra.gmra.2.mxu2 }
 0x513   : > { %4383 = vmatmul.lmr.bf16.gmra.2.mxu2 }
 0x532   : > { %v3790_v40 = vpop.f32.mrf.mxu1 }
 0x53a   : > { %v3793_v11 = vpop.f32.mrf.mxu1 }
 0x58e   : > { %v3813_v61 = vpop.f32.mrf.mxu2 }
 0x58f   : > { %v3814_v60 = vadd.f32 %v3813_v61, %v3790_v40 }
 0x591   : > { %v3819_v41 = vadd.f32 %v3814_v60, %v296_v30 }
 0x593   : > { %3821 = vst.msk [vmem:[#allocation2] sm:$0xff] %vm2322_vm8, %v3819_v41 }
 0x596   : > { %v3816_v59 = vpop.f32.mrf.mxu2 }
 0x597   : > { %v3817_v52 = vadd.f32 %v3816_v59, %v3793_v11  ;;  %3826 = sbr.rel (%p4329_p5) target bundleno = 1717 (0x6b5), region = 56 }
 0x599   : > { %v3820_v45 = vadd.f32 %v3817_v52, %v297_v31 }
 0x59b   : > { %3822 = vst.msk [vmem:[#allocation2 + $0x8] sm:$0xff] %vm2322_vm8, %v3820_v45 }
 0x59c   : > { %v3827_v18 = vld [vmem:[%s7709_s2] sm:$0xff]  ;;  %v3828_v6 = vld [vmem:[%s7709_s2 + $0x8] sm:$0xff]  ;;  %v4552_v4 = vmov 32.0  }
 0x59d   : > { %v3829_v10 = vld [vmem:[#allocation2] sm:$0xff]  ;;  %4498 = vrcp.f32 %v4552_v4 }
 0x59e   : > { %v3831_v56 = vadd.f32 %v3829_v10, %v3827_v18  ;;  %v4496_v20 = vld [vmem:[%s7712_s5] ss:$0 sm:$0xff] }
 0x59f   : > { %v4497_v50 = vld [vmem:[%s7713_s6] ss:$0 sm:$0xff] }
 0x5a0   : > { %v3835_v17 = vsel %vm2322_vm8, %v3831_v56, 0.0 }
 0x5a1   : > { %3836 = vadd.xlane.f32.xlu0 %v3835_v17 }
 0x5a2   : > { %v3830_v35 = vld [vmem:[#allocation2 + $0x8] sm:$0xff] }
 0x5a3   : > { %v3832_v21 = vadd.f32 %v3830_v35, %v3828_v6  ;;  %v4499_v38 = vpop.eup %4498 }
 0x5a4   : > { %v3842_v53 = vmul.f32 32.0, %v4499_v38  ;;  %vm3846_vm11 = vweird.f32 %v4499_v38 }
 0x5a5   : > { %v3838_v39 = vsel %vm2322_vm8, %v3832_v21, 0.0 }
 0x5a6   : > { %v3843_v47 = vsub.f32 1.0, %v3842_v53 }
 0x5a8   : > { %v3844_v43 = vmul.f32 %v4499_v38, %v3843_v47 }
 0x5a9   : > { %3839 = vadd.xlane.f32.xlu0 %v3838_v39 }
 0x5aa   : > { %v3845_v54 = vadd.f32 %v4499_v38, %v3844_v43 }
 0x5ac   : > { %v3847_v55 = vsel %vm3846_vm11, %v4499_v38, %v3845_v54 }
 0x614   : > { %v3837_v29 = vpop.xlane.xlu0 %3836 }
 0x615   : > { %v3848_v49 = vmul.f32 %v3847_v55, %v3837_v29 }
 0x617   : > { %v3850_v22 = vsub.f32 %v3831_v56, %v3848_v49 }
 0x619   : > { %v3852_v48 = vmul.f32 %v3850_v22, %v3850_v22 }
 0x61b   : > { %v3854_v12 = vsel %vm2322_vm8, %v3852_v48, 0.0 }
 0x61c   : > { %3855 = vadd.xlane.f32.xlu1 %v3854_v12  ;;  %v3840_v25 = vpop.xlane.xlu0 %3839 }
 0x61d   : > { %v3849_v37 = vmul.f32 %v3847_v55, %v3840_v25 }
 0x61f   : > { %v3851_v33 = vsub.f32 %v3832_v21, %v3849_v37 }
 0x621   : > { %v3853_v57 = vmul.f32 %v3851_v33, %v3851_v33 }
 0x623   : > { %v3857_v3 = vsel %vm2322_vm8, %v3853_v57, 0.0 }
 0x624   : > { %3858 = vadd.xlane.f32.xlu1 %v3857_v3 }
 0x68f   : > { %v3856_v46 = vpop.xlane.xlu1 %3855 }
 0x690   : > { %v3860_v13 = vmul.f32 %v3856_v46, %v3847_v55 }
 0x692   : > { %v3862_v51 = vadd.f32 1e-05, %v3860_v13 }
 0x694   : > { %4500 = vrsqrt.f32 %v3862_v51  ;;  %vm3870_vm13 = vweird.f32 %v3862_v51 }
 0x697   : > { %v3859_v16 = vpop.xlane.xlu1 %3858 }
 0x698   : > { %v3861_v9 = vmul.f32 %v3859_v16, %v3847_v55 }
 0x69a   : > { %v4501_v27 = vpop.eup %4500  ;;  %v3863_v26 = vadd.f32 1e-05, %v3861_v9 }
 0x69b   : > { %v3865_v1 = vmul.f32 %v4501_v27, %v3862_v51  ;;  %vm3871_vm12 = vweird.f32 %v4501_v27 }
 0x69c   : > { %4502 = vrsqrt.f32 %v3863_v26  ;;  %vm3872_vm14 = vmor %vm3870_vm13, %vm3871_vm12  ;;  %vm3880_vm0 = vweird.f32 %v3863_v26 }
 0x69d   : > { %v3866_v34 = vmul.f32 %v4501_v27, %v3865_v1 }
 0x69f   : > { %v3867_v15 = vmul.f32 0.5, %v3866_v34 }
 0x6a1   : > { %v3868_v32 = vsub.f32 1.5, %v3867_v15 }
 0x6a2   : > { %v4503_v42 = vpop.eup %4502 }
 0x6a3   : > { %v3869_v2 = vmul.f32 %v4501_v27, %v3868_v32  ;;  %v3875_v62 = vmul.f32 %v4503_v42, %v3863_v26  ;;  %vm3881_vm15 = vweird.f32 %v4503_v42 }
 0x6a4   : > { %vm3882_vm1 = vmor %vm3880_vm0, %vm3881_vm15 }
 0x6a5   : > { %v3873_v23 = vsel %vm3872_vm14, %v4501_v27, %v3869_v2  ;;  %v3876_v7 = vmul.f32 %v4503_v42, %v3875_v62 }
 0x6a6   : > { %v3884_v24 = vmul.f32 %v3873_v23, %v3850_v22 }
 0x6a7   : > { %v3877_v36 = vmul.f32 0.5, %v3876_v7 }
 0x6a8   : > { %v3889_v44 = vmul.f32 %v4496_v20, %v3884_v24 }
 0x6a9   : > { %v3878_v58 = vsub.f32 1.5, %v3877_v36 }
 0x6aa   : > { %v3894_v28 = vadd.f32 %v4497_v50, %v3889_v44 }
 0x6ab   : > { %v3879_v63 = vmul.f32 %v4503_v42, %v3878_v58 }
 0x6ac   : > { %3896 = vst.msk [vmem:[#allocation3] sm:$0xff] %vm2322_vm8, %v3894_v28 }
 0x6ad   : > { %v3883_v0 = vsel %vm3882_vm1, %v4503_v42, %v3879_v63 }
 0x6ae   : > { %v3885_v14 = vmul.f32 %v3883_v0, %v3851_v33 }
 0x6b0   : > { %v3890_v19 = vmul.f32 %v4496_v20, %v3885_v14 }
 0x6b2   : > { %v3895_v5 = vadd.f32 %v4497_v50, %v3890_v19 }
 0x6b4   : > { %3897 = vst.msk [vmem:[#allocation3 + $0x8] sm:$0xff] %vm2322_vm8, %v3895_v5 }
 0x6b5 PF: > { %p4420_p6 = scmp.eq.s32.totalorder %s4604_s25, 1  ;;  %s4553_s22 = smov [#allocation3]  }
 0x6b6   : > { %s3903_s23 = sshll.u32 %s4553_s22, 4  ;;  %s3905_s28 = sshll.u32 %s7714_s7, 4  ;;  %s3904_s23 = int_to_ptr.vmem [resolvable:$true] %s3903_s23  ;;  %s3906_s28 = int_to_ptr.hbm [resolvable:$true] %s3905_s28 }
 0x6b7   : > { %s4554_s8 = smov 128   ;;  %s4555_s9 = smov 8  }
 0x6b8   : > { %4417 = dma.vmem_to_hbm [thread:$0]  (%p4420_p6), %s3904_s23, 256, %s3906_s28, [#allocation4], %s4554_s8, %s4554_s8, %s4555_s9  }
 0x6b9   : > { %4537 = dma.done.wait (%p4420_p6), [#allocation4], 256  }
 0x6ba   : > { %4539 = vsyncadd (%p4420_p6), [#allocation4], 4294967040 }
 0x6bb PF: > { %s18_s24 = sadd.s32 1, %s4542_s24  }
 0x6bc   : > { %p15_p7 = scmp.ge.s32.totalorder %s18_s24, 4  }
 0x6be   :  { %17 = sbr.rel (!%p15_p7) target bundleno = 1 (0x1), region = 86 }
 0x6c3   :  { %3922 = vsyncpa [#allocation4], 1 }
 0x6c4   :  { %3924 = vsyncpa [#allocation4 + $0x1], 1 }

</bundles_post_ra>
